<compile_context>
chip_gen: v7x
topology: tpu7x:2x2x1
jax: 0.10.0
libtpu: 0.0.40
codegen_flags: <defaults>
</compile_context>

<pallas_src>
import functools
import numpy as np
import jax
import jax.numpy as jnp
from jax import lax
from jax.experimental import pallas as pl
from jax.experimental.pallas import tpu as pltpu

MIN_VALUE = 0.0
MAX_VALUE = 6.4
K = 5
STRIDE = 2
PAD = 1
CIN = 3
CIN_PAD = 8          # cin padded to a full sublane group
COUT = 32
PAD_L = 128          # 128-aligned lane offset of y inside the pooling scratch


# --------------------------- fused Pallas kernel ------------------------------

def _fused_kernel(xflat_ref, wm_ref, b_ref, mask_ref, o_ref, big_ref, apad_ref,
                  *, k, cout, wp, m_acc, pad_l, min_value, max_value):
    # ---- im2col in VMEM: each tap writes one full, aligned 8-sublane group ----
    #   big[tap*8 + ci, m] = xflat[ci, m + kh*wp + kw]      (tap = kh*k + kw)
    for kh in range(k):
        for kw in range(k):
            tap = kh * k + kw
            off = kh * wp + kw
            big_ref[pl.ds(tap * CIN_PAD, CIN_PAD), :] = xflat_ref[:, pl.ds(off, m_acc)]

    # ---- transposed conv == ONE MXU matmul over the (k*k*8) contraction ----
    y = jnp.dot(wm_ref[...], big_ref[...], preferred_element_type=jnp.float32)
    # per-channel bias (lane broadcast) + -inf mask on the (wp-ow) garbage columns
    y = y + b_ref[...] + mask_ref[...]                       # (cout, m_acc)

    # ---- separable 3x3 stride-1 max pool with -inf halo, flat (row*wp + col) coords ----
    halo = wp + 1
    neg = jnp.full((cout, halo), -jnp.inf, dtype=jnp.float32)
    apad_ref[:, pad_l - halo:pad_l] = neg                    # left halo only
    apad_ref[:, pad_l + m_acc:pad_l + m_acc + halo] = neg    # right halo only
    apad_ref[:, pad_l:pad_l + m_acc] = y                     # 128-aligned big store

    ext = m_acc + 2
    base = pad_l - wp - 1
    s0 = apad_ref[:, base:base + ext]                        # row above
    s1 = apad_ref[:, base + wp:base + wp + ext]              # same row
    s2 = apad_ref[:, base + 2 * wp:base + 2 * wp + ext]      # row below
    vmax = jnp.maximum(jnp.maximum(s0, s1), s2)              # vertical 3-max
    hmax = jnp.maximum(jnp.maximum(vmax[:, 0:m_acc], vmax[:, 1:m_acc + 1]),
                       vmax[:, 2:m_acc + 2])                 # horizontal 3-max

    # ---- clamp and ONE lane-dense store (garbage cols clamp -inf -> 0, dropped later) ----
    o_ref[...] = jnp.clip(hmax, min_value, max_value)


# --------------------------- wrapper (thin XLA prep) ---------------------------

@jax.jit
def model_forward(x, wt, bias):
    n, cin, h, w = x.shape
    assert cin == CIN
    oh = (h - 1) * STRIDE - 2 * PAD + K
    ow = (w - 1) * STRIDE - 2 * PAD + K
    off = K - 1 - PAD
    hp = oh + K - 1
    wp = ow + K - 1
    m_acc = oh * wp                      # flat conv-output length (with garbage cols)
    lflat = (hp + 1) * wp                # one extra zero row so all shifted windows fit
    kkc = K * K * CIN_PAD                # 200: contraction dim fed to the MXU
    w_a = PAD_L + m_acc + wp + 1         # pooling scratch width (left/right halos included)

    # ReLU on the tiny raw input, then stride-2 zero-insertion + (k-1-p) zero padding,
    # with the channel axis zero-padded 3 -> 8 for sublane-aligned in-kernel copies.
    xr = jnp.maximum(x.astype(jnp.float32), 0.0)
    xu = jnp.zeros((n, CIN_PAD, hp + 1, wp), jnp.float32)
    xu = xu.at[:, :CIN, off:off + (h - 1) * STRIDE + 1:STRIDE,
                        off:off + (w - 1) * STRIDE + 1:STRIDE].set(xr)
    xflat = xu.reshape(n, CIN_PAD, lflat)

    # Weight as (COUT, (kh, kw, ci_pad8)) with flipped kernel; bias as a lane-broadcast column.
    wflip = wt[:, :, ::-1, ::-1]                                       # (CIN, COUT, K, K)
    wmat = wflip.transpose(1, 2, 3, 0).reshape(COUT, K * K, CIN)       # (COUT, 25, 3)
    wm = jnp.zeros((COUT, K * K, CIN_PAD), jnp.float32)
    wm = wm.at[:, :, :CIN].set(wmat.astype(jnp.float32)).reshape(COUT, kkc)
    b2 = bias.reshape(COUT, 1).astype(jnp.float32)

    # -inf additive mask for the (wp-ow) garbage columns (constant-folded by XLA).
    colmask = jnp.where((jnp.arange(m_acc) % wp) < ow, 0.0, -jnp.inf)
    colmask = colmask.reshape(1, m_acc).astype(jnp.float32)

    kernel = functools.partial(
        _fused_kernel, k=K, cout=COUT, wp=wp, m_acc=m_acc, pad_l=PAD_L,
        min_value=MIN_VALUE, max_value=MAX_VALUE)

    out_flat = pl.pallas_call(
        kernel,
        out_shape=jax.ShapeDtypeStruct((n, COUT, m_acc), jnp.float32),
        grid=(n,),
        in_specs=[
            pl.BlockSpec((None, CIN_PAD, lflat), lambda i: (i, 0, 0)),  # flat dilated input
            pl.BlockSpec((COUT, kkc), lambda i: (0, 0)),                # padded weight matrix
            pl.BlockSpec((COUT, 1), lambda i: (0, 0)),                  # bias column
            pl.BlockSpec((1, m_acc), lambda i: (0, 0)),                 # -inf column mask
        ],
        out_specs=pl.BlockSpec((None, COUT, m_acc), lambda i: (i, 0, 0)),
        scratch_shapes=[
            pltpu.VMEM((kkc, m_acc), jnp.float32),                      # im2col patches
            pltpu.VMEM((COUT, w_a), jnp.float32),                       # -inf halo pool buffer
        ],
        compiler_params=pltpu.CompilerParams(dimension_semantics=("parallel",)),
    )(xflat, wm, b2, colmask)

    # Drop the garbage columns with a fused XLA reshape+slice (cheap, outside the kernel).
    return out_flat.reshape(n, COUT, oh, wp)[..., :ow]


# --------------------------- reference (pure JAX) -----------------------------

def reference_forward(x, wt, bias):
    xr = jnp.maximum(x, 0.0)
    w_conv = jnp.transpose(wt, (1, 0, 2, 3))[:, :, ::-1, ::-1]        # (COUT, CIN, K, K)
    y = lax.conv_general_dilated(
        xr, w_conv, window_strides=(1, 1),
        padding=[(K - 1 - PAD, K - 1 - PAD)] * 2,
        lhs_dilation=(STRIDE, STRIDE),
        dimension_numbers=("NCHW", "OIHW", "NCHW"),
    ) + bias[None, :, None, None]
    pooled = lax.reduce_window(
        y, -jnp.inf, lax.max,
        window_dimensions=(1, 1, 3, 3), window_strides=(1, 1, 1, 1),
        padding=((0, 0), (0, 0), (1, 1), (1, 1)),
    )
    return jnp.clip(pooled, MIN_VALUE, MAX_VALUE)


# ------------------------------- main ----------------------------------------

if __name__ == "__main__":
    key = jax.random.PRNGKey(0)
    kx, kw_, kb = jax.random.split(key, 3)

    # deterministic parameter init (shapes from nn.ConvTranspose2d(3, 32, 5))
    fan = CIN * K * K
    bound = 1.0 / np.sqrt(fan)
    wt = jax.random.uniform(kw_, (CIN, COUT, K, K), jnp.float32, -bound, bound)
    bias = jax.random.uniform(kb, (COUT,), jnp.float32, -bound, bound)

    x = jax.random.normal(kx, (2, CIN, 16, 16), jnp.float32)

    out = jax.block_until_ready(model_forward(x, wt, bias))
    assert out.shape == (2, COUT, 33, 33), out.shape

    ref = jax.block_until_ready(reference_forward(x, wt, bias))
    np.testing.assert_allclose(np.asarray(out), np.asarray(ref), rtol=2e-2, atol=2e-2)

    print("KERNEL_OK")
</pallas_src>

<mosaic_0001>
module attributes {stable_mosaic.version = 11 : i64} {
  func.func @_fused_kernel(%arg0: i32, %arg1: memref<1x8x1406xf32, #tpu.memory_space<vmem>>, %arg2: memref<32x200xf32, #tpu.memory_space<vmem>>, %arg3: memref<32x1xf32, #tpu.memory_space<vmem>>, %arg4: memref<1x1221xf32, #tpu.memory_space<vmem>>, %arg5: memref<1x32x1221xf32, #tpu.memory_space<vmem>>, %arg6: memref<200x1221xf32, #tpu.memory_space<vmem>>, %arg7: memref<32x1387xf32, #tpu.memory_space<vmem>>) attributes {dimension_semantics = [#tpu.dimension_semantics<parallel>], iteration_bounds = array<i64: 2>, scalar_prefetch = 0 : i64, scratch_operands = 2 : i64, tpu.core_type = #tpu.core_type<tc>, window_params = [{transform_indices = @transform_0, window_bounds = array<i64: 1, 8, 1406>}, {pipeline_mode = #tpu.pipeline_mode<synchronous>, transform_indices = @transform_1, window_bounds = array<i64: 32, 200>}, {pipeline_mode = #tpu.pipeline_mode<synchronous>, transform_indices = @transform_2, window_bounds = array<i64: 32, 1>}, {pipeline_mode = #tpu.pipeline_mode<synchronous>, transform_indices = @transform_3, window_bounds = array<i64: 1, 1221>}, {transform_indices = @transform_4, window_bounds = array<i64: 1, 32, 1221>}]} {
    %c0 = arith.constant 0 : index
    %c0_0 = arith.constant 0 : index
    %c0_1 = arith.constant 0 : index
    %0 = vector.load %arg1[%c0, %c0_0, %c0_1] : memref<1x8x1406xf32, #tpu.memory_space<vmem>>, vector<1x8x1221xf32>
    %1 = vector.shape_cast %0 : vector<1x8x1221xf32> to vector<8x1221xf32>
    %c0_2 = arith.constant 0 : index
    %c0_3 = arith.constant 0 : index
    %2 = vector.load %arg6[%c0_2, %c0_3] : memref<200x1221xf32, #tpu.memory_space<vmem>>, vector<8x1221xf32>
    tpu.vector_store %arg6[%c0_2, %c0_3], %1 {strides = array<i32>} : memref<200x1221xf32, #tpu.memory_space<vmem>>, vector<8x1221xf32>,
    %c0_4 = arith.constant 0 : index
    %c0_5 = arith.constant 0 : index
    %c1 = arith.constant 1 : index
    %3 = vector.load %arg1[%c0_4, %c0_5, %c1] : memref<1x8x1406xf32, #tpu.memory_space<vmem>>, vector<1x8x1221xf32>
    %4 = vector.shape_cast %3 : vector<1x8x1221xf32> to vector<8x1221xf32>
    %c8 = arith.constant 8 : index
    %c0_6 = arith.constant 0 : index
    %5 = vector.load %arg6[%c8, %c0_6] : memref<200x1221xf32, #tpu.memory_space<vmem>>, vector<8x1221xf32>
    tpu.vector_store %arg6[%c8, %c0_6], %4 {strides = array<i32>} : memref<200x1221xf32, #tpu.memory_space<vmem>>, vector<8x1221xf32>,
    %c0_7 = arith.constant 0 : index
    %c0_8 = arith.constant 0 : index
    %c2 = arith.constant 2 : index
    %6 = vector.load %arg1[%c0_7, %c0_8, %c2] : memref<1x8x1406xf32, #tpu.memory_space<vmem>>, vector<1x8x1221xf32>
    %7 = vector.shape_cast %6 : vector<1x8x1221xf32> to vector<8x1221xf32>
    %c16 = arith.constant 16 : index
    %c0_9 = arith.constant 0 : index
    %8 = vector.load %arg6[%c16, %c0_9] : memref<200x1221xf32, #tpu.memory_space<vmem>>, vector<8x1221xf32>
    tpu.vector_store %arg6[%c16, %c0_9], %7 {strides = array<i32>} : memref<200x1221xf32, #tpu.memory_space<vmem>>, vector<8x1221xf32>,
    %c0_10 = arith.constant 0 : index
    %c0_11 = arith.constant 0 : index
    %c3 = arith.constant 3 : index
    %9 = vector.load %arg1[%c0_10, %c0_11, %c3] : memref<1x8x1406xf32, #tpu.memory_space<vmem>>, vector<1x8x1221xf32>
    %10 = vector.shape_cast %9 : vector<1x8x1221xf32> to vector<8x1221xf32>
    %c24 = arith.constant 24 : index
    %c0_12 = arith.constant 0 : index
    %11 = vector.load %arg6[%c24, %c0_12] : memref<200x1221xf32, #tpu.memory_space<vmem>>, vector<8x1221xf32>
    tpu.vector_store %arg6[%c24, %c0_12], %10 {strides = array<i32>} : memref<200x1221xf32, #tpu.memory_space<vmem>>, vector<8x1221xf32>,
    %c0_13 = arith.constant 0 : index
    %c0_14 = arith.constant 0 : index
    %c4 = arith.constant 4 : index
    %12 = vector.load %arg1[%c0_13, %c0_14, %c4] : memref<1x8x1406xf32, #tpu.memory_space<vmem>>, vector<1x8x1221xf32>
    %13 = vector.shape_cast %12 : vector<1x8x1221xf32> to vector<8x1221xf32>
    %c32 = arith.constant 32 : index
    %c0_15 = arith.constant 0 : index
    %14 = vector.load %arg6[%c32, %c0_15] : memref<200x1221xf32, #tpu.memory_space<vmem>>, vector<8x1221xf32>
    tpu.vector_store %arg6[%c32, %c0_15], %13 {strides = array<i32>} : memref<200x1221xf32, #tpu.memory_space<vmem>>, vector<8x1221xf32>,
    %c0_16 = arith.constant 0 : index
    %c0_17 = arith.constant 0 : index
    %c37 = arith.constant 37 : index
    %15 = vector.load %arg1[%c0_16, %c0_17, %c37] : memref<1x8x1406xf32, #tpu.memory_space<vmem>>, vector<1x8x1221xf32>
    %16 = vector.shape_cast %15 : vector<1x8x1221xf32> to vector<8x1221xf32>
    %c40 = arith.constant 40 : index
    %c0_18 = arith.constant 0 : index
    %17 = vector.load %arg6[%c40, %c0_18] : memref<200x1221xf32, #tpu.memory_space<vmem>>, vector<8x1221xf32>
    tpu.vector_store %arg6[%c40, %c0_18], %16 {strides = array<i32>} : memref<200x1221xf32, #tpu.memory_space<vmem>>, vector<8x1221xf32>,
    %c0_19 = arith.constant 0 : index
    %c0_20 = arith.constant 0 : index
    %c38 = arith.constant 38 : index
    %18 = vector.load %arg1[%c0_19, %c0_20, %c38] : memref<1x8x1406xf32, #tpu.memory_space<vmem>>, vector<1x8x1221xf32>
    %19 = vector.shape_cast %18 : vector<1x8x1221xf32> to vector<8x1221xf32>
    %c48 = arith.constant 48 : index
    %c0_21 = arith.constant 0 : index
    %20 = vector.load %arg6[%c48, %c0_21] : memref<200x1221xf32, #tpu.memory_space<vmem>>, vector<8x1221xf32>
    tpu.vector_store %arg6[%c48, %c0_21], %19 {strides = array<i32>} : memref<200x1221xf32, #tpu.memory_space<vmem>>, vector<8x1221xf32>,
    %c0_22 = arith.constant 0 : index
    %c0_23 = arith.constant 0 : index
    %c39 = arith.constant 39 : index
    %21 = vector.load %arg1[%c0_22, %c0_23, %c39] : memref<1x8x1406xf32, #tpu.memory_space<vmem>>, vector<1x8x1221xf32>
    %22 = vector.shape_cast %21 : vector<1x8x1221xf32> to vector<8x1221xf32>
    %c56 = arith.constant 56 : index
    %c0_24 = arith.constant 0 : index
    %23 = vector.load %arg6[%c56, %c0_24] : memref<200x1221xf32, #tpu.memory_space<vmem>>, vector<8x1221xf32>
    tpu.vector_store %arg6[%c56, %c0_24], %22 {strides = array<i32>} : memref<200x1221xf32, #tpu.memory_space<vmem>>, vector<8x1221xf32>,
    %c0_25 = arith.constant 0 : index
    %c0_26 = arith.constant 0 : index
    %c40_27 = arith.constant 40 : index
    %24 = vector.load %arg1[%c0_25, %c0_26, %c40_27] : memref<1x8x1406xf32, #tpu.memory_space<vmem>>, vector<1x8x1221xf32>
    %25 = vector.shape_cast %24 : vector<1x8x1221xf32> to vector<8x1221xf32>
    %c64 = arith.constant 64 : index
    %c0_28 = arith.constant 0 : index
    %26 = vector.load %arg6[%c64, %c0_28] : memref<200x1221xf32, #tpu.memory_space<vmem>>, vector<8x1221xf32>
    tpu.vector_store %arg6[%c64, %c0_28], %25 {strides = array<i32>} : memref<200x1221xf32, #tpu.memory_space<vmem>>, vector<8x1221xf32>,
    %c0_29 = arith.constant 0 : index
    %c0_30 = arith.constant 0 : index
    %c41 = arith.constant 41 : index
    %27 = vector.load %arg1[%c0_29, %c0_30, %c41] : memref<1x8x1406xf32, #tpu.memory_space<vmem>>, vector<1x8x1221xf32>
    %28 = vector.shape_cast %27 : vector<1x8x1221xf32> to vector<8x1221xf32>
    %c72 = arith.constant 72 : index
    %c0_31 = arith.constant 0 : index
    %29 = vector.load %arg6[%c72, %c0_31] : memref<200x1221xf32, #tpu.memory_space<vmem>>, vector<8x1221xf32>
    tpu.vector_store %arg6[%c72, %c0_31], %28 {strides = array<i32>} : memref<200x1221xf32, #tpu.memory_space<vmem>>, vector<8x1221xf32>,
    %c0_32 = arith.constant 0 : index
    %c0_33 = arith.constant 0 : index
    %c74 = arith.constant 74 : index
    %30 = vector.load %arg1[%c0_32, %c0_33, %c74] : memref<1x8x1406xf32, #tpu.memory_space<vmem>>, vector<1x8x1221xf32>
    %31 = vector.shape_cast %30 : vector<1x8x1221xf32> to vector<8x1221xf32>
    %c80 = arith.constant 80 : index
    %c0_34 = arith.constant 0 : index
    %32 = vector.load %arg6[%c80, %c0_34] : memref<200x1221xf32, #tpu.memory_space<vmem>>, vector<8x1221xf32>
    tpu.vector_store %arg6[%c80, %c0_34], %31 {strides = array<i32>} : memref<200x1221xf32, #tpu.memory_space<vmem>>, vector<8x1221xf32>,
    %c0_35 = arith.constant 0 : index
    %c0_36 = arith.constant 0 : index
    %c75 = arith.constant 75 : index
    %33 = vector.load %arg1[%c0_35, %c0_36, %c75] : memref<1x8x1406xf32, #tpu.memory_space<vmem>>, vector<1x8x1221xf32>
    %34 = vector.shape_cast %33 : vector<1x8x1221xf32> to vector<8x1221xf32>
    %c88 = arith.constant 88 : index
    %c0_37 = arith.constant 0 : index
    %35 = vector.load %arg6[%c88, %c0_37] : memref<200x1221xf32, #tpu.memory_space<vmem>>, vector<8x1221xf32>
    tpu.vector_store %arg6[%c88, %c0_37], %34 {strides = array<i32>} : memref<200x1221xf32, #tpu.memory_space<vmem>>, vector<8x1221xf32>,
    %c0_38 = arith.constant 0 : index
    %c0_39 = arith.constant 0 : index
    %c76 = arith.constant 76 : index
    %36 = vector.load %arg1[%c0_38, %c0_39, %c76] : memref<1x8x1406xf32, #tpu.memory_space<vmem>>, vector<1x8x1221xf32>
    %37 = vector.shape_cast %36 : vector<1x8x1221xf32> to vector<8x1221xf32>
    %c96 = arith.constant 96 : index
    %c0_40 = arith.constant 0 : index
    %38 = vector.load %arg6[%c96, %c0_40] : memref<200x1221xf32, #tpu.memory_space<vmem>>, vector<8x1221xf32>
    tpu.vector_store %arg6[%c96, %c0_40], %37 {strides = array<i32>} : memref<200x1221xf32, #tpu.memory_space<vmem>>, vector<8x1221xf32>,
    %c0_41 = arith.constant 0 : index
    %c0_42 = arith.constant 0 : index
    %c77 = arith.constant 77 : index
    %39 = vector.load %arg1[%c0_41, %c0_42, %c77] : memref<1x8x1406xf32, #tpu.memory_space<vmem>>, vector<1x8x1221xf32>
    %40 = vector.shape_cast %39 : vector<1x8x1221xf32> to vector<8x1221xf32>
    %c104 = arith.constant 104 : index
    %c0_43 = arith.constant 0 : index
    %41 = vector.load %arg6[%c104, %c0_43] : memref<200x1221xf32, #tpu.memory_space<vmem>>, vector<8x1221xf32>
    tpu.vector_store %arg6[%c104, %c0_43], %40 {strides = array<i32>} : memref<200x1221xf32, #tpu.memory_space<vmem>>, vector<8x1221xf32>,
    %c0_44 = arith.constant 0 : index
    %c0_45 = arith.constant 0 : index
    %c78 = arith.constant 78 : index
    %42 = vector.load %arg1[%c0_44, %c0_45, %c78] : memref<1x8x1406xf32, #tpu.memory_space<vmem>>, vector<1x8x1221xf32>
    %43 = vector.shape_cast %42 : vector<1x8x1221xf32> to vector<8x1221xf32>
    %c112 = arith.constant 112 : index
    %c0_46 = arith.constant 0 : index
    %44 = vector.load %arg6[%c112, %c0_46] : memref<200x1221xf32, #tpu.memory_space<vmem>>, vector<8x1221xf32>
    tpu.vector_store %arg6[%c112, %c0_46], %43 {strides = array<i32>} : memref<200x1221xf32, #tpu.memory_space<vmem>>, vector<8x1221xf32>,
    %c0_47 = arith.constant 0 : index
    %c0_48 = arith.constant 0 : index
    %c111 = arith.constant 111 : index
    %45 = vector.load %arg1[%c0_47, %c0_48, %c111] : memref<1x8x1406xf32, #tpu.memory_space<vmem>>, vector<1x8x1221xf32>
    %46 = vector.shape_cast %45 : vector<1x8x1221xf32> to vector<8x1221xf32>
    %c120 = arith.constant 120 : index
    %c0_49 = arith.constant 0 : index
    %47 = vector.load %arg6[%c120, %c0_49] : memref<200x1221xf32, #tpu.memory_space<vmem>>, vector<8x1221xf32>
    tpu.vector_store %arg6[%c120, %c0_49], %46 {strides = array<i32>} : memref<200x1221xf32, #tpu.memory_space<vmem>>, vector<8x1221xf32>,
    %c0_50 = arith.constant 0 : index
    %c0_51 = arith.constant 0 : index
    %c112_52 = arith.constant 112 : index
    %48 = vector.load %arg1[%c0_50, %c0_51, %c112_52] : memref<1x8x1406xf32, #tpu.memory_space<vmem>>, vector<1x8x1221xf32>
    %49 = vector.shape_cast %48 : vector<1x8x1221xf32> to vector<8x1221xf32>
    %c128 = arith.constant 128 : index
    %c0_53 = arith.constant 0 : index
    %50 = vector.load %arg6[%c128, %c0_53] : memref<200x1221xf32, #tpu.memory_space<vmem>>, vector<8x1221xf32>
    tpu.vector_store %arg6[%c128, %c0_53], %49 {strides = array<i32>} : memref<200x1221xf32, #tpu.memory_space<vmem>>, vector<8x1221xf32>,
    %c0_54 = arith.constant 0 : index
    %c0_55 = arith.constant 0 : index
    %c113 = arith.constant 113 : index
    %51 = vector.load %arg1[%c0_54, %c0_55, %c113] : memref<1x8x1406xf32, #tpu.memory_space<vmem>>, vector<1x8x1221xf32>
    %52 = vector.shape_cast %51 : vector<1x8x1221xf32> to vector<8x1221xf32>
    %c136 = arith.constant 136 : index
    %c0_56 = arith.constant 0 : index
    %53 = vector.load %arg6[%c136, %c0_56] : memref<200x1221xf32, #tpu.memory_space<vmem>>, vector<8x1221xf32>
    tpu.vector_store %arg6[%c136, %c0_56], %52 {strides = array<i32>} : memref<200x1221xf32, #tpu.memory_space<vmem>>, vector<8x1221xf32>,
    %c0_57 = arith.constant 0 : index
    %c0_58 = arith.constant 0 : index
    %c114 = arith.constant 114 : index
    %54 = vector.load %arg1[%c0_57, %c0_58, %c114] : memref<1x8x1406xf32, #tpu.memory_space<vmem>>, vector<1x8x1221xf32>
    %55 = vector.shape_cast %54 : vector<1x8x1221xf32> to vector<8x1221xf32>
    %c144 = arith.constant 144 : index
    %c0_59 = arith.constant 0 : index
    %56 = vector.load %arg6[%c144, %c0_59] : memref<200x1221xf32, #tpu.memory_space<vmem>>, vector<8x1221xf32>
    tpu.vector_store %arg6[%c144, %c0_59], %55 {strides = array<i32>} : memref<200x1221xf32, #tpu.memory_space<vmem>>, vector<8x1221xf32>,
    %c0_60 = arith.constant 0 : index
    %c0_61 = arith.constant 0 : index
    %c115 = arith.constant 115 : index
    %57 = vector.load %arg1[%c0_60, %c0_61, %c115] : memref<1x8x1406xf32, #tpu.memory_space<vmem>>, vector<1x8x1221xf32>
    %58 = vector.shape_cast %57 : vector<1x8x1221xf32> to vector<8x1221xf32>
    %c152 = arith.constant 152 : index
    %c0_62 = arith.constant 0 : index
    %59 = vector.load %arg6[%c152, %c0_62] : memref<200x1221xf32, #tpu.memory_space<vmem>>, vector<8x1221xf32>
    tpu.vector_store %arg6[%c152, %c0_62], %58 {strides = array<i32>} : memref<200x1221xf32, #tpu.memory_space<vmem>>, vector<8x1221xf32>,
    %c0_63 = arith.constant 0 : index
    %c0_64 = arith.constant 0 : index
    %c148 = arith.constant 148 : index
    %60 = vector.load %arg1[%c0_63, %c0_64, %c148] : memref<1x8x1406xf32, #tpu.memory_space<vmem>>, vector<1x8x1221xf32>
    %61 = vector.shape_cast %60 : vector<1x8x1221xf32> to vector<8x1221xf32>
    %c160 = arith.constant 160 : index
    %c0_65 = arith.constant 0 : index
    %62 = vector.load %arg6[%c160, %c0_65] : memref<200x1221xf32, #tpu.memory_space<vmem>>, vector<8x1221xf32>
    tpu.vector_store %arg6[%c160, %c0_65], %61 {strides = array<i32>} : memref<200x1221xf32, #tpu.memory_space<vmem>>, vector<8x1221xf32>,
    %c0_66 = arith.constant 0 : index
    %c0_67 = arith.constant 0 : index
    %c149 = arith.constant 149 : index
    %63 = vector.load %arg1[%c0_66, %c0_67, %c149] : memref<1x8x1406xf32, #tpu.memory_space<vmem>>, vector<1x8x1221xf32>
    %64 = vector.shape_cast %63 : vector<1x8x1221xf32> to vector<8x1221xf32>
    %c168 = arith.constant 168 : index
    %c0_68 = arith.constant 0 : index
    %65 = vector.load %arg6[%c168, %c0_68] : memref<200x1221xf32, #tpu.memory_space<vmem>>, vector<8x1221xf32>
    tpu.vector_store %arg6[%c168, %c0_68], %64 {strides = array<i32>} : memref<200x1221xf32, #tpu.memory_space<vmem>>, vector<8x1221xf32>,
    %c0_69 = arith.constant 0 : index
    %c0_70 = arith.constant 0 : index
    %c150 = arith.constant 150 : index
    %66 = vector.load %arg1[%c0_69, %c0_70, %c150] : memref<1x8x1406xf32, #tpu.memory_space<vmem>>, vector<1x8x1221xf32>
    %67 = vector.shape_cast %66 : vector<1x8x1221xf32> to vector<8x1221xf32>
    %c176 = arith.constant 176 : index
    %c0_71 = arith.constant 0 : index
    %68 = vector.load %arg6[%c176, %c0_71] : memref<200x1221xf32, #tpu.memory_space<vmem>>, vector<8x1221xf32>
    tpu.vector_store %arg6[%c176, %c0_71], %67 {strides = array<i32>} : memref<200x1221xf32, #tpu.memory_space<vmem>>, vector<8x1221xf32>,
    %c0_72 = arith.constant 0 : index
    %c0_73 = arith.constant 0 : index
    %c151 = arith.constant 151 : index
    %69 = vector.load %arg1[%c0_72, %c0_73, %c151] : memref<1x8x1406xf32, #tpu.memory_space<vmem>>, vector<1x8x1221xf32>
    %70 = vector.shape_cast %69 : vector<1x8x1221xf32> to vector<8x1221xf32>
    %c184 = arith.constant 184 : index
    %c0_74 = arith.constant 0 : index
    %71 = vector.load %arg6[%c184, %c0_74] : memref<200x1221xf32, #tpu.memory_space<vmem>>, vector<8x1221xf32>
    tpu.vector_store %arg6[%c184, %c0_74], %70 {strides = array<i32>} : memref<200x1221xf32, #tpu.memory_space<vmem>>, vector<8x1221xf32>,
    %c0_75 = arith.constant 0 : index
    %c0_76 = arith.constant 0 : index
    %c152_77 = arith.constant 152 : index
    %72 = vector.load %arg1[%c0_75, %c0_76, %c152_77] : memref<1x8x1406xf32, #tpu.memory_space<vmem>>, vector<1x8x1221xf32>
    %73 = vector.shape_cast %72 : vector<1x8x1221xf32> to vector<8x1221xf32>
    %c192 = arith.constant 192 : index
    %c0_78 = arith.constant 0 : index
    %74 = vector.load %arg6[%c192, %c0_78] : memref<200x1221xf32, #tpu.memory_space<vmem>>, vector<8x1221xf32>
    tpu.vector_store %arg6[%c192, %c0_78], %73 {strides = array<i32>} : memref<200x1221xf32, #tpu.memory_space<vmem>>, vector<8x1221xf32>,
    %c0_79 = arith.constant 0 : index
    %c0_80 = arith.constant 0 : index
    %75 = vector.load %arg2[%c0_79, %c0_80] : memref<32x200xf32, #tpu.memory_space<vmem>>, vector<32x200xf32>
    %c0_81 = arith.constant 0 : index
    %c0_82 = arith.constant 0 : index
    %76 = vector.load %arg6[%c0_81, %c0_82] : memref<200x1221xf32, #tpu.memory_space<vmem>>, vector<200x1221xf32>
    %cst = arith.constant dense<0.000000e+00> : vector<32x1221xf32>
    %77 = tpu.matmul %75, %76, %cst {dimension_numbers = #tpu.dot_dimension_numbers<[1], [0], [0], [1], [0, 0, 1, 1], [], []>} : vector<32x200xf32>, vector<200x1221xf32>, vector<32x1221xf32> -> vector<32x1221xf32>
    %c0_83 = arith.constant 0 : index
    %c0_84 = arith.constant 0 : index
    %78 = vector.load %arg3[%c0_83, %c0_84] : memref<32x1xf32, #tpu.memory_space<vmem>>, vector<32x1xf32>
    %79 = vector.broadcast %78 : vector<32x1xf32> to vector<32x1221xf32>
    %80 = arith.addf %77, %79 : vector<32x1221xf32>
    %c0_85 = arith.constant 0 : index
    %c0_86 = arith.constant 0 : index
    %81 = vector.load %arg4[%c0_85, %c0_86] : memref<1x1221xf32, #tpu.memory_space<vmem>>, vector<1x1221xf32>
    %82 = vector.broadcast %81 : vector<1x1221xf32> to vector<32x1221xf32>
    %83 = arith.addf %80, %82 : vector<32x1221xf32>
    %cst_87 = arith.constant 0xFF800000 : f32
    %84 = vector.broadcast %cst_87 : f32 to vector<32x38xf32>
    %c0_88 = arith.constant 0 : index
    %c90 = arith.constant 90 : index
    %85 = vector.load %arg7[%c0_88, %c90] : memref<32x1387xf32, #tpu.memory_space<vmem>>, vector<32x38xf32>
    tpu.vector_store %arg7[%c0_88, %c90], %84 {strides = array<i32>} : memref<32x1387xf32, #tpu.memory_space<vmem>>, vector<32x38xf32>,
    %c0_89 = arith.constant 0 : index
    %c1349 = arith.constant 1349 : index
    %86 = vector.load %arg7[%c0_89, %c1349] : memref<32x1387xf32, #tpu.memory_space<vmem>>, vector<32x38xf32>
    tpu.vector_store %arg7[%c0_89, %c1349], %84 {strides = array<i32>} : memref<32x1387xf32, #tpu.memory_space<vmem>>, vector<32x38xf32>,
    %c0_90 = arith.constant 0 : index
    %c128_91 = arith.constant 128 : index
    %87 = vector.load %arg7[%c0_90, %c128_91] : memref<32x1387xf32, #tpu.memory_space<vmem>>, vector<32x1221xf32>
    tpu.vector_store %arg7[%c0_90, %c128_91], %83 {strides = array<i32>} : memref<32x1387xf32, #tpu.memory_space<vmem>>, vector<32x1221xf32>,
    %c0_92 = arith.constant 0 : index
    %c90_93 = arith.constant 90 : index
    %88 = vector.load %arg7[%c0_92, %c90_93] : memref<32x1387xf32, #tpu.memory_space<vmem>>, vector<32x1223xf32>
    %c0_94 = arith.constant 0 : index
    %c127 = arith.constant 127 : index
    %89 = vector.load %arg7[%c0_94, %c127] : memref<32x1387xf32, #tpu.memory_space<vmem>>, vector<32x1223xf32>
    %c0_95 = arith.constant 0 : index
    %c164 = arith.constant 164 : index
    %90 = vector.load %arg7[%c0_95, %c164] : memref<32x1387xf32, #tpu.memory_space<vmem>>, vector<32x1223xf32>
    %91 = arith.maximumf %88, %89 : vector<32x1223xf32>
    %92 = arith.maximumf %91, %90 : vector<32x1223xf32>
    %93 = vector.extract_strided_slice %92 {offsets = [0, 0], sizes = [32, 1221], strides = [1, 1]} : vector<32x1223xf32> to vector<32x1221xf32>
    %94 = vector.extract_strided_slice %92 {offsets = [0, 1], sizes = [32, 1221], strides = [1, 1]} : vector<32x1223xf32> to vector<32x1221xf32>
    %95 = arith.maximumf %93, %94 : vector<32x1221xf32>
    %96 = vector.extract_strided_slice %92 {offsets = [0, 2], sizes = [32, 1221], strides = [1, 1]} : vector<32x1223xf32> to vector<32x1221xf32>
    %97 = arith.maximumf %95, %96 : vector<32x1221xf32>
    %cst_96 = arith.constant 0.000000e+00 : f32
    %cst_97 = arith.constant 6.400000e+00 : f32
    %98 = vector.broadcast %cst_96 : f32 to vector<32x1221xf32>
    %99 = arith.maximumf %98, %97 : vector<32x1221xf32>
    %100 = vector.broadcast %cst_97 : f32 to vector<32x1221xf32>
    %101 = arith.minimumf %100, %99 : vector<32x1221xf32>
    %c0_98 = arith.constant 0 : index
    %c0_99 = arith.constant 0 : index
    %c0_100 = arith.constant 0 : index
    %102 = vector.load %arg5[%c0_98, %c0_99, %c0_100] : memref<1x32x1221xf32, #tpu.memory_space<vmem>>, vector<1x32x1221xf32>
    %103 = vector.shape_cast %102 : vector<1x32x1221xf32> to vector<32x1221xf32>
    %104 = vector.shape_cast %101 : vector<32x1221xf32> to vector<1x32x1221xf32>
    tpu.vector_store %arg5[%c0_98, %c0_99, %c0_100], %104 {strides = array<i32>} : memref<1x32x1221xf32, #tpu.memory_space<vmem>>, vector<1x32x1221xf32>,
    return
  }
  func.func @transform_0(%arg0: i32) -> (i32, i32, i32) {
    %c0_i32 = arith.constant 0 : i32
    %c0_i32_0 = arith.constant 0 : i32
    %c0_i32_1 = arith.constant 0 : i32
    return %arg0, %c0_i32, %c0_i32_0 : i32, i32, i32
  }
  func.func @transform_1(%arg0: i32) -> (i32, i32) {
    %c0_i32 = arith.constant 0 : i32
    %c0_i32_0 = arith.constant 0 : i32
    %c0_i32_1 = arith.constant 0 : i32
    return %c0_i32, %c0_i32_0 : i32, i32
  }
  func.func @transform_2(%arg0: i32) -> (i32, i32) {
    %c0_i32 = arith.constant 0 : i32
    %c0_i32_0 = arith.constant 0 : i32
    %c0_i32_1 = arith.constant 0 : i32
    return %c0_i32, %c0_i32_0 : i32, i32
  }
  func.func @transform_3(%arg0: i32) -> (i32, i32) {
    %c0_i32 = arith.constant 0 : i32
    %c0_i32_0 = arith.constant 0 : i32
    %c0_i32_1 = arith.constant 0 : i32
    return %c0_i32, %c0_i32_0 : i32, i32
  }
  func.func @transform_4(%arg0: i32) -> (i32, i32, i32) {
    %c0_i32 = arith.constant 0 : i32
    %c0_i32_0 = arith.constant 0 : i32
    %c0_i32_1 = arith.constant 0 : i32
    return %arg0, %c0_i32, %c0_i32_0 : i32, i32, i32
  }
}

</mosaic_0001>

<bundles_post_ra>
// kernel: model_forward.1
= control target key start
LH: loop header
LB: loop body
LE: loop exit
PB: predicated region body
PF: predicated region fallthrough
CT: control target
= control target key end

     0   :  { %s4613_s15 = smov 0   ;;  %s7034_s0 = inlined_call_operand.vmem [shape: f32[2,8,1406], index: 0, kind: input, shape index: {}]   ;;  %s7035_s1 = inlined_call_operand.vmem [shape: f32[32,200], index: 1, kind: input, shape index: {}]   ;;  %s7036_s2 = inlined_call_operand.vmem [shape: f32[32,1], index: 2, kind: input, shape index: {}]   ;;  %s7037_s3 = inlined_call_operand.vmem [shape: f32[1,1221], index: 3, kind: input, shape index: {}]   ;;  %s7038_s4 = inlined_call_operand.vmem [shape: f32[2,32,1221], index: 4, kind: output, shape index: {}]  }
   0x1 LB: > { %s4213_s16 = sadd.s32 4294967295, %s4559_s15   ;;  %p4217_p0 = scmp.ge.s32.totalorder %s4559_s15, 1  ;;  %s4559_s15 = sphi %s4613_s15, %s14_s15  }
   0x2   : > { %p162_p1 = scmp.lt.s32.totalorder %s4559_s15, 3 }
   0x4   : > { %p163_p2 = pnand %p4217_p0, %p162_p1 }
   0x6   : > { %166 = sbr.rel (%p163_p2) target bundleno = 1486 (0x5ce), region = 36 }
   0xd   : > { %p188_p3 = scmp.lt.s32.totalorder %s4213_s16, 1  ;;  %s4561_s21 = smov 127   ;;  %vm217_vm0 = vcmask 564224   ;;  %vm259_vm1 = vcmask 1039360   ;;  %vm329_vm2 = vcmask 1031168   ;;  %vm399_vm3 = vcmask 1022976  }
   0xe   : > { %s4562_s22 = smov 126   ;;  %s4563_s23 = smov 125   ;;  %vm469_vm4 = vcmask 1014784   ;;  %vm539_vm5 = vcmask 744448   ;;  %vm609_vm6 = vcmask 736256   ;;  %vm679_vm7 = vcmask 728064  }
   0xf   : > { %s7246_s16 = smov (!%p188_p3, %s4213_s16), 1  ;;  %s4564_s24 = smov 124   ;;  %vm749_vm8 = vcmask 719872   ;;  %vm819_vm9 = vcmask 711680   ;;  %vm893_vm10 = vcmask 441344   ;;  %vm968_vm11 = vcmask 433152  }
  0x10   : > { %s4508_s17 = smul.u32 88, %s7246_s16  ;;  %s4565_s25 = smov 91   ;;  %vm1043_vm12 = vcmask 424960   ;;  %vm1118_vm13 = vcmask 416768   ;;  %vm1193_vm14 = vcmask 408576   ;;  %vm2231_vm15 = vcmask 588800  }
  0x11   : > { %s4566_s26 = smov 90   ;;  %s4567_s27 = smov 89  }
  0x12   : > { %s4627_s20 = scalar_lea.vmem %s7034_s0, %s4508_s17  ;;  %s4568_s28 = smov 88  }
  0x13   : > { %v4630_v0 = vld [vmem:[%s4627_s20 + $0x10] sm:$0xff]  ;;  %v4633_v1 = vld [vmem:[%s4627_s20] sm:$0xff]  ;;  %v4636_v2 = vld [vmem:[%s4627_s20 + $0x18] sm:$0xff]  ;;  %s4569_s29 = smov 87   ;;  %s4570_s30 = smov 54  }
  0x14   : > { %243 = vrot.lane.b32.xlu1 %v4630_v0, %s4561_s21  ;;  %239 = vrot.lane.b32.xlu0 %v4633_v1, %s4561_s21  ;;  %v4643_v3 = vld [vmem:[%s4627_s20 + $0x8] sm:$0xff]  ;;  %v202_v4 = vld [vmem:[%s4627_s20 + $0x20] sm:$0xff]  ;;  %s4571_s5 = smov 53   ;;  %s4572_s6 = smov 52  }
  0x15   : > { %212 = vst [vmem:[#allocation2 + $0x20] sm:$0xff] %v202_v4  ;;  %v4651_v5 = vld [vmem:[%s4627_s20 + $0x28] sm:$0xff]  ;;  %v4654_v6 = vld [vmem:[%s4627_s20 + $0x20] sm:$0xff]  ;;  %v1604_v8 = vld [vmem:[%s4627_s20 + $0x30] sm:$0xff]  ;;  %s4573_s7 = smov 51   ;;  %s4574_s8 = smov 50  }
  0x16   : > { %v207_v7 = vld [vmem:[%s4627_s20 + $0x48] sm:$0xff]  ;;  %214 = vst [vmem:[#allocation2 + $0x30] sm:$0xff] %v1604_v8  ;;  %v4665_v10 = vld [vmem:[%s4627_s20 + $0x38] sm:$0xff]  ;;  %v4668_v11 = vld [vmem:[%s4627_s20 + $0x30] sm:$0xff]  ;;  %s4575_s9 = smov 17   ;;  %s4576_s10 = smov 16  }
  0x17   : > { %v203_v9 = vld [vmem:[%s4627_s20 + $0x28] sm:$0xff]  ;;  %218 = vst.msk [vmem:[#allocation2 + $0x48] sm:$0xff] %vm217_vm0, %v207_v7  ;;  %v1605_v12 = vld [vmem:[%s4627_s20 + $0x38] sm:$0xff]  ;;  %v206_v13 = vld [vmem:[%s4627_s20 + $0x40] sm:$0xff]  ;;  %s4577_s11 = smov 15   ;;  %s4578_s12 = smov 14  }
  0x18   : > { %245 = vrot.lane.b32.xlu1 %v4636_v2, %s4561_s21  ;;  %241 = vrot.lane.b32.xlu0 %v4643_v3, %s4561_s21  ;;  %213 = vst [vmem:[#allocation2 + $0x28] sm:$0xff] %v203_v9  ;;  %215 = vst [vmem:[#allocation2 + $0x38] sm:$0xff] %v1605_v12  ;;  %v4677_v14 = vld [vmem:[%s4627_s20 + $0x48] sm:$0xff]  ;;  %v4680_v15 = vld [vmem:[%s4627_s20 + $0x40] sm:$0xff]  ;;  %s4579_s13 = smov 13   ;;  %s4580_s14 = smov 108  }
  0x19   : > { %216 = vst [vmem:[#allocation2 + $0x40] sm:$0xff] %v206_v13  ;;  %s4581_s17 = smov 107   ;;  %s4582_s18 = smov 106  }
  0x1a   : > { %s4583_s19 = smov 105  }
  0x1c   : > { %249 = vrot.lane.b32.xlu1 %v4651_v5, %s4561_s21  ;;  %247 = vrot.lane.b32.xlu0 %v4654_v6, %s4561_s21 }
  0x20   : > { %253 = vrot.lane.b32.xlu1 %v4665_v10, %s4561_s21  ;;  %251 = vrot.lane.b32.xlu0 %v4668_v11, %s4561_s21 }
  0x24   : > { %257 = vrot.lane.b32.xlu1 %v4677_v14, %s4561_s21  ;;  %255 = vrot.lane.b32.xlu0 %v4680_v15, %s4561_s21 }
  0x28   : > { %311 = vrot.lane.b32.xlu1 %v4643_v3, %s4562_s22  ;;  %309 = vrot.lane.b32.xlu0 %v4633_v1, %s4562_s22 }
  0x2c   : > { %315 = vrot.lane.b32.xlu1 %v4636_v2, %s4562_s22  ;;  %313 = vrot.lane.b32.xlu0 %v4630_v0, %s4562_s22 }
  0x30   : > { %319 = vrot.lane.b32.xlu1 %v4651_v5, %s4562_s22  ;;  %317 = vrot.lane.b32.xlu0 %v4654_v6, %s4562_s22 }
  0x34   : > { %323 = vrot.lane.b32.xlu1 %v4665_v10, %s4562_s22  ;;  %321 = vrot.lane.b32.xlu0 %v4668_v11, %s4562_s22 }
  0x38   : > { %327 = vrot.lane.b32.xlu1 %v4677_v14, %s4562_s22  ;;  %325 = vrot.lane.b32.xlu0 %v4680_v15, %s4562_s22 }
  0x3c   : > { %381 = vrot.lane.b32.xlu1 %v4643_v3, %s4563_s23  ;;  %379 = vrot.lane.b32.xlu0 %v4633_v1, %s4563_s23 }
  0x40   : > { %385 = vrot.lane.b32.xlu1 %v4636_v2, %s4563_s23  ;;  %383 = vrot.lane.b32.xlu0 %v4630_v0, %s4563_s23 }
  0x44   : > { %389 = vrot.lane.b32.xlu1 %v4651_v5, %s4563_s23  ;;  %387 = vrot.lane.b32.xlu0 %v4654_v6, %s4563_s23 }
  0x48   : > { %393 = vrot.lane.b32.xlu1 %v4665_v10, %s4563_s23  ;;  %391 = vrot.lane.b32.xlu0 %v4668_v11, %s4563_s23 }
  0x4c   : > { %397 = vrot.lane.b32.xlu1 %v4677_v14, %s4563_s23  ;;  %395 = vrot.lane.b32.xlu0 %v4680_v15, %s4563_s23 }
  0x50   : > { %451 = vrot.lane.b32.xlu1 %v4643_v3, %s4564_s24  ;;  %449 = vrot.lane.b32.xlu0 %v4633_v1, %s4564_s24 }
  0x54   : > { %455 = vrot.lane.b32.xlu1 %v4636_v2, %s4564_s24  ;;  %453 = vrot.lane.b32.xlu0 %v4630_v0, %s4564_s24 }
  0x58   : > { %459 = vrot.lane.b32.xlu1 %v4651_v5, %s4564_s24  ;;  %457 = vrot.lane.b32.xlu0 %v4654_v6, %s4564_s24 }
  0x5c   : > { %463 = vrot.lane.b32.xlu1 %v4665_v10, %s4564_s24  ;;  %461 = vrot.lane.b32.xlu0 %v4668_v11, %s4564_s24 }
  0x60   : > { %467 = vrot.lane.b32.xlu1 %v4677_v14, %s4564_s24  ;;  %465 = vrot.lane.b32.xlu0 %v4680_v15, %s4564_s24 }
  0x64   : > { %521 = vrot.lane.b32.xlu1 %v4643_v3, %s4565_s25  ;;  %519 = vrot.lane.b32.xlu0 %v4633_v1, %s4565_s25 }
  0x68   : > { %525 = vrot.lane.b32.xlu1 %v4636_v2, %s4565_s25  ;;  %523 = vrot.lane.b32.xlu0 %v4630_v0, %s4565_s25 }
  0x6c   : > { %529 = vrot.lane.b32.xlu1 %v4651_v5, %s4565_s25  ;;  %527 = vrot.lane.b32.xlu0 %v4654_v6, %s4565_s25 }
  0x70   : > { %533 = vrot.lane.b32.xlu1 %v4665_v10, %s4565_s25  ;;  %531 = vrot.lane.b32.xlu0 %v4668_v11, %s4565_s25 }
  0x74   : > { %537 = vrot.lane.b32.xlu1 %v4677_v14, %s4565_s25  ;;  %535 = vrot.lane.b32.xlu0 %v4680_v15, %s4565_s25 }
  0x78   : > { %591 = vrot.lane.b32.xlu1 %v4643_v3, %s4566_s26  ;;  %589 = vrot.lane.b32.xlu0 %v4633_v1, %s4566_s26 }
  0x7c   : > { %595 = vrot.lane.b32.xlu1 %v4636_v2, %s4566_s26  ;;  %593 = vrot.lane.b32.xlu0 %v4630_v0, %s4566_s26 }
  0x80   : > { %599 = vrot.lane.b32.xlu1 %v4651_v5, %s4566_s26  ;;  %597 = vrot.lane.b32.xlu0 %v4654_v6, %s4566_s26 }
  0x84   : > { %603 = vrot.lane.b32.xlu1 %v4665_v10, %s4566_s26  ;;  %601 = vrot.lane.b32.xlu0 %v4668_v11, %s4566_s26 }
  0x86   : > { %v244_v16 = vpop.permute.xlu1 %243  ;;  %v240_v17 = vpop.permute.xlu0 %239 }
  0x88   : > { %607 = vrot.lane.b32.xlu1 %v4677_v14, %s4566_s26  ;;  %605 = vrot.lane.b32.xlu0 %v4680_v15, %s4566_s26  ;;  %s4584_s26 = smov 104  }
  0x8a   : > { %v246_v18 = vpop.permute.xlu1 %245  ;;  %v242_v19 = vpop.permute.xlu0 %241 }
  0x8b   : > { %v262_v20 = vsel %vm259_vm1, %v244_v16, %v246_v18  ;;  %v260_v21 = vsel %vm259_vm1, %v240_v17, %v242_v19  ;;  %v261_v22 = vsel %vm259_vm1, %v242_v19, %v244_v16 }
  0x8c   : > { %661 = vrot.lane.b32.xlu1 %v4643_v3, %s4567_s27  ;;  %659 = vrot.lane.b32.xlu0 %v4633_v1, %s4567_s27  ;;  %v4242_v23 = vpack.c.bf16 %v261_v22, %v4643_v3  ;;  %v4244_v24 = vpack.c.bf16 %v260_v21, %v4633_v1  ;;  %v4292_v30 = vpack.c.bf16 %v262_v20, %v4630_v0 }
  0x8e   : > { %v250_v25 = vpop.permute.xlu1 %249  ;;  %v248_v26 = vpop.permute.xlu0 %247  ;;  %4243 = vmatprep.subr.bf16.mxu0 %v4242_v23 }
  0x8f   : > { %v263_v27 = vsel %vm259_vm1, %v246_v18, %v248_v26  ;;  %v264_v28 = vsel %vm259_vm1, %v248_v26, %v250_v25  ;;  %4245 = vmatpush1.bf16.msra.mxu0 %v4244_v24 }
  0x90   : > { %283 = vst [vmem:[#allocation2 + $0x70] sm:$0xff] %v264_v28  ;;  %665 = vrot.lane.b32.xlu1 %v4636_v2, %s4567_s27  ;;  %663 = vrot.lane.b32.xlu0 %v4630_v0, %s4567_s27  ;;  %v4290_v29 = vpack.c.bf16 %v263_v27, %v4636_v2 }
  0x92   : > { %v254_v31 = vpop.permute.xlu1 %253  ;;  %v252_v32 = vpop.permute.xlu0 %251  ;;  %4291 = vmatprep.subr.bf16.mxu1 %v4290_v29 }
  0x93   : > { %v265_v33 = vsel %vm259_vm1, %v250_v25, %v252_v32  ;;  %v266_v34 = vsel %vm259_vm1, %v252_v32, %v254_v31  ;;  %4293 = vmatpush1.bf16.msra.mxu1 %v4292_v30 }
  0x94   : > { %284 = vst [vmem:[#allocation2 + $0x78] sm:$0xff] %v265_v33  ;;  %285 = vst [vmem:[#allocation2 + $0x80] sm:$0xff] %v266_v34  ;;  %669 = vrot.lane.b32.xlu1 %v4651_v5, %s4567_s27  ;;  %667 = vrot.lane.b32.xlu0 %v4654_v6, %s4567_s27 }
  0x96   : > { %v258_v35 = vpop.permute.xlu1 %257  ;;  %v256_v36 = vpop.permute.xlu0 %255 }
  0x97   : > { %288 = vst.msk [vmem:[#allocation2 + $0x98] sm:$0xff] %vm217_vm0, %v258_v35  ;;  %v267_v37 = vsel %vm259_vm1, %v254_v31, %v256_v36  ;;  %v268_v38 = vsel %vm259_vm1, %v256_v36, %v258_v35 }
  0x98   : > { %286 = vst [vmem:[#allocation2 + $0x88] sm:$0xff] %v267_v37  ;;  %287 = vst [vmem:[#allocation2 + $0x90] sm:$0xff] %v268_v38  ;;  %673 = vrot.lane.b32.xlu1 %v4665_v10, %s4567_s27  ;;  %671 = vrot.lane.b32.xlu0 %v4668_v11, %s4567_s27 }
  0x9a   : > { %v312_v39 = vpop.permute.xlu1 %311  ;;  %v310_v40 = vpop.permute.xlu0 %309 }
  0x9b   : > { %v330_v41 = vsel %vm329_vm2, %v310_v40, %v312_v39 }
  0x9c   : > { %677 = vrot.lane.b32.xlu1 %v4677_v14, %s4567_s27  ;;  %675 = vrot.lane.b32.xlu0 %v4680_v15, %s4567_s27 }
  0x9e   : > { %v316_v42 = vpop.permute.xlu1 %315  ;;  %v314_v43 = vpop.permute.xlu0 %313 }
  0x9f   : > { %v331_v44 = vsel %vm329_vm2, %v312_v39, %v314_v43  ;;  %v332_v45 = vsel %vm329_vm2, %v314_v43, %v316_v42 }
  0xa0   : > { %731 = vrot.lane.b32.xlu1 %v4643_v3, %s4568_s28  ;;  %729 = vrot.lane.b32.xlu0 %v4633_v1, %s4568_s28 }
  0xa2   : > { %v320_v46 = vpop.permute.xlu1 %319  ;;  %v318_v47 = vpop.permute.xlu0 %317 }
  0xa3   : > { %v333_v48 = vsel %vm329_vm2, %v316_v42, %v318_v47  ;;  %v334_v49 = vsel %vm329_vm2, %v318_v47, %v320_v46 }
  0xa4   : > { %353 = vst [vmem:[#allocation2 + $0xc0] sm:$0xff] %v334_v49  ;;  %735 = vrot.lane.b32.xlu1 %v4636_v2, %s4568_s28  ;;  %733 = vrot.lane.b32.xlu0 %v4630_v0, %s4568_s28  ;;  %v4882_v49 = vld [vmem:[%s4627_s20 + $0x50] sm:$0xff] }
  0xa6   : > { %v324_v50 = vpop.permute.xlu1 %323  ;;  %v322_v51 = vpop.permute.xlu0 %321 }
  0xa7   : > { %v335_v52 = vsel %vm329_vm2, %v320_v46, %v322_v51  ;;  %v336_v53 = vsel %vm329_vm2, %v322_v51, %v324_v50 }
  0xa8   : > { %354 = vst [vmem:[#allocation2 + $0xc8] sm:$0xff] %v335_v52  ;;  %355 = vst [vmem:[#allocation2 + $0xd0] sm:$0xff] %v336_v53  ;;  %739 = vrot.lane.b32.xlu1 %v4651_v5, %s4568_s28  ;;  %737 = vrot.lane.b32.xlu0 %v4654_v6, %s4568_s28 }
  0xaa   : > { %v328_v54 = vpop.permute.xlu1 %327  ;;  %v326_v55 = vpop.permute.xlu0 %325 }
  0xab   : > { %358 = vst.msk [vmem:[#allocation2 + $0xe8] sm:$0xff] %vm217_vm0, %v328_v54  ;;  %v337_v56 = vsel %vm329_vm2, %v324_v50, %v326_v55  ;;  %v338_v57 = vsel %vm329_vm2, %v326_v55, %v328_v54 }
  0xac   : > { %356 = vst [vmem:[#allocation2 + $0xd8] sm:$0xff] %v337_v56  ;;  %357 = vst [vmem:[#allocation2 + $0xe0] sm:$0xff] %v338_v57  ;;  %743 = vrot.lane.b32.xlu1 %v4665_v10, %s4568_s28  ;;  %741 = vrot.lane.b32.xlu0 %v4668_v11, %s4568_s28 }
  0xae   : > { %v382_v58 = vpop.permute.xlu1 %381  ;;  %v380_v59 = vpop.permute.xlu0 %379 }
  0xaf   : > { %v400_v60 = vsel %vm399_vm3, %v380_v59, %v382_v58 }
  0xb0   : > { %747 = vrot.lane.b32.xlu1 %v4677_v14, %s4568_s28  ;;  %745 = vrot.lane.b32.xlu0 %v4680_v15, %s4568_s28  ;;  %v4248_v8 = vpack.c.bf16 %v400_v60, %v330_v41 }
  0xb2   : > { %v386_v61 = vpop.permute.xlu1 %385  ;;  %v384_v62 = vpop.permute.xlu0 %383 }
  0xb3   : > { %v401_v63 = vsel %vm399_vm3, %v382_v58, %v384_v62  ;;  %v402_v4 = vsel %vm399_vm3, %v384_v62, %v386_v61 }
  0xb4   : > { %801 = vrot.lane.b32.xlu1 %v4643_v3, %s4569_s29  ;;  %799 = vrot.lane.b32.xlu0 %v4633_v1, %s4569_s29  ;;  %v4246_v7 = vpack.c.bf16 %v401_v63, %v331_v44  ;;  %v4296_v18 = vpack.c.bf16 %v402_v4, %v332_v45 }
  0xb6   : > { %v390_v9 = vpop.permute.xlu1 %389  ;;  %v388_v12 = vpop.permute.xlu0 %387  ;;  %4247 = vmatprep.subr.bf16.mxu0 %v4246_v7 }
  0xb7   : > { %v403_v13 = vsel %vm399_vm3, %v386_v61, %v388_v12  ;;  %v404_v16 = vsel %vm399_vm3, %v388_v12, %v390_v9  ;;  %4249 = vmatpush1.bf16.msra.mxu0 %v4248_v8 }
  0xb8   : > { %423 = vst [vmem:[#allocation2 + $0x110] sm:$0xff] %v404_v16  ;;  %805 = vrot.lane.b32.xlu1 %v4636_v2, %s4569_s29  ;;  %803 = vrot.lane.b32.xlu0 %v4630_v0, %s4569_s29  ;;  %v4294_v17 = vpack.c.bf16 %v403_v13, %v333_v48 }
  0xba   : > { %v394_v19 = vpop.permute.xlu1 %393  ;;  %v392_v20 = vpop.permute.xlu0 %391  ;;  %4295 = vmatprep.subr.bf16.mxu1 %v4294_v17 }
  0xbb   : > { %v405_v21 = vsel %vm399_vm3, %v390_v9, %v392_v20  ;;  %v406_v22 = vsel %vm399_vm3, %v392_v20, %v394_v19  ;;  %4297 = vmatpush1.bf16.msra.mxu1 %v4296_v18 }
  0xbc   : > { %424 = vst [vmem:[#allocation2 + $0x118] sm:$0xff] %v405_v21  ;;  %425 = vst [vmem:[#allocation2 + $0x120] sm:$0xff] %v406_v22  ;;  %809 = vrot.lane.b32.xlu1 %v4651_v5, %s4569_s29  ;;  %807 = vrot.lane.b32.xlu0 %v4654_v6, %s4569_s29 }
  0xbe   : > { %v398_v23 = vpop.permute.xlu1 %397  ;;  %v396_v24 = vpop.permute.xlu0 %395 }
  0xbf   : > { %428 = vst.msk [vmem:[#allocation2 + $0x138] sm:$0xff] %vm217_vm0, %v398_v23  ;;  %v407_v25 = vsel %vm399_vm3, %v394_v19, %v396_v24  ;;  %v408_v26 = vsel %vm399_vm3, %v396_v24, %v398_v23  ;;  %vm1268_vm3 = vcmask 138240  }
  0xc0   : > { %426 = vst [vmem:[#allocation2 + $0x128] sm:$0xff] %v407_v25  ;;  %427 = vst [vmem:[#allocation2 + $0x130] sm:$0xff] %v408_v26  ;;  %813 = vrot.lane.b32.xlu1 %v4665_v10, %s4569_s29  ;;  %811 = vrot.lane.b32.xlu0 %v4668_v11, %s4569_s29 }
  0xc2   : > { %v452_v27 = vpop.permute.xlu1 %451  ;;  %v450_v28 = vpop.permute.xlu0 %449 }
  0xc3   : > { %v470_v29 = vsel %vm469_vm4, %v450_v28, %v452_v27 }
  0xc4   : > { %817 = vrot.lane.b32.xlu1 %v4677_v14, %s4569_s29  ;;  %815 = vrot.lane.b32.xlu0 %v4680_v15, %s4569_s29 }
  0xc6   : > { %v456_v30 = vpop.permute.xlu1 %455  ;;  %v454_v31 = vpop.permute.xlu0 %453 }
  0xc7   : > { %v471_v32 = vsel %vm469_vm4, %v452_v27, %v454_v31  ;;  %v472_v33 = vsel %vm469_vm4, %v454_v31, %v456_v30 }
  0xc8   : > { %873 = vrot.lane.b32.xlu1 %v4643_v3, %s4570_s30  ;;  %871 = vrot.lane.b32.xlu0 %v4633_v1, %s4570_s30 }
  0xca   : > { %v460_v34 = vpop.permute.xlu1 %459  ;;  %v458_v35 = vpop.permute.xlu0 %457 }
  0xcb   : > { %v473_v36 = vsel %vm469_vm4, %v456_v30, %v458_v35  ;;  %v474_v37 = vsel %vm469_vm4, %v458_v35, %v460_v34 }
  0xcc   : > { %493 = vst [vmem:[#allocation2 + $0x160] sm:$0xff] %v474_v37  ;;  %877 = vrot.lane.b32.xlu1 %v4636_v2, %s4570_s30  ;;  %875 = vrot.lane.b32.xlu0 %v4630_v0, %s4570_s30 }
  0xce   : > { %v464_v38 = vpop.permute.xlu1 %463  ;;  %v462_v39 = vpop.permute.xlu0 %461 }
  0xcf   : > { %v475_v40 = vsel %vm469_vm4, %v460_v34, %v462_v39  ;;  %v476_v41 = vsel %vm469_vm4, %v462_v39, %v464_v38 }
  0xd0   : > { %494 = vst [vmem:[#allocation2 + $0x168] sm:$0xff] %v475_v40  ;;  %495 = vst [vmem:[#allocation2 + $0x170] sm:$0xff] %v476_v41  ;;  %881 = vrot.lane.b32.xlu1 %v4651_v5, %s4570_s30  ;;  %879 = vrot.lane.b32.xlu0 %v4654_v6, %s4570_s30  ;;  %v4960_v41 = vld [vmem:[%s4627_s20 + $0x8] sm:$0xff] }
  0xd2   : > { %v468_v42 = vpop.permute.xlu1 %467  ;;  %v466_v43 = vpop.permute.xlu0 %465 }
  0xd3   : > { %498 = vst.msk [vmem:[#allocation2 + $0x188] sm:$0xff] %vm217_vm0, %v468_v42  ;;  %v477_v44 = vsel %vm469_vm4, %v464_v38, %v466_v43  ;;  %v478_v45 = vsel %vm469_vm4, %v466_v43, %v468_v42  ;;  %vm1343_vm4 = vcmask 130048  }
  0xd4   : > { %496 = vst [vmem:[#allocation2 + $0x178] sm:$0xff] %v477_v44  ;;  %497 = vst [vmem:[#allocation2 + $0x180] sm:$0xff] %v478_v45  ;;  %885 = vrot.lane.b32.xlu1 %v4665_v10, %s4570_s30  ;;  %883 = vrot.lane.b32.xlu0 %v4668_v11, %s4570_s30 }
  0xd6   : > { %v522_v46 = vpop.permute.xlu1 %521  ;;  %v520_v47 = vpop.permute.xlu0 %519 }
  0xd7   : > { %v540_v48 = vsel %vm539_vm5, %v520_v47, %v522_v46  ;;  %v4972_v47 = vld [vmem:[%s4627_s20 + $0x18] sm:$0xff] }
  0xd8   : > { %889 = vrot.lane.b32.xlu1 %v4677_v14, %s4570_s30  ;;  %887 = vrot.lane.b32.xlu0 %v4680_v15, %s4570_s30  ;;  %v4252_v55 = vpack.c.bf16 %v540_v48, %v470_v29 }
  0xda   : > { %v526_v50 = vpop.permute.xlu1 %525  ;;  %v524_v51 = vpop.permute.xlu0 %523 }
  0xdb   : > { %v541_v52 = vsel %vm539_vm5, %v522_v46, %v524_v51  ;;  %v542_v53 = vsel %vm539_vm5, %v524_v51, %v526_v50 }
  0xdc   : > { %946 = vrot.lane.b32.xlu1 %v4633_v1, %s4571_s5  ;;  %891 = vrot.lane.b32.xlu0 %v4882_v49, %s4570_s30  ;;  %v4250_v54 = vpack.c.bf16 %v541_v52, %v471_v32  ;;  %v4300_v61 = vpack.c.bf16 %v542_v53, %v472_v33  ;;  %v4982_v53 = vld [vmem:[%s4627_s20 + $0x30] sm:$0xff] }
  0xde   : > { %v530_v56 = vpop.permute.xlu1 %529  ;;  %v528_v57 = vpop.permute.xlu0 %527  ;;  %4251 = vmatprep.subr.bf16.mxu0 %v4250_v54  ;;  %v4985_v54 = vld [vmem:[%s4627_s20 + $0x28] sm:$0xff] }
  0xdf   : > { %v543_v58 = vsel %vm539_vm5, %v526_v50, %v528_v57  ;;  %v544_v59 = vsel %vm539_vm5, %v528_v57, %v530_v56  ;;  %4253 = vmatpush1.bf16.msra.mxu0 %v4252_v55 }
  0xe0   : > { %563 = vst [vmem:[#allocation2 + $0x1b0] sm:$0xff] %v544_v59  ;;  %950 = vrot.lane.b32.xlu1 %v4630_v0, %s4571_s5  ;;  %948 = vrot.lane.b32.xlu0 %v4643_v3, %s4571_s5  ;;  %v4298_v60 = vpack.c.bf16 %v543_v58, %v473_v36  ;;  %v4993_v58 = vld [vmem:[%s4627_s20 + $0x40] sm:$0xff]  ;;  %v4996_v59 = vld [vmem:[%s4627_s20 + $0x38] sm:$0xff] }
  0xe2   : > { %v534_v62 = vpop.permute.xlu1 %533  ;;  %v532_v63 = vpop.permute.xlu0 %531  ;;  %4299 = vmatprep.subr.bf16.mxu1 %v4298_v60 }
  0xe3   : > { %v545_v4 = vsel %vm539_vm5, %v530_v56, %v532_v63  ;;  %v546_v7 = vsel %vm539_vm5, %v532_v63, %v534_v62  ;;  %4301 = vmatpush1.bf16.msra.mxu1 %v4300_v61 }
  0xe4   : > { %564 = vst [vmem:[#allocation2 + $0x1b8] sm:$0xff] %v545_v4  ;;  %565 = vst [vmem:[#allocation2 + $0x1c0] sm:$0xff] %v546_v7  ;;  %954 = vrot.lane.b32.xlu1 %v4654_v6, %s4571_s5  ;;  %952 = vrot.lane.b32.xlu0 %v4636_v2, %s4571_s5  ;;  %v5005_v4 = vld [vmem:[%s4627_s20 + $0x48] sm:$0xff] }
  0xe6   : > { %v538_v8 = vpop.permute.xlu1 %537  ;;  %v536_v9 = vpop.permute.xlu0 %535 }
  0xe7   : > { %568 = vst.msk [vmem:[#allocation2 + $0x1d8] sm:$0xff] %vm217_vm0, %v538_v8  ;;  %v547_v12 = vsel %vm539_vm5, %v534_v62, %v536_v9  ;;  %v548_v13 = vsel %vm539_vm5, %v536_v9, %v538_v8 }
  0xe8   : > { %566 = vst [vmem:[#allocation2 + $0x1c8] sm:$0xff] %v547_v12  ;;  %567 = vst [vmem:[#allocation2 + $0x1d0] sm:$0xff] %v548_v13  ;;  %958 = vrot.lane.b32.xlu1 %v4668_v11, %s4571_s5  ;;  %956 = vrot.lane.b32.xlu0 %v4651_v5, %s4571_s5  ;;  %v5014_v13 = vld [vmem:[%s4627_s20] sm:$0xff] }
  0xea   : > { %v592_v16 = vpop.permute.xlu1 %591  ;;  %v590_v17 = vpop.permute.xlu0 %589 }
  0xeb   : > { %v610_v18 = vsel %vm609_vm6, %v590_v17, %v592_v16 }
  0xec   : > { %962 = vrot.lane.b32.xlu1 %v4680_v15, %s4571_s5  ;;  %960 = vrot.lane.b32.xlu0 %v4665_v10, %s4571_s5 }
  0xee   : > { %v596_v19 = vpop.permute.xlu1 %595  ;;  %v594_v20 = vpop.permute.xlu0 %593 }
  0xef   : > { %v611_v21 = vsel %vm609_vm6, %v592_v16, %v594_v20  ;;  %v612_v22 = vsel %vm609_vm6, %v594_v20, %v596_v19 }
  0xf0   : > { %966 = vrot.lane.b32.xlu1 %v4882_v49, %s4571_s5  ;;  %964 = vrot.lane.b32.xlu0 %v4677_v14, %s4571_s5 }
  0xf2   : > { %v600_v23 = vpop.permute.xlu1 %599  ;;  %v598_v24 = vpop.permute.xlu0 %597 }
  0xf3   : > { %v613_v25 = vsel %vm609_vm6, %v596_v19, %v598_v24  ;;  %v614_v26 = vsel %vm609_vm6, %v598_v24, %v600_v23 }
  0xf4   : > { %633 = vst [vmem:[#allocation2 + $0x200] sm:$0xff] %v614_v26  ;;  %1023 = vrot.lane.b32.xlu1 %v4643_v3, %s4572_s6  ;;  %1021 = vrot.lane.b32.xlu0 %v4633_v1, %s4572_s6 }
  0xf6   : > { %v604_v27 = vpop.permute.xlu1 %603  ;;  %v602_v28 = vpop.permute.xlu0 %601 }
  0xf7   : > { %v615_v29 = vsel %vm609_vm6, %v600_v23, %v602_v28  ;;  %v616_v30 = vsel %vm609_vm6, %v602_v28, %v604_v27 }
  0xf8   : > { %634 = vst [vmem:[#allocation2 + $0x208] sm:$0xff] %v615_v29  ;;  %635 = vst [vmem:[#allocation2 + $0x210] sm:$0xff] %v616_v30  ;;  %1027 = vrot.lane.b32.xlu1 %v4636_v2, %s4572_s6  ;;  %1025 = vrot.lane.b32.xlu0 %v4630_v0, %s4572_s6 }
  0xfa   : > { %v608_v31 = vpop.permute.xlu1 %607  ;;  %v606_v32 = vpop.permute.xlu0 %605 }
  0xfb   : > { %638 = vst.msk [vmem:[#allocation2 + $0x228] sm:$0xff] %vm217_vm0, %v608_v31  ;;  %v617_v3 = vsel %vm609_vm6, %v604_v27, %v606_v32  ;;  %v618_v33 = vsel %vm609_vm6, %v606_v32, %v608_v31  ;;  %vm1418_vm6 = vcmask 121856  }
  0xfc   : > { %636 = vst [vmem:[#allocation2 + $0x218] sm:$0xff] %v617_v3  ;;  %637 = vst [vmem:[#allocation2 + $0x220] sm:$0xff] %v618_v33  ;;  %1031 = vrot.lane.b32.xlu1 %v4651_v5, %s4572_s6  ;;  %1029 = vrot.lane.b32.xlu0 %v4654_v6, %s4572_s6 }
  0xfe   : > { %v662_v2 = vpop.permute.xlu1 %661  ;;  %v660_v34 = vpop.permute.xlu0 %659 }
  0xff   : > { %v680_v0 = vsel %vm679_vm7, %v660_v34, %v662_v2 }
 0x100   : > { %1035 = vrot.lane.b32.xlu1 %v4665_v10, %s4572_s6  ;;  %1033 = vrot.lane.b32.xlu0 %v4668_v11, %s4572_s6  ;;  %v4256_v38 = vpack.c.bf16 %v680_v0, %v610_v18 }
 0x102   : > { %v666_v35 = vpop.permute.xlu1 %665  ;;  %v664_v36 = vpop.permute.xlu0 %663 }
 0x103   : > { %v681_v37 = vsel %vm679_vm7, %v662_v2, %v664_v36  ;;  %v682_v5 = vsel %vm679_vm7, %v664_v36, %v666_v35 }
 0x104   : > { %1039 = vrot.lane.b32.xlu1 %v4677_v14, %s4572_s6  ;;  %1037 = vrot.lane.b32.xlu0 %v4680_v15, %s4572_s6  ;;  %v4254_v6 = vpack.c.bf16 %v681_v37, %v611_v21  ;;  %v4957_v15 = vld [vmem:[%s4627_s20 + $0x10] sm:$0xff]  ;;  %v4304_v42 = vpack.c.bf16 %v682_v5, %v612_v22 }
 0x106   : > { %v670_v10 = vpop.permute.xlu1 %669  ;;  %v668_v39 = vpop.permute.xlu0 %667  ;;  %4255 = vmatprep.subr.bf16.mxu0 %v4254_v6 }
 0x107   : > { %v683_v11 = vsel %vm679_vm7, %v666_v35, %v668_v39  ;;  %v684_v40 = vsel %vm679_vm7, %v668_v39, %v670_v10  ;;  %4257 = vmatpush1.bf16.msra.mxu0 %v4256_v38 }
 0x108   : > { %703 = vst [vmem:[#allocation2 + $0x250] sm:$0xff] %v684_v40  ;;  %1096 = vrot.lane.b32.xlu1 %v4633_v1, %s4573_s7  ;;  %1041 = vrot.lane.b32.xlu0 %v4882_v49, %s4572_s6  ;;  %v4302_v14 = vpack.c.bf16 %v683_v11, %v613_v25  ;;  %v4969_v1 = vld [vmem:[%s4627_s20 + $0x20] sm:$0xff] }
 0x10a   : > { %v674_v43 = vpop.permute.xlu1 %673  ;;  %v672_v44 = vpop.permute.xlu0 %671  ;;  %4303 = vmatprep.subr.bf16.mxu1 %v4302_v14 }
 0x10b   : > { %v685_v45 = vsel %vm679_vm7, %v670_v10, %v672_v44  ;;  %v686_v46 = vsel %vm679_vm7, %v672_v44, %v674_v43  ;;  %4305 = vmatpush1.bf16.msra.mxu1 %v4304_v42 }
 0x10c   : > { %704 = vst [vmem:[#allocation2 + $0x258] sm:$0xff] %v685_v45  ;;  %705 = vst [vmem:[#allocation2 + $0x260] sm:$0xff] %v686_v46  ;;  %1100 = vrot.lane.b32.xlu1 %v4957_v15, %s4573_s7  ;;  %1098 = vrot.lane.b32.xlu0 %v4960_v41, %s4573_s7 }
 0x10e   : > { %v678_v48 = vpop.permute.xlu1 %677  ;;  %v676_v50 = vpop.permute.xlu0 %675 }
 0x10f   : > { %708 = vst.msk [vmem:[#allocation2 + $0x278] sm:$0xff] %vm217_vm0, %v678_v48  ;;  %v687_v51 = vsel %vm679_vm7, %v674_v43, %v676_v50  ;;  %v688_v52 = vsel %vm679_vm7, %v676_v50, %v678_v48  ;;  %vm1493_vm7 = vcmask 113664  }
 0x110   : > { %706 = vst [vmem:[#allocation2 + $0x268] sm:$0xff] %v687_v51  ;;  %707 = vst [vmem:[#allocation2 + $0x270] sm:$0xff] %v688_v52  ;;  %1104 = vrot.lane.b32.xlu1 %v4969_v1, %s4573_s7  ;;  %1102 = vrot.lane.b32.xlu0 %v4972_v47, %s4573_s7 }
 0x112   : > { %v732_v55 = vpop.permute.xlu1 %731  ;;  %v730_v56 = vpop.permute.xlu0 %729 }
 0x113   : > { %v750_v57 = vsel %vm749_vm8, %v730_v56, %v732_v55 }
 0x114   : > { %1108 = vrot.lane.b32.xlu1 %v4982_v53, %s4573_s7  ;;  %1106 = vrot.lane.b32.xlu0 %v4985_v54, %s4573_s7 }
 0x116   : > { %v736_v60 = vpop.permute.xlu1 %735  ;;  %v734_v61 = vpop.permute.xlu0 %733 }
 0x117   : > { %v751_v62 = vsel %vm749_vm8, %v732_v55, %v734_v61  ;;  %v752_v63 = vsel %vm749_vm8, %v734_v61, %v736_v60 }
 0x118   : > { %1112 = vrot.lane.b32.xlu1 %v4993_v58, %s4573_s7  ;;  %1110 = vrot.lane.b32.xlu0 %v4996_v59, %s4573_s7 }
 0x11a   : > { %v740_v7 = vpop.permute.xlu1 %739  ;;  %v738_v8 = vpop.permute.xlu0 %737 }
 0x11b   : > { %v753_v9 = vsel %vm749_vm8, %v736_v60, %v738_v8  ;;  %v754_v12 = vsel %vm749_vm8, %v738_v8, %v740_v7 }
 0x11c   : > { %773 = vst [vmem:[#allocation2 + $0x2a0] sm:$0xff] %v754_v12  ;;  %1116 = vrot.lane.b32.xlu1 %v4882_v49, %s4573_s7  ;;  %1114 = vrot.lane.b32.xlu0 %v5005_v4, %s4573_s7 }
 0x11e   : > { %v744_v16 = vpop.permute.xlu1 %743  ;;  %v742_v17 = vpop.permute.xlu0 %741 }
 0x11f   : > { %v755_v18 = vsel %vm749_vm8, %v740_v7, %v742_v17  ;;  %v756_v19 = vsel %vm749_vm8, %v742_v17, %v744_v16 }
 0x120   : > { %774 = vst [vmem:[#allocation2 + $0x2a8] sm:$0xff] %v755_v18  ;;  %775 = vst [vmem:[#allocation2 + $0x2b0] sm:$0xff] %v756_v19  ;;  %1173 = vrot.lane.b32.xlu1 %v4960_v41, %s4574_s8  ;;  %1171 = vrot.lane.b32.xlu0 %v5014_v13, %s4574_s8 }
 0x122   : > { %v748_v20 = vpop.permute.xlu1 %747  ;;  %v746_v21 = vpop.permute.xlu0 %745 }
 0x123   : > { %778 = vst.msk [vmem:[#allocation2 + $0x2c8] sm:$0xff] %vm217_vm0, %v748_v20  ;;  %v757_v22 = vsel %vm749_vm8, %v744_v16, %v746_v21  ;;  %v758_v23 = vsel %vm749_vm8, %v746_v21, %v748_v20  ;;  %vm1568_vm8 = vcmask 105472  }
 0x124   : > { %776 = vst [vmem:[#allocation2 + $0x2b8] sm:$0xff] %v757_v22  ;;  %777 = vst [vmem:[#allocation2 + $0x2c0] sm:$0xff] %v758_v23  ;;  %1177 = vrot.lane.b32.xlu1 %v4972_v47, %s4574_s8  ;;  %1175 = vrot.lane.b32.xlu0 %v4957_v15, %s4574_s8 }
 0x126   : > { %v802_v24 = vpop.permute.xlu1 %801  ;;  %v800_v25 = vpop.permute.xlu0 %799 }
 0x127   : > { %v820_v26 = vsel %vm819_vm9, %v800_v25, %v802_v24 }
 0x128   : > { %1181 = vrot.lane.b32.xlu1 %v4985_v54, %s4574_s8  ;;  %1179 = vrot.lane.b32.xlu0 %v4969_v1, %s4574_s8  ;;  %v4260_v32 = vpack.c.bf16 %v820_v26, %v750_v57 }
 0x12a   : > { %v806_v27 = vpop.permute.xlu1 %805  ;;  %v804_v28 = vpop.permute.xlu0 %803 }
 0x12b   : > { %v821_v29 = vsel %vm819_vm9, %v802_v24, %v804_v28  ;;  %v822_v30 = vsel %vm819_vm9, %v804_v28, %v806_v27 }
 0x12c   : > { %1185 = vrot.lane.b32.xlu1 %v4996_v59, %s4574_s8  ;;  %1183 = vrot.lane.b32.xlu0 %v4982_v53, %s4574_s8  ;;  %v4258_v31 = vpack.c.bf16 %v821_v29, %v751_v62  ;;  %v4308_v35 = vpack.c.bf16 %v822_v30, %v752_v63 }
 0x12e   : > { %v810_v3 = vpop.permute.xlu1 %809  ;;  %v808_v33 = vpop.permute.xlu0 %807  ;;  %4259 = vmatprep.subr.bf16.mxu0 %v4258_v31 }
 0x12f   : > { %v823_v2 = vsel %vm819_vm9, %v806_v27, %v808_v33  ;;  %v824_v34 = vsel %vm819_vm9, %v808_v33, %v810_v3  ;;  %4261 = vmatpush1.bf16.msra.mxu0 %v4260_v32 }
 0x130   : > { %843 = vst [vmem:[#allocation2 + $0x2f0] sm:$0xff] %v824_v34  ;;  %1189 = vrot.lane.b32.xlu1 %v5005_v4, %s4574_s8  ;;  %1187 = vrot.lane.b32.xlu0 %v4993_v58, %s4574_s8  ;;  %v4306_v0 = vpack.c.bf16 %v823_v2, %v753_v9 }
 0x132   : > { %v814_v36 = vpop.permute.xlu1 %813  ;;  %v812_v37 = vpop.permute.xlu0 %811  ;;  %4307 = vmatprep.subr.bf16.mxu1 %v4306_v0 }
 0x133   : > { %v825_v5 = vsel %vm819_vm9, %v810_v3, %v812_v37  ;;  %v826_v6 = vsel %vm819_vm9, %v812_v37, %v814_v36  ;;  %4309 = vmatpush1.bf16.msra.mxu1 %v4308_v35 }
 0x134   : > { %844 = vst [vmem:[#allocation2 + $0x2f8] sm:$0xff] %v825_v5  ;;  %845 = vst [vmem:[#allocation2 + $0x300] sm:$0xff] %v826_v6  ;;  %1246 = vrot.lane.b32.xlu1 %v5014_v13, %s4575_s9  ;;  %1191 = vrot.lane.b32.xlu0 %v4882_v49, %s4574_s8 }
 0x136   : > { %v818_v38 = vpop.permute.xlu1 %817  ;;  %v816_v10 = vpop.permute.xlu0 %815 }
 0x137   : > { %848 = vst.msk [vmem:[#allocation2 + $0x318] sm:$0xff] %vm217_vm0, %v818_v38  ;;  %v827_v39 = vsel %vm819_vm9, %v814_v36, %v816_v10  ;;  %v828_v11 = vsel %vm819_vm9, %v816_v10, %v818_v38  ;;  %vm1639_vm9 = vcmask 883712  }
 0x138   : > { %846 = vst [vmem:[#allocation2 + $0x308] sm:$0xff] %v827_v39  ;;  %847 = vst [vmem:[#allocation2 + $0x310] sm:$0xff] %v828_v11  ;;  %1250 = vrot.lane.b32.xlu1 %v4957_v15, %s4575_s9  ;;  %1248 = vrot.lane.b32.xlu0 %v4960_v41, %s4575_s9 }
 0x13a   : > { %v874_v40 = vpop.permute.xlu1 %873  ;;  %v872_v14 = vpop.permute.xlu0 %871 }
 0x13b   : > { %v894_v42 = vsel %vm893_vm10, %v872_v14, %v874_v40 }
 0x13c   : > { %1254 = vrot.lane.b32.xlu1 %v4969_v1, %s4575_s9  ;;  %1252 = vrot.lane.b32.xlu0 %v4972_v47, %s4575_s9 }
 0x13e   : > { %v878_v43 = vpop.permute.xlu1 %877  ;;  %v876_v44 = vpop.permute.xlu0 %875 }
 0x13f   : > { %v895_v45 = vsel %vm893_vm10, %v874_v40, %v876_v44  ;;  %v896_v46 = vsel %vm893_vm10, %v876_v44, %v878_v43 }
 0x140   : > { %1258 = vrot.lane.b32.xlu1 %v4982_v53, %s4575_s9  ;;  %1256 = vrot.lane.b32.xlu0 %v4985_v54, %s4575_s9 }
 0x142   : > { %v882_v48 = vpop.permute.xlu1 %881  ;;  %v880_v50 = vpop.permute.xlu0 %879 }
 0x143   : > { %v897_v51 = vsel %vm893_vm10, %v878_v43, %v880_v50  ;;  %v898_v52 = vsel %vm893_vm10, %v880_v50, %v882_v48 }
 0x144   : > { %918 = vst [vmem:[#allocation2 + $0x340] sm:$0xff] %v898_v52  ;;  %1262 = vrot.lane.b32.xlu1 %v4993_v58, %s4575_s9  ;;  %1260 = vrot.lane.b32.xlu0 %v4996_v59, %s4575_s9 }
 0x146   : > { %v886_v55 = vpop.permute.xlu1 %885  ;;  %v884_v56 = vpop.permute.xlu0 %883 }
 0x147   : > { %v899_v57 = vsel %vm893_vm10, %v882_v48, %v884_v56  ;;  %v900_v60 = vsel %vm893_vm10, %v884_v56, %v886_v55 }
 0x148   : > { %919 = vst [vmem:[#allocation2 + $0x348] sm:$0xff] %v899_v57  ;;  %920 = vst [vmem:[#allocation2 + $0x350] sm:$0xff] %v900_v60  ;;  %1266 = vrot.lane.b32.xlu1 %v4882_v49, %s4575_s9  ;;  %1264 = vrot.lane.b32.xlu0 %v5005_v4, %s4575_s9 }
 0x14a   : > { %v890_v61 = vpop.permute.xlu1 %889  ;;  %v888_v62 = vpop.permute.xlu0 %887 }
 0x14b   : > { %v901_v63 = vsel %vm893_vm10, %v886_v55, %v888_v62  ;;  %v902_v7 = vsel %vm893_vm10, %v888_v62, %v890_v61 }
 0x14c   : > { %921 = vst [vmem:[#allocation2 + $0x358] sm:$0xff] %v901_v63  ;;  %922 = vst [vmem:[#allocation2 + $0x360] sm:$0xff] %v902_v7  ;;  %1323 = vrot.lane.b32.xlu1 %v4960_v41, %s4576_s10  ;;  %1321 = vrot.lane.b32.xlu0 %v5014_v13, %s4576_s10 }
 0x14e   : > { %v947_v8 = vpop.permute.xlu1 %946  ;;  %v892_v9 = vpop.permute.xlu0 %891 }
 0x14f   : > { %v903_v12 = vsel %vm893_vm10, %v890_v61, %v892_v9 }
 0x150   : > { %923 = vst.msk [vmem:[#allocation2 + $0x368] sm:$0xff] %vm217_vm0, %v903_v12  ;;  %1327 = vrot.lane.b32.xlu1 %v4972_v47, %s4576_s10  ;;  %1325 = vrot.lane.b32.xlu0 %v4957_v15, %s4576_s10 }
 0x152   : > { %v951_v16 = vpop.permute.xlu1 %950  ;;  %v949_v17 = vpop.permute.xlu0 %948 }
 0x153   : > { %v969_v18 = vsel %vm968_vm11, %v947_v8, %v949_v17  ;;  %v970_v19 = vsel %vm968_vm11, %v949_v17, %v951_v16 }
 0x154   : > { %1331 = vrot.lane.b32.xlu1 %v4985_v54, %s4576_s10  ;;  %1329 = vrot.lane.b32.xlu0 %v4969_v1, %s4576_s10  ;;  %v4262_v20 = vpack.c.bf16 %v970_v19, %v895_v45  ;;  %v4264_v21 = vpack.c.bf16 %v969_v18, %v894_v42 }
 0x156   : > { %v955_v22 = vpop.permute.xlu1 %954  ;;  %v953_v23 = vpop.permute.xlu0 %952  ;;  %4263 = vmatprep.subr.bf16.mxu0 %v4262_v20 }
 0x157   : > { %v971_v24 = vsel %vm968_vm11, %v951_v16, %v953_v23  ;;  %v972_v25 = vsel %vm968_vm11, %v953_v23, %v955_v22  ;;  %4265 = vmatpush1.bf16.msra.mxu0 %v4264_v21 }
 0x158   : > { %1335 = vrot.lane.b32.xlu1 %v4996_v59, %s4576_s10  ;;  %1333 = vrot.lane.b32.xlu0 %v4982_v53, %s4576_s10  ;;  %v4310_v26 = vpack.c.bf16 %v972_v25, %v897_v51  ;;  %v4312_v27 = vpack.c.bf16 %v971_v24, %v896_v46 }
 0x15a   : > { %v959_v28 = vpop.permute.xlu1 %958  ;;  %v957_v29 = vpop.permute.xlu0 %956  ;;  %4311 = vmatprep.subr.bf16.mxu1 %v4310_v26 }
 0x15b   : > { %v973_v30 = vsel %vm968_vm11, %v955_v22, %v957_v29  ;;  %v974_v31 = vsel %vm968_vm11, %v957_v29, %v959_v28  ;;  %4313 = vmatpush1.bf16.msra.mxu1 %v4312_v27 }
 0x15c   : > { %993 = vst [vmem:[#allocation2 + $0x390] sm:$0xff] %v973_v30  ;;  %994 = vst [vmem:[#allocation2 + $0x398] sm:$0xff] %v974_v31  ;;  %1339 = vrot.lane.b32.xlu1 %v5005_v4, %s4576_s10  ;;  %1337 = vrot.lane.b32.xlu0 %v4993_v58, %s4576_s10 }
 0x15e   : > { %v963_v32 = vpop.permute.xlu1 %962  ;;  %v961_v3 = vpop.permute.xlu0 %960 }
 0x15f   : > { %v975_v33 = vsel %vm968_vm11, %v959_v28, %v961_v3  ;;  %v976_v2 = vsel %vm968_vm11, %v961_v3, %v963_v32 }
 0x160   : > { %995 = vst [vmem:[#allocation2 + $0x3a0] sm:$0xff] %v975_v33  ;;  %996 = vst [vmem:[#allocation2 + $0x3a8] sm:$0xff] %v976_v2  ;;  %1396 = vrot.lane.b32.xlu1 %v5014_v13, %s4577_s11  ;;  %1341 = vrot.lane.b32.xlu0 %v4882_v49, %s4576_s10 }
 0x162   : > { %v967_v34 = vpop.permute.xlu1 %966  ;;  %v965_v4 = vpop.permute.xlu0 %964 }
 0x163   : > { %v977_v0 = vsel %vm968_vm11, %v963_v32, %v965_v4  ;;  %v978_v35 = vsel %vm968_vm11, %v965_v4, %v967_v34  ;;  %vm1709_vm11 = vcmask 875520  }
 0x164   : > { %997 = vst [vmem:[#allocation2 + $0x3b0] sm:$0xff] %v977_v0  ;;  %998 = vst.msk [vmem:[#allocation2 + $0x3b8] sm:$0xff] %vm217_vm0, %v978_v35  ;;  %1400 = vrot.lane.b32.xlu1 %v4957_v15, %s4577_s11  ;;  %1398 = vrot.lane.b32.xlu0 %v4960_v41, %s4577_s11 }
 0x166   : > { %v1024_v36 = vpop.permute.xlu1 %1023  ;;  %v1022_v37 = vpop.permute.xlu0 %1021 }
 0x167   : > { %v1044_v49 = vsel %vm1043_vm12, %v1022_v37, %v1024_v36 }
 0x168   : > { %1404 = vrot.lane.b32.xlu1 %v4969_v1, %s4577_s11  ;;  %1402 = vrot.lane.b32.xlu0 %v4972_v47, %s4577_s11 }
 0x16a   : > { %v1028_v5 = vpop.permute.xlu1 %1027  ;;  %v1026_v6 = vpop.permute.xlu0 %1025 }
 0x16b   : > { %v1045_v38 = vsel %vm1043_vm12, %v1024_v36, %v1026_v6  ;;  %v1046_v10 = vsel %vm1043_vm12, %v1026_v6, %v1028_v5 }
 0x16c   : > { %1408 = vrot.lane.b32.xlu1 %v4982_v53, %s4577_s11  ;;  %1406 = vrot.lane.b32.xlu0 %v4985_v54, %s4577_s11 }
 0x16e   : > { %v1032_v39 = vpop.permute.xlu1 %1031  ;;  %v1030_v11 = vpop.permute.xlu0 %1029 }
 0x16f   : > { %v1047_v40 = vsel %vm1043_vm12, %v1028_v5, %v1030_v11  ;;  %v1048_v14 = vsel %vm1043_vm12, %v1030_v11, %v1032_v39 }
 0x170   : > { %1068 = vst [vmem:[#allocation2 + $0x3e0] sm:$0xff] %v1048_v14  ;;  %1475 = vrot.lane.b32.xlu1 %v4957_v15, %s4578_s12  ;;  %1473 = vrot.lane.b32.xlu0 %v4960_v41, %s4578_s12 }
 0x172   : > { %v1036_v42 = vpop.permute.xlu1 %1035  ;;  %v1034_v43 = vpop.permute.xlu0 %1033 }
 0x173   : > { %v1049_v44 = vsel %vm1043_vm12, %v1032_v39, %v1034_v43  ;;  %v1050_v45 = vsel %vm1043_vm12, %v1034_v43, %v1036_v42 }
 0x174   : > { %1069 = vst [vmem:[#allocation2 + $0x3e8] sm:$0xff] %v1049_v44  ;;  %1070 = vst [vmem:[#allocation2 + $0x3f0] sm:$0xff] %v1050_v45  ;;  %1479 = vrot.lane.b32.xlu1 %v4969_v1, %s4578_s12  ;;  %1477 = vrot.lane.b32.xlu0 %v4972_v47, %s4578_s12 }
 0x176   : > { %v1040_v46 = vpop.permute.xlu1 %1039  ;;  %v1038_v48 = vpop.permute.xlu0 %1037 }
 0x177   : > { %v1051_v50 = vsel %vm1043_vm12, %v1036_v42, %v1038_v48  ;;  %v1052_v51 = vsel %vm1043_vm12, %v1038_v48, %v1040_v46 }
 0x178   : > { %1071 = vst [vmem:[#allocation2 + $0x3f8] sm:$0xff] %v1051_v50  ;;  %1072 = vst [vmem:[#allocation2 + $0x400] sm:$0xff] %v1052_v51  ;;  %1550 = vrot.lane.b32.xlu1 %v4957_v15, %s4579_s13  ;;  %1548 = vrot.lane.b32.xlu0 %v4960_v41, %s4579_s13 }
 0x17a   : > { %v1097_v52 = vpop.permute.xlu1 %1096  ;;  %v1042_v55 = vpop.permute.xlu0 %1041 }
 0x17b   : > { %v1053_v56 = vsel %vm1043_vm12, %v1040_v46, %v1042_v55  ;;  %vm1779_vm12 = vcmask 867328  }
 0x17c   : > { %1073 = vst.msk [vmem:[#allocation2 + $0x408] sm:$0xff] %vm217_vm0, %v1053_v56  ;;  %1554 = vrot.lane.b32.xlu1 %v4969_v1, %s4579_s13  ;;  %1552 = vrot.lane.b32.xlu0 %v4972_v47, %s4579_s13 }
 0x17e   : > { %v1101_v57 = vpop.permute.xlu1 %1100  ;;  %v1099_v60 = vpop.permute.xlu0 %1098 }
 0x17f   : > { %v1119_v61 = vsel %vm1118_vm13, %v1097_v52, %v1099_v60  ;;  %v1120_v62 = vsel %vm1118_vm13, %v1099_v60, %v1101_v57 }
 0x180   : > { %1546 = vrot.lane.b32.xlu1 %v5014_v13, %s4579_s13  ;;  %1471 = vrot.lane.b32.xlu0 %v5014_v13, %s4578_s12  ;;  %v4266_v63 = vpack.c.bf16 %v1120_v62, %v1045_v38  ;;  %v4268_v7 = vpack.c.bf16 %v1119_v61, %v1044_v49 }
 0x182   : > { %v1105_v8 = vpop.permute.xlu1 %1104  ;;  %v1103_v9 = vpop.permute.xlu0 %1102  ;;  %4267 = vmatprep.subr.bf16.mxu0 %v4266_v63 }
 0x183   : > { %v1121_v12 = vsel %vm1118_vm13, %v1101_v57, %v1103_v9  ;;  %v1122_v16 = vsel %vm1118_vm13, %v1103_v9, %v1105_v8  ;;  %4269 = vmatpush1.bf16.msra.mxu0 %v4268_v7 }
 0x184   : > { %1623 = vrot.lane.b32.xlu1 %v4972_v47, %s4580_s14  ;;  %1621 = vrot.lane.b32.xlu0 %v4957_v15, %s4580_s14  ;;  %v4314_v17 = vpack.c.bf16 %v1122_v16, %v1047_v40  ;;  %v4316_v18 = vpack.c.bf16 %v1121_v12, %v1046_v10  ;;  %v5225_v40 = vld [vmem:[%s7035_s1 + $0x8] sm:$0xff] }
 0x185   : > { %4224 = vmatprep.mubr.msk.f32.mxu1 %vm2231_vm15, %v5225_v40  ;;  %4220 = vmatprep.mubr.msk.f32.mxu0 %vm2231_vm15, %v5225_v40 }
 0x186   : > { %v1109_v13 = vpop.permute.xlu1 %1108  ;;  %v1107_v19 = vpop.permute.xlu0 %1106  ;;  %4315 = vmatprep.subr.bf16.mxu1 %v4314_v17 }
 0x187   : > { %v1123_v20 = vsel %vm1118_vm13, %v1105_v8, %v1107_v19  ;;  %v1124_v21 = vsel %vm1118_vm13, %v1107_v19, %v1109_v13  ;;  %4317 = vmatpush1.bf16.msra.mxu1 %v4316_v18 }
 0x188   : > { %1143 = vst [vmem:[#allocation2 + $0x430] sm:$0xff] %v1123_v20  ;;  %1144 = vst [vmem:[#allocation2 + $0x438] sm:$0xff] %v1124_v21  ;;  %1627 = vrot.lane.b32.xlu1 %v4985_v54, %s4580_s14  ;;  %1625 = vrot.lane.b32.xlu0 %v4969_v1, %s4580_s14 }
 0x18a   : > { %v1113_v22 = vpop.permute.xlu1 %1112  ;;  %v1111_v23 = vpop.permute.xlu0 %1110 }
 0x18b   : > { %v1125_v24 = vsel %vm1118_vm13, %v1109_v13, %v1111_v23  ;;  %v1126_v25 = vsel %vm1118_vm13, %v1111_v23, %v1113_v22 }
 0x18c   : > { %1145 = vst [vmem:[#allocation2 + $0x440] sm:$0xff] %v1125_v24  ;;  %1146 = vst [vmem:[#allocation2 + $0x448] sm:$0xff] %v1126_v25  ;;  %1693 = vrot.lane.b32.xlu1 %v4972_v47, %s4581_s17  ;;  %1691 = vrot.lane.b32.xlu0 %v4957_v15, %s4581_s17 }
 0x18e   : > { %v1117_v26 = vpop.permute.xlu1 %1116  ;;  %v1115_v27 = vpop.permute.xlu0 %1114 }
 0x18f   : > { %v1127_v28 = vsel %vm1118_vm13, %v1113_v22, %v1115_v27  ;;  %v1128_v29 = vsel %vm1118_vm13, %v1115_v27, %v1117_v26  ;;  %v5286_v27 = vld [vmem:[#allocation2 + $0x30] sm:$0xff]  ;;  %vm1849_vm13 = vcmask 859136  }
 0x190   : > { %1147 = vst [vmem:[#allocation2 + $0x450] sm:$0xff] %v1127_v28  ;;  %1148 = vst.msk [vmem:[#allocation2 + $0x458] sm:$0xff] %vm217_vm0, %v1128_v29  ;;  %1697 = vrot.lane.b32.xlu1 %v4985_v54, %s4581_s17  ;;  %1695 = vrot.lane.b32.xlu0 %v4969_v1, %s4581_s17 }
 0x192   : > { %v1174_v30 = vpop.permute.xlu1 %1173  ;;  %v1172_v31 = vpop.permute.xlu0 %1171 }
 0x193   : > { %v1194_v32 = vsel %vm1193_vm14, %v1172_v31, %v1174_v30  ;;  %v5303_v31 = vld [vmem:[#allocation2 + $0x38] sm:$0xff] }
 0x194   : > { %1689 = vrot.lane.b32.xlu1 %v4960_v41, %s4581_s17  ;;  %1619 = vrot.lane.b32.xlu0 %v4960_v41, %s4580_s14 }
 0x196   : > { %v1178_v3 = vpop.permute.xlu1 %1177  ;;  %v1176_v33 = vpop.permute.xlu0 %1175 }
 0x197   : > { %v1195_v2 = vsel %vm1193_vm14, %v1174_v30, %v1176_v33  ;;  %v5198_v34 = vsel %vm1193_vm14, %v1176_v33, %v1178_v3 }
 0x198   : > { %1763 = vrot.lane.b32.xlu1 %v4972_v47, %s4582_s18  ;;  %1761 = vrot.lane.b32.xlu0 %v4957_v15, %s4582_s18 }
 0x19a   : > { %v1182_v4 = vpop.permute.xlu1 %1181  ;;  %v1180_v0 = vpop.permute.xlu0 %1179 }
 0x19b   : > { %v1197_v35 = vsel %vm1193_vm14, %v1178_v3, %v1180_v0  ;;  %v1198_v36 = vsel %vm1193_vm14, %v1180_v0, %v1182_v4 }
 0x19c   : > { %1218 = vst [vmem:[#allocation2 + $0x480] sm:$0xff] %v1198_v36  ;;  %1767 = vrot.lane.b32.xlu1 %v4985_v54, %s4582_s18  ;;  %1765 = vrot.lane.b32.xlu0 %v4969_v1, %s4582_s18 }
 0x19e   : > { %v1186_v37 = vpop.permute.xlu1 %1185  ;;  %v1184_v49 = vpop.permute.xlu0 %1183 }
 0x19f   : > { %v1199_v5 = vsel %vm1193_vm14, %v1182_v4, %v1184_v49  ;;  %v1200_v6 = vsel %vm1193_vm14, %v1184_v49, %v1186_v37 }
 0x1a0   : > { %1219 = vst [vmem:[#allocation2 + $0x488] sm:$0xff] %v1199_v5  ;;  %1220 = vst [vmem:[#allocation2 + $0x490] sm:$0xff] %v1200_v6  ;;  %1833 = vrot.lane.b32.xlu1 %v4972_v47, %s4583_s19  ;;  %1831 = vrot.lane.b32.xlu0 %v4957_v15, %s4583_s19 }
 0x1a2   : > { %v1190_v38 = vpop.permute.xlu1 %1189  ;;  %v1188_v10 = vpop.permute.xlu0 %1187 }
 0x1a3   : > { %v1201_v39 = vsel %vm1193_vm14, %v1186_v37, %v1188_v10  ;;  %v1202_v11 = vsel %vm1193_vm14, %v1188_v10, %v1190_v38 }
 0x1a4   : > { %1221 = vst [vmem:[#allocation2 + $0x498] sm:$0xff] %v1201_v39  ;;  %1222 = vst [vmem:[#allocation2 + $0x4a0] sm:$0xff] %v1202_v11  ;;  %1837 = vrot.lane.b32.xlu1 %v4985_v54, %s4583_s19  ;;  %1835 = vrot.lane.b32.xlu0 %v4969_v1, %s4583_s19 }
 0x1a6   : > { %v1247_v14 = vpop.permute.xlu1 %1246  ;;  %v1192_v42 = vpop.permute.xlu0 %1191 }
 0x1a7   : > { %v1203_v43 = vsel %vm1193_vm14, %v1190_v38, %v1192_v42  ;;  %vm1919_vm14 = vcmask 850944  }
 0x1a8   : > { %1223 = vst.msk [vmem:[#allocation2 + $0x4a8] sm:$0xff] %vm217_vm0, %v1203_v43  ;;  %1829 = vrot.lane.b32.xlu1 %v4960_v41, %s4583_s19  ;;  %1759 = vrot.lane.b32.xlu0 %v4960_v41, %s4582_s18 }
 0x1aa   : > { %v1251_v44 = vpop.permute.xlu1 %1250  ;;  %v1249_v45 = vpop.permute.xlu0 %1248 }
 0x1ab   : > { %v1269_v46 = vsel %vm1268_vm3, %v1247_v14, %v1249_v45  ;;  %v1270_v48 = vsel %vm1268_vm3, %v1249_v45, %v1251_v44 }
 0x1ac   : > { %1903 = vrot.lane.b32.xlu1 %v4972_v47, %s4584_s26  ;;  %1901 = vrot.lane.b32.xlu0 %v4957_v15, %s4584_s26  ;;  %v4270_v50 = vpack.c.bf16 %v1270_v48, %v1195_v2  ;;  %v4272_v51 = vpack.c.bf16 %v1269_v46, %v1194_v32  ;;  %v5308_v32 = vld [vmem:[%s4627_s20 + $0x48] sm:$0xff] }
 0x1ae   : > { %v1255_v52 = vpop.permute.xlu1 %1254  ;;  %v1253_v55 = vpop.permute.xlu0 %1252  ;;  %4271 = vmatprep.subr.bf16.mxu0 %v4270_v50 }
 0x1af   : > { %v1271_v56 = vsel %vm1268_vm3, %v1251_v44, %v1253_v55  ;;  %v1272_v57 = vsel %vm1268_vm3, %v1253_v55, %v1255_v52  ;;  %4273 = vmatpush1.bf16.msra.mxu0 %v4272_v51 }
 0x1b0   : > { %1907 = vrot.lane.b32.xlu1 %v4985_v54, %s4584_s26  ;;  %1905 = vrot.lane.b32.xlu0 %v4969_v1, %s4584_s26  ;;  %v4318_v47 = vpack.c.bf16 %v1272_v57, %v1197_v35  ;;  %v4320_v60 = vpack.c.bf16 %v1271_v56, %v5198_v34 }
 0x1b2   : > { %v1259_v15 = vpop.permute.xlu1 %1258  ;;  %v1257_v61 = vpop.permute.xlu0 %1256  ;;  %4319 = vmatprep.subr.bf16.mxu1 %v4318_v47 }
 0x1b3   : > { %v1273_v62 = vsel %vm1268_vm3, %v1255_v52, %v1257_v61  ;;  %v1274_v63 = vsel %vm1268_vm3, %v1257_v61, %v1259_v15  ;;  %4321 = vmatpush1.bf16.msra.mxu1 %v4320_v60 }
 0x1b4   : > { %1293 = vst [vmem:[#allocation2 + $0x4d0] sm:$0xff] %v1273_v62  ;;  %1294 = vst [vmem:[#allocation2 + $0x4d8] sm:$0xff] %v1274_v63  ;;  %1410 = vrot.lane.b32.xlu1 %v4996_v59, %s4577_s11  ;;  %1899 = vrot.lane.b32.xlu0 %v4960_v41, %s4584_s26 }
 0x1b6   : > { %v1263_v1 = vpop.permute.xlu1 %1262  ;;  %v1261_v7 = vpop.permute.xlu0 %1260 }
 0x1b7   : > { %v1275_v8 = vsel %vm1268_vm3, %v1259_v15, %v1261_v7  ;;  %v5258_v9 = vsel %vm1268_vm3, %v1261_v7, %v1263_v1 }
 0x1b8   : > { %1295 = vst [vmem:[#allocation2 + $0x4e0] sm:$0xff] %v1275_v8  ;;  %1481 = vrot.lane.b32.xlu1 %v4985_v54, %s4578_s12  ;;  %1412 = vrot.lane.b32.xlu0 %v4993_v58, %s4577_s11 }
 0x1ba   : > { %v1267_v12 = vpop.permute.xlu1 %1266  ;;  %v1265_v16 = vpop.permute.xlu0 %1264 }
 0x1bb   : > { %v1277_v17 = vsel %vm1268_vm3, %v1263_v1, %v1265_v16  ;;  %v1278_v41 = vsel %vm1268_vm3, %v1265_v16, %v1267_v12  ;;  %vm2783_vm3 = vcmask 1048272  }
 0x1bc   : > { %1297 = vst [vmem:[#allocation2 + $0x4f0] sm:$0xff] %v1277_v17  ;;  %1298 = vst.msk [vmem:[#allocation2 + $0x4f8] sm:$0xff] %vm217_vm0, %v1278_v41  ;;  %1485 = vrot.lane.b32.xlu1 %v4996_v59, %s4578_s12  ;;  %1483 = vrot.lane.b32.xlu0 %v4982_v53, %s4578_s12  ;;  %v1384_v41 = vld [vmem:[%s4627_s20 + $0x50] sm:$0xff] }
 0x1be   : > { %v1324_v18 = vpop.permute.xlu1 %1323  ;;  %v1322_v13 = vpop.permute.xlu0 %1321 }
 0x1bf   : > { %v1344_v19 = vsel %vm1343_vm4, %v1322_v13, %v1324_v18 }
 0x1c0   : > { %1556 = vrot.lane.b32.xlu1 %v4985_v54, %s4579_s13  ;;  %1487 = vrot.lane.b32.xlu0 %v4993_v58, %s4578_s12 }
 0x1c2   : > { %v1328_v20 = vpop.permute.xlu1 %1327  ;;  %v1326_v21 = vpop.permute.xlu0 %1325 }
 0x1c3   : > { %v1345_v22 = vsel %vm1343_vm4, %v1324_v18, %v1326_v21  ;;  %v1346_v23 = vsel %vm1343_vm4, %v1326_v21, %v1328_v20 }
 0x1c4   : > { %1560 = vrot.lane.b32.xlu1 %v4996_v59, %s4579_s13  ;;  %1558 = vrot.lane.b32.xlu0 %v4982_v53, %s4579_s13  ;;  %v5293_v59 = vld [vmem:[%s4627_s20 + $0x40] sm:$0xff] }
 0x1c6   : > { %v1332_v24 = vpop.permute.xlu1 %1331  ;;  %v1330_v25 = vpop.permute.xlu0 %1329 }
 0x1c7   : > { %v1347_v54 = vsel %vm1343_vm4, %v1328_v20, %v1330_v25  ;;  %v5284_v26 = vsel %vm1343_vm4, %v1330_v25, %v1332_v24 }
 0x1c8   : > { %1629 = vrot.lane.b32.xlu1 %v5286_v27, %s4580_s14  ;;  %1562 = vrot.lane.b32.xlu0 %v4993_v58, %s4579_s13 }
 0x1ca   : > { %v1336_v28 = vpop.permute.xlu1 %1335  ;;  %v1334_v53 = vpop.permute.xlu0 %1333 }
 0x1cb   : > { %v5296_v29 = vsel %vm1343_vm4, %v1332_v24, %v1334_v53  ;;  %v5299_v30 = vsel %vm1343_vm4, %v1334_v53, %v1336_v28  ;;  %v4585_v53 = vmov 0  }
 0x1cc   : > { %1633 = vrot.lane.b32.xlu1 %v5293_v59, %s4580_s14  ;;  %1631 = vrot.lane.b32.xlu0 %v5303_v31, %s4580_s14 }
 0x1cd   : > { %4545 = vset.pattern.permute.xlu0 %v4585_v53  ;;  %4546 = vset.pattern.permute.xlu1 %v4585_v53  ;;  %v1973_v53 = vld [vmem:[#allocation2 + $0x80] sm:$0xff] }
 0x1ce   : > { %v1340_v58 = vpop.permute.xlu1 %1339  ;;  %v1338_v3 = vpop.permute.xlu0 %1337 }
 0x1cf   : > { %v5311_v33 = vsel %vm1343_vm4, %v1336_v28, %v1338_v3  ;;  %v1352_v2 = vsel %vm1343_vm4, %v1338_v3, %v1340_v58 }
 0x1d0   : > { %1372 = vst [vmem:[#allocation2 + $0x540] sm:$0xff] %v1352_v2  ;;  %1699 = vrot.lane.b32.xlu1 %v5286_v27, %s4581_s17  ;;  %1635 = vrot.lane.b32.xlu0 %v5308_v32, %s4580_s14 }
 0x1d2   : > { %v1397_v34 = vpop.permute.xlu1 %1396  ;;  %v1342_v4 = vpop.permute.xlu0 %1341 }
 0x1d3   : > { %v1353_v0 = vsel %vm1343_vm4, %v1340_v58, %v1342_v4 }
 0x1d4   : > { %1373 = vst.msk [vmem:[#allocation2 + $0x548] sm:$0xff] %vm217_vm0, %v1353_v0  ;;  %1703 = vrot.lane.b32.xlu1 %v5293_v59, %s4581_s17  ;;  %1701 = vrot.lane.b32.xlu0 %v5303_v31, %s4581_s17 }
 0x1d6   : > { %v1401_v35 = vpop.permute.xlu1 %1400  ;;  %v1399_v36 = vpop.permute.xlu0 %1398 }
 0x1d7   : > { %v1419_v37 = vsel %vm1418_vm6, %v1397_v34, %v1399_v36  ;;  %v1420_v49 = vsel %vm1418_vm6, %v1399_v36, %v1401_v35 }
 0x1d8   : > { %1769 = vrot.lane.b32.xlu1 %v5286_v27, %s4582_s18  ;;  %1705 = vrot.lane.b32.xlu0 %v5308_v32, %s4581_s17  ;;  %v4274_v5 = vpack.c.bf16 %v1420_v49, %v1345_v22  ;;  %v4276_v6 = vpack.c.bf16 %v1419_v37, %v1344_v19  ;;  %v2207_v49 = vld [vmem:[%s7036_s2] sm:$0xff] }
 0x1da   : > { %v1405_v38 = vpop.permute.xlu1 %1404  ;;  %v1403_v10 = vpop.permute.xlu0 %1402  ;;  %4275 = vmatprep.subr.bf16.mxu0 %v4274_v5 }
 0x1db   : > { %v1421_v39 = vsel %vm1418_vm6, %v1401_v35, %v1403_v10  ;;  %v1422_v11 = vsel %vm1418_vm6, %v1403_v10, %v1405_v38  ;;  %4277 = vmatpush1.bf16.msra.mxu0 %v4276_v6 }
 0x1dc   : > { %1773 = vrot.lane.b32.xlu1 %v5293_v59, %s4582_s18  ;;  %1771 = vrot.lane.b32.xlu0 %v5303_v31, %s4582_s18  ;;  %v4322_v14 = vpack.c.bf16 %v1422_v11, %v1347_v54  ;;  %v4324_v42 = vpack.c.bf16 %v1421_v39, %v1346_v23 }
 0x1de   : > { %v5336_v43 = vpop.permute.xlu1 %1408  ;;  %v1407_v44 = vpop.permute.xlu0 %1406  ;;  %4323 = vmatprep.subr.bf16.mxu1 %v4322_v14 }
 0x1df   : > { %v5339_v45 = vsel %vm1418_vm6, %v1405_v38, %v1407_v44  ;;  %v5343_v46 = vsel %vm1418_vm6, %v1407_v44, %v5336_v43  ;;  %4325 = vmatpush1.bf16.msra.mxu1 %v4324_v42 }
 0x1e0   : > { %1839 = vrot.lane.b32.xlu1 %v5286_v27, %s4583_s19  ;;  %1775 = vrot.lane.b32.xlu0 %v5308_v32, %s4582_s18  ;;  %v4370_v48 = vpack.c.bf16 %v5343_v46, %v5296_v29  ;;  %v4372_v50 = vpack.c.bf16 %v5339_v45, %v5284_v26 }
 0x1e2   : > { %v1476_v51 = vpop.permute.xlu1 %1475  ;;  %v1474_v52 = vpop.permute.xlu0 %1473 }
 0x1e3   : > { %v1495_v55 = vsel %vm1493_vm7, %v1474_v52, %v1476_v51 }
 0x1e4   : > { %1843 = vrot.lane.b32.xlu1 %v5293_v59, %s4583_s19  ;;  %1841 = vrot.lane.b32.xlu0 %v5303_v31, %s4583_s19 }
 0x1e6   : > { %v5358_v56 = vpop.permute.xlu1 %1479  ;;  %v1478_v57 = vpop.permute.xlu0 %1477 }
 0x1e7   : > { %v1496_v47 = vsel %vm1493_vm7, %v1476_v51, %v1478_v57  ;;  %v1497_v60 = vsel %vm1493_vm7, %v1478_v57, %v5358_v56 }
 0x1e8   : > { %1909 = vrot.lane.b32.xlu1 %v5286_v27, %s4584_s26  ;;  %1845 = vrot.lane.b32.xlu0 %v5308_v32, %s4583_s19 }
 0x1ea   : > { %v1551_v15 = vpop.permute.xlu1 %1550  ;;  %v1549_v61 = vpop.permute.xlu0 %1548 }
 0x1eb   : > { %v1570_v62 = vsel %vm1568_vm8, %v1549_v61, %v1551_v15 }
 0x1ec   : > { %1913 = vrot.lane.b32.xlu1 %v5293_v59, %s4584_s26  ;;  %1911 = vrot.lane.b32.xlu0 %v5303_v31, %s4584_s26  ;;  %v4278_v63 = vpack.c.bf16 %v1570_v62, %v1495_v55 }
 0x1ee   : > { %v5372_v1 = vpop.permute.xlu1 %1554  ;;  %v1553_v7 = vpop.permute.xlu0 %1552  ;;  %4279 = vmatprep.subr.bf16.mxu0 %v4278_v63 }
 0x1ef   : > { %v1571_v8 = vsel %vm1568_vm8, %v1551_v15, %v1553_v7  ;;  %v1572_v12 = vsel %vm1568_vm8, %v1553_v7, %v5372_v1 }
 0x1f0   : > { %1414 = vrot.lane.b32.xlu1 %v5308_v32, %s4577_s11  ;;  %1915 = vrot.lane.b32.xlu0 %v5308_v32, %s4584_s26  ;;  %v4326_v16 = vpack.c.bf16 %v1572_v12, %v1497_v60  ;;  %v4328_v17 = vpack.c.bf16 %v1571_v8, %v1496_v47 }
 0x1f2   : > { %v1547_v18 = vpop.permute.xlu1 %1546  ;;  %v1472_v13 = vpop.permute.xlu0 %1471  ;;  %4327 = vmatprep.subr.bf16.mxu1 %v4326_v16 }
 0x1f3   : > { %v1569_v19 = vsel %vm1568_vm8, %v1547_v18, %v1549_v61  ;;  %v1494_v20 = vsel %vm1493_vm7, %v1472_v13, %v1474_v52  ;;  %4329 = vmatpush1.bf16.msra.mxu1 %v4328_v17 }
 0x1f4   : > { %1489 = vrot.lane.b32.xlu1 %v5308_v32, %s4578_s12  ;;  %1416 = vrot.lane.b32.xlu0 %v1384_v41, %s4577_s11  ;;  %v4280_v21 = vpack.c.bf16 %v1569_v19, %v1494_v20  ;;  %v2208_v19 = vld [vmem:[%s7036_s2 + $0x8] sm:$0xff]  ;;  %v2210_v20 = vld [vmem:[%s7036_s2 + $0x18] sm:$0xff] }
 0x1f6   : > { %v1624_v22 = vpop.permute.xlu1 %1623  ;;  %v1622_v23 = vpop.permute.xlu0 %1621  ;;  %4281 = vmatpush1.bf16.msra.mxu0 %v4280_v21 }
 0x1f7   : > { %v1641_v24 = vsel %vm1639_vm9, %v1622_v23, %v1624_v22 }
 0x1f8   : > { %1564 = vrot.lane.b32.xlu1 %v5308_v32, %s4579_s13  ;;  %1491 = vrot.lane.b32.xlu0 %v1384_v41, %s4578_s12 }
 0x1fa   : > { %v5391_v25 = vpop.permute.xlu1 %1627  ;;  %v1626_v54 = vpop.permute.xlu0 %1625 }
 0x1fb   : > { %v1642_v59 = vsel %vm1639_vm9, %v1624_v22, %v1626_v54  ;;  %v1643_v28 = vsel %vm1639_vm9, %v1626_v54, %v5391_v25  ;;  %v1974_v54 = vld [vmem:[#allocation2 + $0x88] sm:$0xff] }
 0x1fc   : > { %1637 = vrot.lane.b32.xlu1 %v1384_v41, %s4580_s14  ;;  %1566 = vrot.lane.b32.xlu0 %v1384_v41, %s4579_s13 }
 0x1fe   : > { %v1694_v58 = vpop.permute.xlu1 %1693  ;;  %v1692_v32 = vpop.permute.xlu0 %1691 }
 0x1ff   : > { %v1711_v3 = vsel %vm1709_vm11, %v1692_v32, %v1694_v58 }
 0x200   : > { %1777 = vrot.lane.b32.xlu1 %v1384_v41, %s4582_s18  ;;  %1707 = vrot.lane.b32.xlu0 %v1384_v41, %s4581_s17  ;;  %v4282_v2 = vpack.c.bf16 %v1711_v3, %v1641_v24  ;;  %v5445_v3 = vld [vmem:[%s7035_s1] sm:$0xff] }
 0x202   : > { %v5401_v34 = vpop.permute.xlu1 %1697  ;;  %v1696_v4 = vpop.permute.xlu0 %1695  ;;  %4283 = vmatprep.subr.bf16.mxu0 %v4282_v2  ;;  %v1994_v2 = vld [vmem:[#allocation2 + $0x128] sm:$0xff] }
 0x203   : > { %v1712_v0 = vsel %vm1709_vm11, %v1694_v58, %v1696_v4  ;;  %v1713_v35 = vsel %vm1709_vm11, %v1696_v4, %v5401_v34  ;;  %v4386_v4 = vpack.c.bf16 %v1974_v54, %v5303_v31  ;;  %v2011_v54 = vld [vmem:[#allocation2 + $0x1b0] sm:$0xff] }
 0x204   : > { %1917 = vrot.lane.b32.xlu1 %v1384_v41, %s4584_s26  ;;  %1847 = vrot.lane.b32.xlu0 %v1384_v41, %s4583_s19  ;;  %v4330_v36 = vpack.c.bf16 %v1713_v35, %v1643_v28  ;;  %v4332_v37 = vpack.c.bf16 %v1712_v0, %v1642_v59  ;;  %v1972_v0 = vld [vmem:[#allocation2 + $0x78] sm:$0xff]  ;;  %v4388_v35 = vpack.c.bf16 %v1973_v53, %v5286_v27 }
 0x206   : > { %v1690_v5 = vpop.permute.xlu1 %1689  ;;  %v1620_v6 = vpop.permute.xlu0 %1619  ;;  %4331 = vmatprep.subr.bf16.mxu1 %v4330_v36  ;;  %v1984_v36 = vld [vmem:[#allocation2 + $0xd8] sm:$0xff] }
 0x207   : > { %v1710_v38 = vsel %vm1709_vm11, %v1690_v5, %v1692_v32  ;;  %v1640_v10 = vsel %vm1639_vm9, %v1620_v6, %v1622_v23  ;;  %4333 = vmatpush1.bf16.msra.mxu1 %v4332_v37  ;;  %v2209_v23 = vld [vmem:[%s7036_s2 + $0x10] sm:$0xff]  ;;  %v4390_v6 = vpack.c.bf16 %v1994_v2, %v1984_v36  ;;  %v2033_v2 = vld [vmem:[#allocation2 + $0x260] sm:$0xff] }
 0x208   : > { %v4284_v39 = vpack.c.bf16 %v1710_v38, %v1640_v10  ;;  %2213 = vperm.xlu0 %4545, %v2207_v49   ;;  %2218 = vperm.xlu1 %4546, %v2208_v19   ;;  %v1971_v37 = vld [vmem:[#allocation2 + $0x70] sm:$0xff]  ;;  %v1992_v38 = vld [vmem:[#allocation2 + $0x118] sm:$0xff]  ;;  %v1993_v10 = vld [vmem:[#allocation2 + $0x120] sm:$0xff] }
 0x209   : > { %v5483_v19 = vld [vmem:[%s7035_s1 + $0x28] sm:$0xff]  ;;  %v2001_v36 = vld [vmem:[#allocation2 + $0x160] sm:$0xff] }
 0x20a   : > { %v1764_v11 = vpop.permute.xlu1 %1763  ;;  %v1762_v14 = vpop.permute.xlu0 %1761  ;;  %4285 = vmatpush1.bf16.msra.mxu0 %v4284_v39  ;;  %v5453_v39 = vld [vmem:[%s7035_s1 + $0x18] sm:$0xff] }
 0x20b   : > { %v1781_v42 = vsel %vm1779_vm12, %v1762_v14, %v1764_v11 }
 0x20c   : > { %2228 = vperm.xlu0 %4545, %v2210_v20   ;;  %2223 = vperm.xlu1 %4546, %v2209_v23  }
 0x20e   : > { %v5414_v44 = vpop.permute.xlu1 %1767  ;;  %v1766_v51 = vpop.permute.xlu0 %1765 }
 0x20f   : > { %v1782_v52 = vsel %vm1779_vm12, %v1764_v11, %v1766_v51  ;;  %v1783_v55 = vsel %vm1779_vm12, %v1766_v51, %v5414_v44  ;;  %v4549_v11 = vld [vmem:[#allocation2 + $0x28] sm:$0xff]  ;;  %v4550_v51 = vld [vmem:[#allocation2 + $0x20] sm:$0xff] }
 0x212   : > { %v1834_v57 = vpop.permute.xlu1 %1833  ;;  %v1832_v47 = vpop.permute.xlu0 %1831 }
 0x213   : > { %v1851_v60 = vsel %vm1849_vm13, %v1832_v47, %v1834_v57 }
 0x214   : > { %v4286_v15 = vpack.c.bf16 %v1851_v60, %v1781_v42  ;;  %v2014_v42 = vld [vmem:[#allocation2 + $0x1c8] sm:$0xff]  ;;  %v2004_v60 = vld [vmem:[#allocation2 + $0x178] sm:$0xff] }
 0x216   : > { %v5420_v61 = vpop.permute.xlu1 %1837  ;;  %v1836_v62 = vpop.permute.xlu0 %1835  ;;  %4287 = vmatprep.subr.bf16.mxu0 %v4286_v15  ;;  %v1991_v15 = vld [vmem:[#allocation2 + $0x110] sm:$0xff] }
 0x217   : > { %v1852_v63 = vsel %vm1849_vm13, %v1834_v57, %v1836_v62  ;;  %v1853_v7 = vsel %vm1849_vm13, %v1836_v62, %v5420_v61  ;;  %v1983_v57 = vld [vmem:[#allocation2 + $0xd0] sm:$0xff] }
 0x218   : > { %v4334_v8 = vpack.c.bf16 %v1853_v7, %v1783_v55  ;;  %v4336_v12 = vpack.c.bf16 %v1852_v63, %v1782_v52  ;;  %v4340_v52 = vpack.c.bf16 %v1971_v37, %v4550_v51  ;;  %v1982_v55 = vld [vmem:[#allocation2 + $0xc8] sm:$0xff]  ;;  %v4394_v7 = vpack.c.bf16 %v2014_v42, %v2004_v60 }
 0x219   : > { %v2054_v37 = vld [vmem:[#allocation2 + $0x308] sm:$0xff] }
 0x21a   : > { %v1830_v16 = vpop.permute.xlu1 %1829  ;;  %v1760_v17 = vpop.permute.xlu0 %1759  ;;  %4335 = vmatprep.subr.bf16.mxu1 %v4334_v8  ;;  %v2012_v8 = vld [vmem:[#allocation2 + $0x1b8] sm:$0xff] }
 0x21b   : > { %v1850_v41 = vsel %vm1849_vm13, %v1830_v16, %v1832_v47  ;;  %v1780_v18 = vsel %vm1779_vm12, %v1760_v17, %v1762_v14  ;;  %4337 = vmatpush1.bf16.msra.mxu1 %v4336_v12  ;;  %v4338_v14 = vpack.c.bf16 %v1972_v0, %v4549_v11  ;;  %v4392_v47 = vpack.c.bf16 %v1993_v10, %v1983_v57  ;;  %v2013_v12 = vld [vmem:[#allocation2 + $0x1c0] sm:$0xff]  ;;  %v5470_v16 = vld [vmem:[%s7035_s1 + $0x10] sm:$0xff]  ;;  %v2044_v11 = vld [vmem:[#allocation2 + $0x2b8] sm:$0xff] }
 0x21c   : > { %v4288_v13 = vpack.c.bf16 %v1850_v41, %v1780_v18  ;;  %v1981_v18 = vld [vmem:[#allocation2 + $0xc0] sm:$0xff] }
 0x21d   : > { %v4344_v20 = vpack.c.bf16 %v1991_v15, %v1981_v18  ;;  %v2053_v57 = vld [vmem:[#allocation2 + $0x300] sm:$0xff] }
 0x21e   : > { %v1904_v21 = vpop.permute.xlu1 %1903  ;;  %v1902_v22 = vpop.permute.xlu0 %1901  ;;  %4289 = vmatpush1.bf16.msra.mxu0 %v4288_v13  ;;  %v2034_v13 = vld [vmem:[#allocation2 + $0x268] sm:$0xff]  ;;  %v2021_v15 = vld [vmem:[#allocation2 + $0x200] sm:$0xff] }
 0x21f   : > { %v1921_v24 = vsel %vm1919_vm14, %v1902_v22, %v1904_v21 }
 0x220   : > { %2292 = vmatprep.subr.mxu0 %v1921_v24  ;;  %v2024_v24 = vld [vmem:[#allocation2 + $0x218] sm:$0xff] }
 0x222   : > { %v5437_v59 = vpop.permute.xlu1 %1907  ;;  %v1906_v28 = vpop.permute.xlu0 %1905 }
 0x223   : > { %v1922_v58 = vsel %vm1919_vm14, %v1904_v21, %v1906_v28  ;;  %v1923_v32 = vsel %vm1919_vm14, %v1906_v28, %v5437_v59  ;;  %v2002_v21 = vld [vmem:[#allocation2 + $0x168] sm:$0xff] }
 0x224   : > { %2381 = vmatprep.subr.mxu1 %v1923_v32  ;;  %v2032_v32 = vld [vmem:[#allocation2 + $0x258] sm:$0xff] }
 0x225   : > { %2382 = vmatpush1.msra.mxu1 %v1922_v58  ;;  %v4398_v58 = vpack.c.bf16 %v2034_v13, %v2024_v24  ;;  %v2073_v24 = vld [vmem:[#allocation2 + $0x3a0] sm:$0xff] }
 0x226   : > { %v1411_v49 = vpop.permute.xlu1 %1410  ;;  %v1900_v5 = vpop.permute.xlu0 %1899  ;;  %4387 = vmatprep.subr.bf16.mxu1 %v4386_v4  ;;  %2398 = vmatmul.mubr.f32.vlgmr.msra.gmra.mrb[0].mxu1 %v5445_v3  ;;  %v5494_v4 = vld [vmem:[%s7035_s1 + $0x20] sm:$0xff] }
 0x227   : > { %v5457_v31 = vsel %vm1418_vm6, %v5336_v43, %v1411_v49  ;;  %v1920_v27 = vsel %vm1919_vm14, %v1900_v5, %v1902_v22  ;;  %4389 = vmatpush1.bf16.msra.mxu1 %v4388_v35  ;;  %4225 = vmatprep.mubr.msk.f32.mxu1 %vm2231_vm15, %v5453_v39  ;;  %v4342_v43 = vpack.c.bf16 %v1992_v38, %v1982_v55  ;;  %v2003_v22 = vld [vmem:[#allocation2 + $0x170] sm:$0xff]  ;;  %v2052_v55 = vld [vmem:[#allocation2 + $0x2f8] sm:$0xff] }
 0x228   : > { %2293 = vmatpush1.msra.mxu0 %v1920_v27  ;;  %4391 = vmatprep.subr.bf16.mxu1 %v4390_v6  ;;  %v4396_v23 = vpack.c.bf16 %v2013_v12, %v2003_v22  ;;  %v4348_v5 = vpack.c.bf16 %v2011_v54, %v2001_v36  ;;  %v2022_v6 = vld [vmem:[#allocation2 + $0x208] sm:$0xff]  ;;  %v2023_v38 = vld [vmem:[#allocation2 + $0x210] sm:$0xff] }
 0x229   : > { %2309 = vmatmul.mubr.f32.vlgmr.msra.gmra.mrb[0].mxu0 %v5445_v3  ;;  %4339 = vmatprep.subr.bf16.mxu0 %v4338_v14  ;;  %v4350_v10 = vpack.c.bf16 %v2032_v32, %v2022_v6  ;;  %v4400_v27 = vpack.c.bf16 %v2033_v2, %v2023_v38  ;;  %v2031_v14 = vld [vmem:[#allocation2 + $0x250] sm:$0xff]  ;;  %v2062_v2 = vld [vmem:[#allocation2 + $0x348] sm:$0xff]  ;;  %v2084_v6 = vld [vmem:[#allocation2 + $0x3f8] sm:$0xff] }
 0x22a   : > { %v1482_v62 = vpop.permute.xlu1 %1481  ;;  %v5463_v63 = vpop.permute.xlu0 %1412  ;;  %4341 = vmatpush1.bf16.msra.mxu0 %v4340_v52  ;;  %4221 = vmatprep.mubr.msk.f32.mxu0 %vm2231_vm15, %v5453_v39  ;;  %v4402_v52 = vpack.c.bf16 %v2054_v37, %v2044_v11  ;;  %v2043_v12 = vld [vmem:[#allocation2 + $0x2b0] sm:$0xff]  ;;  %v2092_v11 = vld [vmem:[#allocation2 + $0x438] sm:$0xff] }
 0x22b   : > { %v5474_v17 = vsel %vm1493_vm7, %v5358_v56, %v1482_v62  ;;  %v5478_v41 = vsel %vm1418_vm6, %v1411_v49, %v5463_v63  ;;  %4343 = vmatprep.subr.bf16.mxu0 %v4342_v43  ;;  %4393 = vmatpush1.bf16.msra.mxu1 %v4392_v47  ;;  %v4346_v56 = vpack.c.bf16 %v2012_v8, %v2002_v21  ;;  %v5505_v49 = vld [vmem:[%s7035_s1 + $0x38] sm:$0xff]  ;;  %v5518_v43 = vld [vmem:[%s7035_s1 + $0x30] sm:$0xff]  ;;  %v2042_v8 = vld [vmem:[#allocation2 + $0x2a8] sm:$0xff] }
 0x22c   : > { %4395 = vmatprep.subr.bf16.mxu1 %v4394_v7  ;;  %2404 = vmatmul.mubr.f32.gmra.mrb[2].mxu1 %v5470_v16  ;;  %v4352_v7 = vpack.c.bf16 %v2031_v14, %v2021_v15  ;;  %v4354_v18 = vpack.c.bf16 %v2052_v55, %v2042_v8  ;;  %v4404_v13 = vpack.c.bf16 %v2053_v57, %v2043_v12  ;;  %v2051_v21 = vld [vmem:[#allocation2 + $0x2f0] sm:$0xff]  ;;  %v2093_v14 = vld [vmem:[#allocation2 + $0x440] sm:$0xff]  ;;  %v2082_v15 = vld [vmem:[#allocation2 + $0x3e8] sm:$0xff] }
 0x22d   : > { %2315 = vmatmul.mubr.f32.gmra.mrb[2].mxu0 %v5470_v16  ;;  %4226 = vmatprep.mubr.msk.f32.mxu1 %vm2231_vm15, %v5483_v19  ;;  %v2063_v36 = vld [vmem:[#allocation2 + $0x350] sm:$0xff]  ;;  %v2061_v55 = vld [vmem:[#allocation2 + $0x340] sm:$0xff]  ;;  %v2104_v12 = vld [vmem:[#allocation2 + $0x498] sm:$0xff] }
 0x22e   : > { %v1486_v28 = vpop.permute.xlu1 %1485  ;;  %v1484_v53 = vpop.permute.xlu0 %1483  ;;  %4345 = vmatpush1.bf16.msra.mxu0 %v4344_v20  ;;  %4222 = vmatprep.mubr.msk.f32.mxu0 %vm2231_vm15, %v5483_v19  ;;  %v2064_v20 = vld [vmem:[#allocation2 + $0x358] sm:$0xff]  ;;  %v2071_v38 = vld [vmem:[#allocation2 + $0x390] sm:$0xff] }
 0x22f   : > { %v5497_v0 = vsel %vm1493_vm7, %v1482_v62, %v1484_v53  ;;  %v5500_v35 = vsel %vm1493_vm7, %v1484_v53, %v1486_v28  ;;  %4347 = vmatprep.subr.bf16.mxu0 %v4346_v56  ;;  %4397 = vmatpush1.bf16.msra.mxu1 %v4396_v23  ;;  %v2074_v62 = vld [vmem:[#allocation2 + $0x3a8] sm:$0xff]  ;;  %v2072_v23 = vld [vmem:[#allocation2 + $0x398] sm:$0xff]  ;;  %v2041_v53 = vld [vmem:[#allocation2 + $0x2a0] sm:$0xff]  ;;  %v4360_v57 = vpack.c.bf16 %v2071_v38, %v2061_v55 }
 0x230   : > { %4399 = vmatprep.subr.bf16.mxu1 %v4398_v58  ;;  %2410 = vmatmul.mubr.f32.gmra.mrb[4].mxu1 %v5494_v4  ;;  %v4406_v56 = vpack.c.bf16 %v2074_v62, %v2064_v20  ;;  %v2094_v58 = vld [vmem:[#allocation2 + $0x448] sm:$0xff]  ;;  %v4356_v32 = vpack.c.bf16 %v2051_v21, %v2041_v53  ;;  %v4358_v37 = vpack.c.bf16 %v2072_v23, %v2062_v2  ;;  %v2083_v62 = vld [vmem:[#allocation2 + $0x3f0] sm:$0xff]  ;;  %v2112_v21 = vld [vmem:[#allocation2 + $0x4d8] sm:$0xff] }
 0x231   : > { %2321 = vmatmul.mubr.f32.gmra.mrb[4].mxu0 %v5494_v4  ;;  %4227 = vmatprep.mubr.msk.f32.mxu1 %vm2231_vm15, %v5505_v49  ;;  %v4412_v8 = vpack.c.bf16 %v2093_v14, %v2083_v62  ;;  %v2081_v23 = vld [vmem:[#allocation2 + $0x3e0] sm:$0xff]  ;;  %v2102_v53 = vld [vmem:[#allocation2 + $0x488] sm:$0xff] }
 0x232   : > { %v1557_v42 = vpop.permute.xlu1 %1556  ;;  %v5511_v51 = vpop.permute.xlu0 %1487  ;;  %4349 = vmatpush1.bf16.msra.mxu0 %v4348_v5  ;;  %4223 = vmatprep.mubr.msk.f32.mxu0 %vm2231_vm15, %v5505_v49  ;;  %v4408_v5 = vpack.c.bf16 %v2073_v24, %v2063_v36  ;;  %v2111_v36 = vld [vmem:[#allocation2 + $0x4d0] sm:$0xff] }
 0x233   : > { %v5522_v47 = vsel %vm1568_vm8, %v5372_v1, %v1557_v42  ;;  %v5526_v60 = vsel %vm1493_vm7, %v1486_v28, %v5511_v51  ;;  %4351 = vmatprep.subr.bf16.mxu0 %v4350_v10  ;;  %4401 = vmatpush1.bf16.msra.mxu1 %v4400_v27  ;;  %v4410_v27 = vpack.c.bf16 %v2094_v58, %v2084_v6  ;;  %v2103_v58 = vld [vmem:[#allocation2 + $0x490] sm:$0xff] }
 0x234   : > { %4403 = vmatprep.subr.bf16.mxu1 %v4402_v52  ;;  %2416 = vmatmul.mubr.f32.gmra.mrb[6].mxu1 %v5518_v43  ;;  %v4376_v46 = vpack.c.bf16 %v5522_v47, %v5474_v17 }
 0x235   : > { %2327 = vmatmul.mubr.f32.gmra.mrb[6].mxu0 %v5518_v43  ;;  %4232 = vmatprep.mubr.msk.f32.mxu1 %vm2231_vm15, %v5225_v40 }
 0x236   : > { %v1561_v1 = vpop.permute.xlu1 %1560  ;;  %v1559_v22 = vpop.permute.xlu0 %1558  ;;  %4353 = vmatpush1.bf16.msra.mxu0 %v4352_v7  ;;  %4228 = vmatprep.mubr.msk.f32.mxu0 %vm2231_vm15, %v5225_v40  ;;  %v4362_v7 = vpack.c.bf16 %v2092_v11, %v2082_v15  ;;  %v4420_v11 = vpack.c.bf16 %v5457_v31, %v5299_v30 }
 0x237   : > { %v5535_v54 = vsel %vm1568_vm8, %v1557_v42, %v1559_v22  ;;  %v5538_v28 = vsel %vm1568_vm8, %v1559_v22, %v1561_v1  ;;  %4355 = vmatprep.subr.bf16.mxu0 %v4354_v18  ;;  %4405 = vmatpush1.bf16.msra.mxu1 %v4404_v13  ;;  %v2091_v18 = vld [vmem:[#allocation2 + $0x430] sm:$0xff]  ;;  %v2113_v22 = vld [vmem:[#allocation2 + $0x4e0] sm:$0xff] }
 0x238   : > { %4407 = vmatprep.subr.bf16.mxu1 %v4406_v56  ;;  %v4364_v24 = vpack.c.bf16 %v2091_v18, %v2081_v23  ;;  %v4416_v2 = vpack.c.bf16 %v2113_v22, %v2103_v58  ;;  %v4424_v30 = vpack.c.bf16 %v5538_v28, %v5500_v35 }
 0x23a   : > { %v1630_v10 = vpop.permute.xlu1 %1629  ;;  %v5540_v40 = vpop.permute.xlu0 %1562  ;;  %4357 = vmatpush1.bf16.msra.mxu0 %v4356_v32  ;;  %v4366_v32 = vpack.c.bf16 %v2112_v21, %v2102_v53  ;;  %v1975_v53 = vld [vmem:[#allocation2 + $0x90] sm:$0xff] }
 0x23b   : > { %v5544_v42 = vsel %vm1639_vm9, %v5391_v25, %v1630_v10  ;;  %v1576_v52 = vsel %vm1568_vm8, %v1561_v1, %v5540_v40  ;;  %4359 = vmatprep.subr.bf16.mxu0 %v4358_v37  ;;  %4409 = vmatpush1.bf16.msra.mxu1 %v4408_v5  ;;  %v4414_v25 = vpack.c.bf16 %v5258_v9, %v2104_v12 }
 0x23c   : > { %4411 = vmatprep.subr.bf16.mxu1 %v4410_v27  ;;  %v4418_v9 = vpack.c.bf16 %v5478_v41, %v5311_v33  ;;  %v4374_v41 = vpack.c.bf16 %v5535_v54, %v5497_v0 }
 0x23e   : > { %v1634_v13 = vpop.permute.xlu1 %1633  ;;  %v1632_v20 = vpop.permute.xlu0 %1631  ;;  %4361 = vmatpush1.bf16.msra.mxu0 %v4360_v57  ;;  %v4422_v57 = vpack.c.bf16 %v1576_v52, %v5526_v60 }
 0x23f   : > { %v1645_v1 = vsel %vm1639_vm9, %v1630_v10, %v1632_v20  ;;  %v1646_v56 = vsel %vm1639_vm9, %v1632_v20, %v1634_v13  ;;  %4363 = vmatprep.subr.bf16.mxu0 %v4362_v7  ;;  %4413 = vmatpush1.bf16.msra.mxu1 %v4412_v8  ;;  %v2101_v10 = vld [vmem:[#allocation2 + $0x480] sm:$0xff] }
 0x240   : > { %4415 = vmatprep.subr.bf16.mxu1 %v4414_v25  ;;  %v4368_v27 = vpack.c.bf16 %v2111_v36, %v2101_v10  ;;  %v4551_v36 = vld [vmem:[#allocation2 + $0x40] sm:$0xff] }
 0x242   : > { %v1700_v37 = vpop.permute.xlu1 %1699  ;;  %v5551_v5 = vpop.permute.xlu0 %1635  ;;  %4365 = vmatpush1.bf16.msra.mxu0 %v4364_v24 }
 0x243   : > { %v1714_v6 = vsel %vm1709_vm11, %v5401_v34, %v1700_v37  ;;  %v1647_v38 = vsel %vm1639_vm9, %v1634_v13, %v5551_v5  ;;  %4367 = vmatprep.subr.bf16.mxu0 %v4366_v32  ;;  %4417 = vmatpush1.bf16.msra.mxu1 %v4416_v2  ;;  %v1996_v2 = vld [vmem:[#allocation2 + $0x138] sm:$0xff] }
 0x244   : > { %4419 = vmatprep.subr.bf16.mxu1 %v4418_v9  ;;  %v1986_v9 = vld [vmem:[#allocation2 + $0xe8] sm:$0xff] }
 0x245   : > { %v4438_v10 = vpack.c.bf16 %v1996_v2, %v1986_v9  ;;  %v2095_v9 = vld [vmem:[#allocation2 + $0x450] sm:$0xff] }
 0x246   : > { %v1704_v14 = vpop.permute.xlu1 %1703  ;;  %v1702_v55 = vpop.permute.xlu0 %1701  ;;  %4369 = vmatpush1.bf16.msra.mxu0 %v4368_v27  ;;  %v1995_v27 = vld [vmem:[#allocation2 + $0x130] sm:$0xff] }
 0x247   : > { %v1715_v33 = vsel %vm1709_vm11, %v1700_v37, %v1702_v55  ;;  %v1716_v34 = vsel %vm1709_vm11, %v1702_v55, %v1704_v14  ;;  %4371 = vmatprep.subr.bf16.mxu0 %v4370_v48  ;;  %4421 = vmatpush1.bf16.msra.mxu1 %v4420_v11  ;;  %v4436_v37 = vpack.c.bf16 %v1975_v53, %v4551_v36  ;;  %v2016_v55 = vld [vmem:[#allocation2 + $0x1d8] sm:$0xff] }
 0x248   : > { %4423 = vmatprep.subr.bf16.mxu1 %v4422_v57  ;;  %v4378_v0 = vpack.c.bf16 %v1715_v33, %v1645_v1  ;;  %v4428_v35 = vpack.c.bf16 %v1716_v34, %v1646_v56  ;;  %v1966_v1 = vld [vmem:[#allocation2 + $0x48] sm:$0xff]  ;;  %v1976_v56 = vld [vmem:[#allocation2 + $0x98] sm:$0xff]  ;;  %v1985_v57 = vld [vmem:[#allocation2 + $0xe0] sm:$0xff] }
 0x249   : > { %v4440_v33 = vpack.c.bf16 %v1995_v27, %v1985_v57  ;;  %v2006_v34 = vld [vmem:[#allocation2 + $0x188] sm:$0xff]  ;;  %v2085_v27 = vld [vmem:[#allocation2 + $0x400] sm:$0xff] }
 0x24a   : > { %v1770_v31 = vpop.permute.xlu1 %1769  ;;  %v5571_v15 = vpop.permute.xlu0 %1705  ;;  %4373 = vmatpush1.bf16.msra.mxu0 %v4372_v50  ;;  %v4380_v50 = vpack.c.bf16 %v1714_v6, %v5544_v42 }
 0x24b   : > { %v1784_v60 = vsel %vm1779_vm12, %v5414_v44, %v1770_v31  ;;  %v1717_v29 = vsel %vm1709_vm11, %v1704_v14, %v5571_v15  ;;  %4375 = vmatprep.subr.bf16.mxu0 %v4374_v41  ;;  %4425 = vmatpush1.bf16.msra.mxu1 %v4424_v30 }
 0x24c   : > { %v4426_v48 = vpack.c.bf16 %v1717_v29, %v1647_v38 }
 0x24e   : > { %v1774_v54 = vpop.permute.xlu1 %1773  ;;  %v1772_v28 = vpop.permute.xlu0 %1771  ;;  %4377 = vmatpush1.bf16.msra.mxu0 %v4376_v46  ;;  %4427 = vmatprep.subr.bf16.mxu1 %v4426_v48  ;;  %v2036_v46 = vld [vmem:[#allocation2 + $0x278] sm:$0xff]  ;;  %v2005_v48 = vld [vmem:[#allocation2 + $0x180] sm:$0xff] }
 0x24f   : > { %v1785_v26 = vsel %vm1779_vm12, %v1770_v31, %v1772_v28  ;;  %v1786_v45 = vsel %vm1779_vm12, %v1772_v28, %v1774_v54  ;;  %4379 = vmatprep.subr.bf16.mxu0 %v4378_v0  ;;  %4429 = vmatpush1.bf16.msra.mxu1 %v4428_v35  ;;  %v2015_v31 = vld [vmem:[#allocation2 + $0x1d0] sm:$0xff]  ;;  %v2026_v35 = vld [vmem:[#allocation2 + $0x228] sm:$0xff] }
 0x250   : > { %v4444_v0 = vpack.c.bf16 %v2015_v31, %v2005_v48  ;;  %v4446_v28 = vpack.c.bf16 %v2036_v46, %v2026_v35  ;;  %v2125_v46 = vld [vmem:[#allocation2 + $0x540] sm:$0xff] }
 0x252   : > { %v1840_v44 = vpop.permute.xlu1 %1839  ;;  %v5585_v52 = vpop.permute.xlu0 %1775  ;;  %4381 = vmatpush1.bf16.msra.mxu0 %v4380_v50 }
 0x253   : > { %v1854_v17 = vsel %vm1849_vm13, %v5420_v61, %v1840_v44  ;;  %v1787_v47 = vsel %vm1779_vm12, %v1774_v54, %v5585_v52 }
 0x254   : > { %v4384_v13 = vpack.c.bf16 %v1854_v17, %v1784_v60  ;;  %v2025_v17 = vld [vmem:[#allocation2 + $0x220] sm:$0xff] }
 0x256   : > { %v1844_v62 = vpop.permute.xlu1 %1843  ;;  %v1842_v7 = vpop.permute.xlu0 %1841 }
 0x257   : > { %v1855_v8 = vsel %vm1849_vm13, %v1840_v44, %v1842_v7  ;;  %v1856_v12 = vsel %vm1849_vm13, %v1842_v7, %v1844_v62  ;;  %v2056_v44 = vld [vmem:[#allocation2 + $0x318] sm:$0xff] }
 0x258   : > { %v4382_v18 = vpack.c.bf16 %v1855_v8, %v1785_v26  ;;  %v4432_v22 = vpack.c.bf16 %v1856_v12, %v1786_v45  ;;  %v2035_v26 = vld [vmem:[#allocation2 + $0x270] sm:$0xff] }
 0x259   : > { %v2055_v12 = vld [vmem:[#allocation2 + $0x310] sm:$0xff] }
 0x25a   : > { %v1910_v20 = vpop.permute.xlu1 %1909  ;;  %v5593_v42 = vpop.permute.xlu0 %1845  ;;  %4383 = vmatprep.subr.bf16.mxu0 %v4382_v18 }
 0x25b   : > { %v1924_v25 = vsel %vm1919_vm14, %v5437_v59, %v1910_v20  ;;  %v1857_v61 = vsel %vm1849_vm13, %v1844_v62, %v5593_v42  ;;  %4385 = vmatpush1.bf16.msra.mxu0 %v4384_v13  ;;  %v4434_v59 = vpack.c.bf16 %v1976_v56, %v1966_v1  ;;  %v2046_v62 = vld [vmem:[#allocation2 + $0x2c8] sm:$0xff]  ;;  %v2075_v56 = vld [vmem:[#allocation2 + $0x3b0] sm:$0xff] }
 0x25c   : > { %v4430_v21 = vpack.c.bf16 %v1857_v61, %v1787_v47  ;;  %v4448_v47 = vpack.c.bf16 %v2035_v26, %v2025_v17  ;;  %v4450_v8 = vpack.c.bf16 %v2056_v44, %v2046_v62 }
 0x25e   : > { %v1914_v23 = vpop.permute.xlu1 %1913  ;;  %v1912_v24 = vpop.permute.xlu0 %1911  ;;  %4431 = vmatprep.subr.bf16.mxu1 %v4430_v21  ;;  %v2066_v21 = vld [vmem:[#allocation2 + $0x368] sm:$0xff] }
 0x25f   : > { %v1925_v58 = vsel %vm1919_vm14, %v1910_v20, %v1912_v24  ;;  %v1926_v32 = vsel %vm1919_vm14, %v1912_v24, %v1914_v23  ;;  %4433 = vmatpush1.bf16.msra.mxu1 %v4432_v22  ;;  %v2076_v20 = vld [vmem:[#allocation2 + $0x3b8] sm:$0xff] }
 0x260   : > { %2470 = vmatprep.subr.mxu0 %v1925_v58  ;;  %v4454_v1 = vpack.c.bf16 %v2076_v20, %v2066_v21  ;;  %v2096_v58 = vld [vmem:[#allocation2 + $0x458] sm:$0xff] }
 0x261   : > { %2471 = vmatpush1.msra.mxu0 %v1924_v25  ;;  %v2045_v25 = vld [vmem:[#allocation2 + $0x2c0] sm:$0xff] }
 0x262   : > { %v1415_v6 = vpop.permute.xlu1 %1414  ;;  %v5601_v38 = vpop.permute.xlu0 %1915  ;;  %2487 = vmatmul.mubr.f32.vlgmr.msra.gmra.mrb[8].mxu0 %v5445_v3  ;;  %4435 = vmatprep.subr.bf16.mxu0 %v4434_v59  ;;  %v4452_v61 = vpack.c.bf16 %v2055_v12, %v2045_v25 }
 0x263   : > { %v5606_v11 = vsel %vm1418_vm6, %v5463_v63, %v1415_v6  ;;  %v1927_v14 = vsel %vm1919_vm14, %v1914_v23, %v5601_v38  ;;  %4437 = vmatpush1.bf16.msra.mxu0 %v4436_v37  ;;  %4229 = vmatprep.mubr.msk.f32.mxu0 %vm2231_vm15, %v5453_v39  ;;  %v4442_v63 = vpack.c.bf16 %v2016_v55, %v2006_v34  ;;  %v4552_v23 = vld [vmem:[%s7035_s1 + $0x8] sm:$0xff]  ;;  %v2105_v34 = vld [vmem:[#allocation2 + $0x4a0] sm:$0xff] }
 0x264   : > { %2559 = vmatprep.subr.mxu1 %v1927_v14  ;;  %4439 = vmatprep.subr.bf16.mxu0 %v4438_v10  ;;  %v4460_v14 = vpack.c.bf16 %v2095_v9, %v2085_v27  ;;  %v2106_v55 = vld [vmem:[#allocation2 + $0x4a8] sm:$0xff]  ;;  %v4468_v48 = vpack.c.bf16 %v5606_v11, %v2125_v46 }
 0x265   : > { %2560 = vmatpush1.msra.mxu1 %v1926_v32  ;;  %v2065_v32 = vld [vmem:[#allocation2 + $0x360] sm:$0xff] }
 0x266   : > { %v1490_v41 = vpop.permute.xlu1 %1489  ;;  %v1417_v30 = vpop.permute.xlu0 %1416  ;;  %2576 = vmatmul.mubr.f32.vlgmr.msra.gmra.mrb[8].mxu1 %v5445_v3  ;;  %4482 = vmatprep.subr.bf16.mxu1 %v4434_v59  ;;  %v4456_v2 = vpack.c.bf16 %v2075_v56, %v2065_v32  ;;  %v2086_v59 = vld [vmem:[#allocation2 + $0x408] sm:$0xff] }
 0x267   : > { %v5615_v60 = vsel %vm1493_vm7, %v5511_v51, %v1490_v41  ;;  %v1428_v29 = vsel %vm1418_vm6, %v1415_v6, %v1417_v30  ;;  %4495 = vmatpush1.bf16.msra.mxu1 %v4436_v37  ;;  %4441 = vmatpush1.bf16.msra.mxu0 %v4440_v33  ;;  %v4458_v37 = vpack.c.bf16 %v2096_v58, %v2086_v59 }
 0x268   : > { %1448 = vst.msk [vmem:[#allocation2 + $0x598] sm:$0xff] %vm217_vm0, %v1428_v29  ;;  %4483 = vmatprep.subr.bf16.mxu1 %v4438_v10  ;;  %4443 = vmatprep.subr.bf16.mxu0 %v4442_v63  ;;  %v2116_v10 = vld [vmem:[#allocation2 + $0x4f8] sm:$0xff] }
 0x269   : > { %4233 = vmatprep.mubr.msk.f32.mxu1 %vm2231_vm15, %v5453_v39  ;;  %2493 = vmatmul.mubr.f32.gmra.mrb[10].mxu0 %v5470_v16  ;;  %v4462_v57 = vpack.c.bf16 %v2116_v10, %v2106_v55 }
 0x26a   : > { %v1565_v54 = vpop.permute.xlu1 %1564  ;;  %v1492_v51 = vpop.permute.xlu0 %1491  ;;  %2582 = vmatmul.mubr.f32.gmra.mrb[10].mxu1 %v5470_v16  ;;  %4230 = vmatprep.mubr.msk.f32.mxu0 %vm2231_vm15, %v5483_v19 }
 0x26b   : > { %v5627_v45 = vsel %vm1568_vm8, %v5540_v40, %v1565_v54  ;;  %v1503_v50 = vsel %vm1493_vm7, %v1490_v41, %v1492_v51  ;;  %4496 = vmatpush1.bf16.msra.mxu1 %v4440_v33  ;;  %4445 = vmatpush1.bf16.msra.mxu0 %v4444_v0  ;;  %v2115_v33 = vld [vmem:[#allocation2 + $0x4f0] sm:$0xff] }
 0x26c   : > { %1523 = vst.msk [vmem:[#allocation2 + $0x5e8] sm:$0xff] %vm217_vm0, %v1503_v50  ;;  %4484 = vmatprep.subr.bf16.mxu1 %v4442_v63  ;;  %4447 = vmatprep.subr.bf16.mxu0 %v4446_v28  ;;  %v4464_v41 = vpack.c.bf16 %v2115_v33, %v2105_v34 }
 0x26d   : > { %4234 = vmatprep.mubr.msk.f32.mxu1 %vm2231_vm15, %v5483_v19  ;;  %2499 = vmatmul.mubr.f32.gmra.mrb[12].mxu0 %v5494_v4 }
 0x26e   : > { %v1638_v7 = vpop.permute.xlu1 %1637  ;;  %v1567_v40 = vpop.permute.xlu0 %1566  ;;  %2588 = vmatmul.mubr.f32.gmra.mrb[12].mxu1 %v5494_v4  ;;  %4231 = vmatprep.mubr.msk.f32.mxu0 %vm2231_vm15, %v5505_v49 }
 0x26f   : > { %v5639_v18 = vsel %vm1639_vm9, %v5551_v5, %v1638_v7  ;;  %1668 = vst.msk [vmem:[#allocation2 + $0x688] sm:$0xff] %vm217_vm0, %v1638_v7  ;;  %v1578_v13 = vsel %vm1568_vm8, %v1565_v54, %v1567_v40  ;;  %4497 = vmatpush1.bf16.msra.mxu1 %v4444_v0  ;;  %4449 = vmatpush1.bf16.msra.mxu0 %v4448_v47 }
 0x270   : > { %1598 = vst.msk [vmem:[#allocation2 + $0x638] sm:$0xff] %vm217_vm0, %v1578_v13  ;;  %4485 = vmatprep.subr.bf16.mxu1 %v4446_v28  ;;  %4451 = vmatprep.subr.bf16.mxu0 %v4450_v8  ;;  %v4472_v28 = vpack.c.bf16 %v5627_v45, %v5615_v60  ;;  %v2693_v60 = vlaneseq }
 0x271   : > { %4235 = vmatprep.mubr.msk.f32.mxu1 %vm2231_vm15, %v5505_v49  ;;  %2505 = vmatmul.mubr.f32.gmra.mrb[14].mxu0 %v5518_v43 }
 0x272   : > { %v1778_v5 = vpop.permute.xlu1 %1777  ;;  %v1708_v22 = vpop.permute.xlu0 %1707  ;;  %2594 = vmatmul.mubr.f32.gmra.mrb[14].mxu1 %v5518_v43  ;;  %4236 = vmatprep.mubr.msk.f32.mxu0 %vm2231_vm15, %v4552_v23  ;;  %v5696_v45 = vshrl.u32 %v2693_v60, 7 }
 0x273   : > { %v5654_v24 = vsel %vm1779_vm12, %v5585_v52, %v1778_v5  ;;  %1808 = vst.msk [vmem:[#allocation2 + $0x728] sm:$0xff] %vm217_vm0, %v1778_v5  ;;  %v5659_v53 = vsel %vm1709_vm11, %v5571_v15, %v1708_v22  ;;  %1738 = vst.msk [vmem:[#allocation2 + $0x6d8] sm:$0xff] %vm217_vm0, %v1708_v22  ;;  %4498 = vmatpush1.bf16.msra.mxu1 %v4448_v47  ;;  %4453 = vmatpush1.bf16.msra.mxu0 %v4452_v61  ;;  %v4586_v15 = vmov -inf   ;;  %v2146_v31 = vld [vmem:[#allocation2 + $0x5e8] sm:$0xff] }
 0x274   : > { %4486 = vmatprep.subr.bf16.mxu1 %v4450_v8  ;;  %4455 = vmatprep.subr.bf16.mxu0 %v4454_v1  ;;  %2784 = vst.msk [vmem:[#allocation3] sm:$0xff] %vm2783_vm3, %v4586_v15  ;;  %2785 = vst.msk [vmem:[#allocation3 + $0x58] sm:$0xff] %vm2783_vm3, %v4586_v15  ;;  %v4476_v11 = vpack.c.bf16 %v5659_v53, %v5639_v18  ;;  %v2719_v62 = vsub.s32 6, %v5696_v45  ;;  %v2695_v7 = vsub.s32 0, %v5696_v45  ;;  %v2699_v40 = vsub.s32 1, %v5696_v45 }
 0x275   : > { %4238 = vmatprep.mubr.msk.f32.mxu1 %vm2231_vm15, %v5483_v19  ;;  %2786 = vst.msk [vmem:[#allocation3 + $0xb0] sm:$0xff] %vm2783_vm3, %v4586_v15  ;;  %2787 = vst.msk [vmem:[#allocation3 + $0x108] sm:$0xff] %vm2783_vm3, %v4586_v15 }
 0x276   : > { %v1918_v52 = vpop.permute.xlu1 %1917  ;;  %v1848_v36 = vpop.permute.xlu0 %1847  ;;  %v2166_v0 = vld [vmem:[#allocation2 + $0x688] sm:$0xff] }
 0x277   : > { %v5670_v6 = vsel %vm1919_vm14, %v5601_v38, %v1918_v52  ;;  %1948 = vst.msk [vmem:[#allocation2 + $0x7c8] sm:$0xff] %vm217_vm0, %v1918_v52  ;;  %v1858_v19 = vsel %vm1849_vm13, %v5593_v42, %v1848_v36  ;;  %1878 = vst.msk [vmem:[#allocation2 + $0x778] sm:$0xff] %vm217_vm0, %v1848_v36  ;;  %4499 = vmatpush1.bf16.msra.mxu1 %v4452_v61  ;;  %4457 = vmatpush1.bf16.msra.mxu0 %v4456_v2  ;;  %v2136_v38 = vld [vmem:[#allocation2 + $0x598] sm:$0xff]  ;;  %v2126_v42 = vld [vmem:[#allocation2 + $0x548] sm:$0xff] }
 0x278   : > { %4487 = vmatprep.subr.bf16.mxu1 %v4454_v1  ;;  %4459 = vmatprep.subr.bf16.mxu0 %v4458_v37  ;;  %v4466_v63 = vpack.c.bf16 %v2136_v38, %v2126_v42  ;;  %v2156_v29 = vld [vmem:[#allocation2 + $0x638] sm:$0xff]  ;;  %v4480_v17 = vpack.c.bf16 %v1858_v19, %v5654_v24 }
 0x279   : > { %v4470_v54 = vpack.c.bf16 %v2156_v29, %v2146_v31 }
 0x27a   : > { %v2176_v35 = vld [vmem:[#allocation2 + $0x6d8] sm:$0xff]  ;;  %v2186_v26 = vld [vmem:[#allocation2 + $0x728] sm:$0xff] }
 0x27b   : > { %4500 = vmatpush1.bf16.msra.mxu1 %v4456_v2  ;;  %4461 = vmatpush1.bf16.msra.mxu0 %v4460_v14  ;;  %v5676_v30 = vld [vmem:[#allocation3] sm:$0xff]  ;;  %v4474_v51 = vpack.c.bf16 %v2176_v35, %v2166_v0 }
 0x27c   : > { %4488 = vmatprep.subr.bf16.mxu1 %v4458_v37  ;;  %4463 = vmatprep.subr.bf16.mxu0 %v4462_v57 }
 0x27d   : > { %2921 = vrot.lane.b32.xlu1 %v5676_v30, %s4565_s25 }
 0x27e   : > { %v2196_v50 = vld [vmem:[#allocation2 + $0x778] sm:$0xff]  ;;  %v2206_v47 = vld [vmem:[#allocation2 + $0x7c8] sm:$0xff] }
 0x27f   : > { %4501 = vmatpush1.bf16.msra.mxu1 %v4460_v14  ;;  %4465 = vmatpush1.bf16.msra.mxu0 %v4464_v41  ;;  %v4478_v44 = vpack.c.bf16 %v2196_v50, %v2186_v26 }
 0x280   : > { %4489 = vmatprep.subr.bf16.mxu1 %v4462_v57  ;;  %4467 = vmatprep.subr.bf16.mxu0 %v4466_v63 }
 0x283   : > { %4502 = vmatpush1.bf16.msra.mxu1 %v4464_v41  ;;  %4469 = vmatpush1.bf16.msra.mxu0 %v4468_v48 }
 0x284   : > { %4490 = vmatprep.subr.bf16.mxu1 %v4466_v63  ;;  %4471 = vmatprep.subr.bf16.mxu0 %v4470_v54 }
 0x287   : > { %4503 = vmatpush1.bf16.msra.mxu1 %v4468_v48  ;;  %4473 = vmatpush1.bf16.msra.mxu0 %v4472_v28  ;;  %v5720_v12 = vpop.permute.xlu0 %2213  ;;  %v5733_v56 = vpop.permute.xlu1 %2218 }
 0x288   : > { %4491 = vmatprep.subr.bf16.mxu1 %v4470_v54  ;;  %4475 = vmatprep.subr.bf16.mxu0 %v4474_v51 }
 0x28b   : > { %4504 = vmatpush1.bf16.msra.mxu1 %v4472_v28  ;;  %4477 = vmatpush1.bf16.msra.mxu0 %v4476_v11  ;;  %v5751_v10 = vpop.permute.xlu1 %2223  ;;  %v5769_v46 = vpop.permute.xlu0 %2228 }
 0x28c   : > { %4492 = vmatprep.subr.bf16.mxu1 %v4474_v51  ;;  %4479 = vmatprep.subr.bf16.mxu0 %v4478_v44 }
 0x28f   : > { %4505 = vmatpush1.bf16.msra.mxu1 %v4476_v11  ;;  %4481 = vmatpush1.bf16.msra.mxu0 %v4480_v17 }
 0x290   : > { %4493 = vmatprep.subr.bf16.mxu1 %v4478_v44  ;;  %2648 = vmatprep.subr.mxu0 %v2206_v47 }
 0x293   : > { %4506 = vmatpush1.bf16.msra.mxu1 %v4480_v17  ;;  %2649 = vmatpush1.msra.mxu0 %v5670_v6 }
 0x294   : > { %4494 = vmatprep.subr.mxu1 %v2206_v47  ;;  %2665 = vmatmul.mubr.f32.vlgmr.msra.gmra.mrb[16].mxu0 %v5445_v3  ;;  %v5702_v3 = vld [vmem:[%s7037_s3] sm:$0xff] }
 0x295   : > { %4237 = vmatprep.mubr.msk.f32.mxu0 %vm2231_vm15, %v5453_v39  ;;  %v2723_v39 = vsub.s32 7, %v5696_v45  ;;  %v2696_v61 = vrot.slane %v5702_v3, %v2695_v7  ;;  %v2700_v22 = vrot.slane %v5702_v3, %v2699_v40 }
 0x297   : > { %4507 = vmatpush1.msra.mxu1 %v5670_v6 }
 0x298   : > { %2671 = vmatmul.mubr.f32.gmra.mrb[18].mxu0 %v5470_v16  ;;  %2677 = vmatmul.mubr.f32.vlgmr.msra.gmra.mrb[16].mxu1 %v5494_v4  ;;  %v5706_v16 = vrot.slane %v5702_v3, %v2719_v62  ;;  %v5709_v4 = vrot.slane %v5702_v3, %v2723_v39 }
 0x299   : > { %4239 = vmatprep.mubr.msk.f32.mxu1 %vm2231_vm15, %v5505_v49  ;;  %vm2788_vm15 = vcmask 876072   ;;  %v2703_v49 = vsub.s32 2, %v5696_v45 }
 0x29a   : > { %2789 = vst.msk [vmem:[#allocation3 + $0x50] sm:$0xff] %vm2788_vm15, %v4586_v15  ;;  %2790 = vst.msk [vmem:[#allocation3 + $0xa8] sm:$0xff] %vm2788_vm15, %v4586_v15 }
 0x29b   : > { %2791 = vst.msk [vmem:[#allocation3 + $0x100] sm:$0xff] %vm2788_vm15, %v4586_v15  ;;  %2792 = vst.msk [vmem:[#allocation3 + $0x158] sm:$0xff] %vm2788_vm15, %v4586_v15  ;;  %v2704_v8 = vrot.slane %v5702_v3, %v2703_v49 }
 0x29c   : > { %2683 = vmatmul.mubr.f32.gmra.mrb[18].mxu1 %v5518_v43  ;;  %v2707_v43 = vsub.s32 3, %v5696_v45 }
 0x29e   : > { %v2708_v13 = vrot.slane %v5702_v3, %v2707_v43  ;;  %v2711_v43 = vsub.s32 4, %v5696_v45 }
 0x2f9   : > { %v2399_v18 = vpop.f32.mrb[0].mxu1 }
 0x2fa   : > { %v2400_v20 = vadd.f32 %v2399_v18, %v5720_v12  ;;  %v2401_v25 = vpop.f32.mrb[1].mxu1  ;;  %v2715_v18 = vsub.s32 5, %v5696_v45 }
 0x2fb   : > { %v2402_v21 = vadd.f32 %v2401_v25, %v5720_v12 }
 0x2fc   : > { %v2310_v5 = vpop.f32.mrb[0].mxu0  ;;  %v5731_v1 = vadd.f32 %v2704_v8, %v2400_v20  ;;  %v2712_v20 = vrot.slane %v5702_v3, %v2711_v43 }
 0x2fd   : > { %v2311_v23 = vadd.f32 %v2310_v5, %v5720_v12  ;;  %v2312_v24 = vpop.f32.mrb[1].mxu0  ;;  %v5736_v53 = vadd.f32 %v2708_v13, %v2402_v21  ;;  %v2716_v21 = vrot.slane %v5702_v3, %v2715_v18 }
 0x2fe   : > { %v2313_v58 = vadd.f32 %v2312_v24, %v5720_v12 }
 0x2ff   : > { %v5739_v32 = vadd.f32 %v2696_v61, %v2311_v23  ;;  %v2405_v2 = vpop.f32.mrb[2].mxu1 }
 0x300   : > { %v5741_v59 = vadd.f32 %v2700_v22, %v2313_v58  ;;  %v2316_v52 = vpop.f32.mrb[2].mxu0  ;;  %v2406_v36 = vadd.f32 %v2405_v2, %v5733_v56  ;;  %v2407_v37 = vpop.f32.mrb[3].mxu1 }
 0x301   : > { %2923 = vrot.lane.b32.xlu0 %v5739_v32, %s4565_s25  ;;  %v2317_v9 = vadd.f32 %v2316_v52, %v5733_v56  ;;  %v2318_v15 = vpop.f32.mrb[3].mxu0  ;;  %v2408_v6 = vadd.f32 %v2407_v37, %v5733_v56 }
 0x302   : > { %2925 = vrot.lane.b32.xlu1 %v5741_v59, %s4565_s25  ;;  %v2319_v19 = vadd.f32 %v2318_v15, %v5733_v56  ;;  %v5753_v27 = vadd.f32 %v2704_v8, %v2406_v36 }
 0x303   : > { %v5755_v14 = vadd.f32 %v2708_v13, %v2408_v6  ;;  %v2411_v55 = vpop.f32.mrb[4].mxu1  ;;  %v5757_v57 = vadd.f32 %v2696_v61, %v2317_v9 }
 0x304   : > { %v5759_v33 = vadd.f32 %v2700_v22, %v2319_v19  ;;  %v2322_v38 = vpop.f32.mrb[4].mxu0  ;;  %v2412_v34 = vadd.f32 %v2411_v55, %v5751_v10  ;;  %v2413_v41 = vpop.f32.mrb[5].mxu1 }
 0x305   : > { %2927 = vrot.lane.b32.xlu0 %v5731_v1, %s4565_s25  ;;  %v2323_v42 = vadd.f32 %v2322_v38, %v5751_v10  ;;  %v2324_v63 = vpop.f32.mrb[5].mxu0  ;;  %v2414_v31 = vadd.f32 %v2413_v41, %v5751_v10 }
 0x306   : > { %2929 = vrot.lane.b32.xlu1 %v5736_v53, %s4565_s25  ;;  %v2325_v29 = vadd.f32 %v2324_v63, %v5751_v10  ;;  %v5771_v48 = vadd.f32 %v2704_v8, %v2412_v34 }
 0x307   : > { %v5773_v0 = vadd.f32 %v2708_v13, %v2414_v31  ;;  %v2417_v35 = vpop.f32.mrb[6].mxu1  ;;  %v5775_v54 = vadd.f32 %v2696_v61, %v2323_v42 }
 0x308   : > { %v5777_v51 = vadd.f32 %v2700_v22, %v2325_v29  ;;  %v2328_v28 = vpop.f32.mrb[6].mxu0  ;;  %v2418_v26 = vadd.f32 %v2417_v35, %v5769_v46  ;;  %v2419_v50 = vpop.f32.mrb[7].mxu1 }
 0x309   : > { %7101 = vst [vmem:[#allocation4_spill] sm:$0xff] %v5773_v0  ;;  %v2329_v44 = vadd.f32 %v2328_v28, %v5769_v46  ;;  %v2330_v11 = vpop.f32.mrb[7].mxu0  ;;  %v2420_v17 = vadd.f32 %v2419_v50, %v5769_v46 }
 0x30a   : > { %v2331_v47 = vadd.f32 %v2330_v11, %v5769_v46  ;;  %v5783_v60 = vadd.f32 %v2704_v8, %v2418_v26 }
 0x30b   : > { %v5785_v62 = vadd.f32 %v2708_v13, %v2420_v17  ;;  %v5787_v39 = vadd.f32 %v2696_v61, %v2329_v44 }
 0x30c   : > { %7102 = vst [vmem:[#allocation5_spill] sm:$0xff] %v5783_v60  ;;  %v5789_v49 = vadd.f32 %v2700_v22, %v2331_v47 }
 0x30d   : > { %7103 = vst [vmem:[#allocation6_spill] sm:$0xff] %v5785_v62  ;;  %7104 = vst [vmem:[#allocation7_spill] sm:$0xff] %v5787_v39 }
 0x30e   : > { %7105 = vst [vmem:[#allocation8_spill] sm:$0xff] %v5789_v49 }
 0x335   : > { %v2488_v25 = vpop.f32.mrb[8].mxu0 }
 0x336   : > { %v2489_v5 = vadd.f32 %v2488_v25, %v5720_v12  ;;  %v2490_v23 = vpop.f32.mrb[9].mxu0 }
 0x337   : > { %v2491_v8 = vadd.f32 %v2490_v23, %v5720_v12 }
 0x338   : > { %v5797_v13 = vadd.f32 %v2712_v20, %v2489_v5 }
 0x339   : > { %v5799_v61 = vadd.f32 %v2716_v21, %v2491_v8  ;;  %v2577_v22 = vpop.f32.mrb[8].mxu1 }
 0x33a   : > { %v2578_v24 = vadd.f32 %v2577_v22, %v5720_v12  ;;  %v2579_v58 = vpop.f32.mrb[9].mxu1  ;;  %2931 = vrot.lane.b32.xlu0 %v5797_v13, %s4565_s25 }
 0x33b   : > { %v2580_v2 = vadd.f32 %v2579_v58, %v5720_v12  ;;  %2933 = vrot.lane.b32.xlu1 %v5799_v61, %s4565_s25 }
 0x33c   : > { %v5808_v3 = vadd.f32 %v5706_v16, %v2578_v24  ;;  %v2494_v52 = vpop.f32.mrb[10].mxu0 }
 0x33d   : > { %v5811_v36 = vadd.f32 %v5709_v4, %v2580_v2  ;;  %v2495_v37 = vadd.f32 %v2494_v52, %v5733_v56  ;;  %v2583_v9 = vpop.f32.mrb[10].mxu1  ;;  %v2496_v15 = vpop.f32.mrb[11].mxu0 }
 0x33e   : > { %2935 = vrot.lane.b32.xlu0 %v5808_v3, %s4565_s25  ;;  %v2584_v6 = vadd.f32 %v2583_v9, %v5733_v56  ;;  %v2497_v19 = vadd.f32 %v2496_v15, %v5733_v56  ;;  %v2585_v55 = vpop.f32.mrb[11].mxu1 }
 0x33f   : > { %2937 = vrot.lane.b32.xlu1 %v5811_v36, %s4565_s25  ;;  %v5820_v38 = vadd.f32 %v2712_v20, %v2495_v37  ;;  %v2586_v34 = vadd.f32 %v2585_v55, %v5733_v56 }
 0x340   : > { %v5824_v41 = vadd.f32 %v5706_v16, %v2584_v6  ;;  %v5826_v42 = vadd.f32 %v2716_v21, %v2497_v19  ;;  %v2500_v63 = vpop.f32.mrb[12].mxu0  ;;  %v2690_v6 = vld [vmem:[%s7037_s3 + $0x8] sm:$0x3] }
 0x341   : > { %v5829_v31 = vadd.f32 %v5709_v4, %v2586_v34  ;;  %v2501_v29 = vadd.f32 %v2500_v63, %v5751_v10  ;;  %v2589_v35 = vpop.f32.mrb[12].mxu1  ;;  %v2502_v28 = vpop.f32.mrb[13].mxu0  ;;  %v2728_v19 = vrot.slane %v2690_v6, %v2695_v7 }
 0x342   : > { %v2590_v26 = vadd.f32 %v2589_v35, %v5751_v10  ;;  %v2503_v50 = vadd.f32 %v2502_v28, %v5751_v10  ;;  %v2591_v44 = vpop.f32.mrb[13].mxu1 }
 0x343   : > { %v5834_v11 = vadd.f32 %v2712_v20, %v2501_v29  ;;  %v2592_v17 = vadd.f32 %v2591_v44, %v5751_v10 }
 0x344   : > { %v5838_v47 = vadd.f32 %v5706_v16, %v2590_v26  ;;  %v5840_v43 = vadd.f32 %v2716_v21, %v2503_v50  ;;  %v2506_v18 = vpop.f32.mrb[14].mxu0 }
 0x345   : > { %7106 = vst [vmem:[#allocation9_spill] sm:$0xff] %v5834_v11  ;;  %v5843_v25 = vadd.f32 %v5709_v4, %v2592_v17  ;;  %v2507_v5 = vadd.f32 %v2506_v18, %v5769_v46  ;;  %v2595_v23 = vpop.f32.mrb[14].mxu1  ;;  %v2508_v8 = vpop.f32.mrb[15].mxu0 }
 0x346   : > { %7107 = vst [vmem:[#allocation10_spill] sm:$0xff] %v5838_v47  ;;  %7108 = vst [vmem:[#allocation11_spill] sm:$0xff] %v5840_v43  ;;  %v2596_v22 = vadd.f32 %v2595_v23, %v5769_v46  ;;  %v2509_v24 = vadd.f32 %v2508_v8, %v5769_v46  ;;  %v2597_v58 = vpop.f32.mrb[15].mxu1 }
 0x347   : > { %7109 = vst [vmem:[#allocation12_spill] sm:$0xff] %v5843_v25  ;;  %v5848_v2 = vadd.f32 %v2712_v20, %v2507_v5  ;;  %v2598_v52 = vadd.f32 %v2597_v58, %v5769_v46  ;;  %v2732_v20 = vrot.slane %v2690_v6, %v2699_v40  ;;  %v5938_v6 = vld [vmem:[#allocation3 + $0x108] sm:$0xff] }
 0x348   : > { %v5852_v37 = vadd.f32 %v5706_v16, %v2596_v22  ;;  %v5854_v9 = vadd.f32 %v2716_v21, %v2509_v24  ;;  %7116 = vst [vmem:[#allocation19_spill] sm:$0xff] %v5938_v6 }
 0x349   : > { %7110 = vst [vmem:[#allocation13_spill] sm:$0xff] %v5848_v2  ;;  %v5857_v15 = vadd.f32 %v5709_v4, %v2598_v52  ;;  %v5920_v52 = vld [vmem:[#allocation3 + $0xb0] sm:$0xff] }
 0x34a   : > { %7111 = vst [vmem:[#allocation14_spill] sm:$0xff] %v5852_v37  ;;  %7112 = vst [vmem:[#allocation15_spill] sm:$0xff] %v5854_v9 }
 0x34b   : > { %7113 = vst [vmem:[#allocation16_spill] sm:$0xff] %v5857_v15 }
 0x367   : > { %v2666_v55 = vpop.f32.mrb[16].mxu0 }
 0x368   : > { %v2667_v34 = vadd.f32 %v2666_v55, %v5720_v12  ;;  %v2668_v16 = vpop.f32.mrb[17].mxu0 }
 0x369   : > { %v2669_v21 = vadd.f32 %v2668_v16, %v5720_v12  ;;  %v5877_v12 = vld [vmem:[#allocation3 + $0x58] sm:$0xff] }
 0x36a   : > { %v5868_v63 = vadd.f32 %v2728_v19, %v2667_v34  ;;  %v5996_v34 = vpop.permute.xlu1 %2921 }
 0x36b   : > { %v2752_v4 = vadd.f32 %v2732_v20, %v2669_v21  ;;  %v2672_v29 = vpop.f32.mrb[18].mxu0  ;;  %v2678_v35 = vpop.f32.mrb[16].mxu1 }
 0x36c   : > { %v2673_v28 = vadd.f32 %v2672_v29, %v5733_v56  ;;  %v2679_v26 = vadd.f32 %v2678_v35, %v5751_v10  ;;  %v2674_v50 = vpop.f32.mrb[19].mxu0  ;;  %v2680_v7 = vpop.f32.mrb[17].mxu1  ;;  %2939 = vrot.lane.b32.xlu0 %v5868_v63, %s4565_s25 }
 0x36d   : > { %2802 = vst.msk [vmem:[#allocation3 + $0x50] sm:$0xff] %vm217_vm0, %v2752_v4  ;;  %v2675_v45 = vadd.f32 %v2674_v50, %v5733_v56  ;;  %v2681_v40 = vadd.f32 %v2680_v7, %v5751_v10 }
 0x36e   : > { %v5879_v44 = vadd.f32 %v2728_v19, %v2673_v28  ;;  %v5881_v17 = vadd.f32 %v2728_v19, %v2679_v26 }
 0x36f   : > { %v2762_v18 = vadd.f32 %v2732_v20, %v2675_v45  ;;  %v2772_v5 = vadd.f32 %v2732_v20, %v2681_v40  ;;  %v2684_v23 = vpop.f32.mrb[18].mxu1 }
 0x370   : > { %7114 = vst [vmem:[#allocation17_spill] sm:$0xff] %v5881_v17  ;;  %v2685_v8 = vadd.f32 %v2684_v23, %v5769_v46  ;;  %v2686_v22 = vpop.f32.mrb[19].mxu1  ;;  %2943 = vrot.lane.b32.xlu0 %v5877_v12, %s4565_s25 }
 0x371   : > { %2812 = vst.msk [vmem:[#allocation3 + $0xa8] sm:$0xff] %vm217_vm0, %v2762_v18  ;;  %2822 = vst.msk [vmem:[#allocation3 + $0x100] sm:$0xff] %vm217_vm0, %v2772_v5  ;;  %v2687_v56 = vadd.f32 %v2686_v22, %v5769_v46 }
 0x372   : > { %v5889_v10 = vadd.f32 %v2728_v19, %v2685_v8 }
 0x373   : > { %v2782_v24 = vadd.f32 %v2732_v20, %v2687_v56  ;;  %v5992_v20 = vpop.permute.xlu0 %2923 }
 0x374   : > { %7115 = vst [vmem:[#allocation18_spill] sm:$0xff] %v5889_v10  ;;  %v5891_v58 = vld [vmem:[#allocation3 + $0x50] sm:$0xff]  ;;  %2947 = vrot.lane.b32.xlu0 %v5759_v33, %s4565_s25  ;;  %v6006_v21 = vpop.permute.xlu1 %2925 }
 0x375   : > { %2832 = vst.msk [vmem:[#allocation3 + $0x158] sm:$0xff] %vm217_vm0, %v2782_v24  ;;  %2941 = vrot.lane.b32.xlu1 %v5891_v58, %s4565_s25 }
 0x377   : > { %v6000_v16 = vpop.permute.xlu0 %2927 }
 0x378   : > { %2951 = vrot.lane.b32.xlu0 %v5755_v14, %s4565_s25  ;;  %v5910_v46 = vld [vmem:[#allocation3 + $0xa8] sm:$0xff]  ;;  %v5944_v19 = vld [vmem:[#allocation3 + $0x100] sm:$0xff]  ;;  %v6016_v29 = vpop.permute.xlu1 %2929 }
 0x379   : > { %2945 = vrot.lane.b32.xlu1 %v5757_v57, %s4565_s25  ;;  %7117 = vst [vmem:[#allocation20_spill] sm:$0xff] %v5944_v19 }
 0x37c   : > { %2955 = vrot.lane.b32.xlu0 %v5826_v42, %s4565_s25  ;;  %v5962_v55 = vld [vmem:[#allocation3 + $0x158] sm:$0xff] }
 0x37d   : > { %2949 = vrot.lane.b32.xlu1 %v5753_v27, %s4565_s25  ;;  %7118 = vst [vmem:[#allocation21_spill] sm:$0xff] %v5962_v55 }
 0x380   : > { %2959 = vrot.lane.b32.xlu0 %v5829_v31, %s4565_s25 }
 0x381   : > { %2953 = vrot.lane.b32.xlu1 %v5820_v38, %s4565_s25 }
 0x384   : > { %2963 = vrot.lane.b32.xlu0 %v5910_v46, %s4565_s25 }
 0x385   : > { %2957 = vrot.lane.b32.xlu1 %v5824_v41, %s4565_s25 }
 0x388   : > { %2967 = vrot.lane.b32.xlu0 %v5775_v54, %s4565_s25 }
 0x389   : > { %2961 = vrot.lane.b32.xlu1 %v5879_v44, %s4565_s25 }
 0x38c   : > { %2971 = vrot.lane.b32.xlu0 %v5771_v48, %s4565_s25 }
 0x38d   : > { %2965 = vrot.lane.b32.xlu1 %v5920_v52, %s4565_s25 }
 0x390   : > { %2975 = vrot.lane.b32.xlu0 %v5834_v11, %s4565_s25 }
 0x391   : > { %2969 = vrot.lane.b32.xlu1 %v5777_v51, %s4565_s25 }
 0x394   : > { %2979 = vrot.lane.b32.xlu0 %v5838_v47, %s4565_s25 }
 0x395   : > { %2973 = vrot.lane.b32.xlu1 %v5773_v0, %s4565_s25 }
 0x398   : > { %2983 = vrot.lane.b32.xlu0 %v5881_v17, %s4565_s25 }
 0x399   : > { %2977 = vrot.lane.b32.xlu1 %v5840_v43, %s4565_s25 }
 0x39c   : > { %2987 = vrot.lane.b32.xlu0 %v5938_v6, %s4565_s25 }
 0x39d   : > { %2981 = vrot.lane.b32.xlu1 %v5843_v25, %s4565_s25 }
 0x3a0   : > { %2991 = vrot.lane.b32.xlu0 %v5789_v49, %s4565_s25 }
 0x3a1   : > { %2985 = vrot.lane.b32.xlu1 %v5944_v19, %s4565_s25 }
 0x3a4   : > { %2995 = vrot.lane.b32.xlu0 %v5785_v62, %s4565_s25 }
 0x3a5   : > { %2989 = vrot.lane.b32.xlu1 %v5787_v39, %s4565_s25 }
 0x3a8   : > { %2999 = vrot.lane.b32.xlu0 %v5854_v9, %s4565_s25 }
 0x3a9   : > { %2993 = vrot.lane.b32.xlu1 %v5783_v60, %s4565_s25 }
 0x3ac   : > { %3003 = vrot.lane.b32.xlu0 %v5857_v15, %s4565_s25  ;;  %v6008_v4 = vpop.permute.xlu0 %2931 }
 0x3ad   : > { %2997 = vrot.lane.b32.xlu1 %v5848_v2, %s4565_s25  ;;  %v6024_v28 = vpop.permute.xlu1 %2933 }
 0x3b0   : > { %3007 = vrot.lane.b32.xlu0 %v5962_v55, %s4565_s25  ;;  %v6020_v35 = vpop.permute.xlu0 %2935 }
 0x3b1   : > { %3001 = vrot.lane.b32.xlu1 %v5852_v37, %s4565_s25  ;;  %v6036_v7 = vpop.permute.xlu1 %2937 }
 0x3b4   : > { %3139 = vrot.lane.b32.xlu0 %v5741_v59, %s4570_s30 }
 0x3b5   : > { %3005 = vrot.lane.b32.xlu1 %v5889_v10, %s4565_s25 }
 0x3b8   : > { %3143 = vrot.lane.b32.xlu0 %v5736_v53, %s4570_s30 }
 0x3b9   : > { %3137 = vrot.lane.b32.xlu1 %v5739_v32, %s4570_s30 }
 0x3bc   : > { %3147 = vrot.lane.b32.xlu0 %v5799_v61, %s4570_s30 }
 0x3bd   : > { %3141 = vrot.lane.b32.xlu1 %v5731_v1, %s4570_s30 }
 0x3c0   : > { %3151 = vrot.lane.b32.xlu0 %v5811_v36, %s4570_s30 }
 0x3c1   : > { %3145 = vrot.lane.b32.xlu1 %v5797_v13, %s4570_s30 }
 0x3c4   : > { %3155 = vrot.lane.b32.xlu0 %v5891_v58, %s4570_s30 }
 0x3c5   : > { %3149 = vrot.lane.b32.xlu1 %v5808_v3, %s4570_s30 }
 0x3c8   : > { %3159 = vrot.lane.b32.xlu0 %v5759_v33, %s4570_s30 }
 0x3c9   : > { %3153 = vrot.lane.b32.xlu1 %v5868_v63, %s4570_s30 }
 0x3cc   : > { %3163 = vrot.lane.b32.xlu0 %v5755_v14, %s4570_s30 }
 0x3cd   : > { %3157 = vrot.lane.b32.xlu1 %v5757_v57, %s4570_s30 }
 0x3d0   : > { %3167 = vrot.lane.b32.xlu0 %v5826_v42, %s4570_s30 }
 0x3d1   : > { %3161 = vrot.lane.b32.xlu1 %v5753_v27, %s4570_s30 }
 0x3d4   : > { %3171 = vrot.lane.b32.xlu0 %v5829_v31, %s4570_s30 }
 0x3d5   : > { %3165 = vrot.lane.b32.xlu1 %v5820_v38, %s4570_s30 }
 0x3d8   : > { %3175 = vrot.lane.b32.xlu0 %v5910_v46, %s4570_s30 }
 0x3d9   : > { %3169 = vrot.lane.b32.xlu1 %v5824_v41, %s4570_s30 }
 0x3dc   : > { %3179 = vrot.lane.b32.xlu0 %v5777_v51, %s4570_s30 }
 0x3dd   : > { %3173 = vrot.lane.b32.xlu1 %v5879_v44, %s4570_s30 }
 0x3de   : > { %v6028_v26 = vpop.permute.xlu0 %2939 }
 0x3e0   : > { %3183 = vrot.lane.b32.xlu0 %v5773_v0, %s4570_s30 }
 0x3e1   : > { %3177 = vrot.lane.b32.xlu1 %v5775_v54, %s4570_s30 }
 0x3e2   : > { %v6034_v50 = vpop.permute.xlu0 %2943 }
 0x3e4   : > { %3187 = vrot.lane.b32.xlu0 %v5840_v43, %s4570_s30 }
 0x3e5   : > { %3181 = vrot.lane.b32.xlu1 %v5771_v48, %s4570_s30 }
 0x3e6   : > { %v6042_v45 = vpop.permute.xlu0 %2947 }
 0x3e7   : > { %v6044_v40 = vpop.permute.xlu1 %2941 }
 0x3e8   : > { %3191 = vrot.lane.b32.xlu0 %v5843_v25, %s4570_s30 }
 0x3e9   : > { %3185 = vrot.lane.b32.xlu1 %v5834_v11, %s4570_s30 }
 0x3ea   : > { %v6050_v18 = vpop.permute.xlu0 %2951 }
 0x3eb   : > { %v6052_v5 = vpop.permute.xlu1 %2945 }
 0x3ec   : > { %3195 = vrot.lane.b32.xlu0 %v5944_v19, %s4570_s30 }
 0x3ed   : > { %3189 = vrot.lane.b32.xlu1 %v5838_v47, %s4570_s30 }
 0x3ee   : > { %v6058_v23 = vpop.permute.xlu0 %2955 }
 0x3ef   : > { %v6060_v8 = vpop.permute.xlu1 %2949 }
 0x3f0   : > { %3199 = vrot.lane.b32.xlu0 %v5789_v49, %s4570_s30 }
 0x3f1   : > { %3193 = vrot.lane.b32.xlu1 %v5881_v17, %s4570_s30 }
 0x3f2   : > { %v6066_v22 = vpop.permute.xlu0 %2959 }
 0x3f3   : > { %v6068_v56 = vpop.permute.xlu1 %2953 }
 0x3f4   : > { %3203 = vrot.lane.b32.xlu0 %v5785_v62, %s4570_s30 }
 0x3f5   : > { %3197 = vrot.lane.b32.xlu1 %v5787_v39, %s4570_s30 }
 0x3f6   : > { %v6074_v24 = vpop.permute.xlu0 %2963 }
 0x3f7   : > { %v6076_v6 = vpop.permute.xlu1 %2957 }
 0x3f8   : > { %3207 = vrot.lane.b32.xlu0 %v5854_v9, %s4570_s30 }
 0x3f9   : > { %3201 = vrot.lane.b32.xlu1 %v5783_v60, %s4570_s30 }
 0x3fa   : > { %v6082_v49 = vpop.permute.xlu0 %2967 }
 0x3fb   : > { %v6084_v19 = vpop.permute.xlu1 %2961 }
 0x3fc   : > { %3211 = vrot.lane.b32.xlu0 %v5857_v15, %s4570_s30 }
 0x3fd   : > { %3205 = vrot.lane.b32.xlu1 %v5848_v2, %s4570_s30 }
 0x3fe   : > { %v6090_v62 = vpop.permute.xlu0 %2971 }
 0x3ff   : > { %v6092_v39 = vpop.permute.xlu1 %2965 }
 0x400   : > { %3215 = vrot.lane.b32.xlu0 %v5962_v55, %s4570_s30 }
 0x401   : > { %3209 = vrot.lane.b32.xlu1 %v5852_v37, %s4570_s30 }
 0x402   : > { %v6098_v9 = vpop.permute.xlu0 %2975 }
 0x403   : > { %7119 = vst [vmem:[#allocation22_spill] sm:$0xff] %v6098_v9  ;;  %v6100_v60 = vpop.permute.xlu1 %2969 }
 0x405   : > { %3213 = vrot.lane.b32.xlu1 %v5889_v10, %s4570_s30 }
 0x406   : > { %v6104_v15 = vpop.permute.xlu0 %2979 }
 0x407   : > { %7120 = vst [vmem:[#allocation23_spill] sm:$0xff] %v6104_v15  ;;  %v6106_v2 = vpop.permute.xlu1 %2973 }
 0x40a   : > { %v6108_v17 = vpop.permute.xlu0 %2983 }
 0x40b   : > { %7121 = vst [vmem:[#allocation24_spill] sm:$0xff] %v6108_v17  ;;  %v6110_v25 = vpop.permute.xlu1 %2977 }
 0x40c   : > { %7122 = vst [vmem:[#allocation25_spill] sm:$0xff] %v6110_v25 }
 0x40e   : > { %v6112_v47 = vpop.permute.xlu0 %2987 }
 0x40f   : > { %7123 = vst [vmem:[#allocation26_spill] sm:$0xff] %v6112_v47  ;;  %v6114_v55 = vpop.permute.xlu1 %2981 }
 0x410   : > { %7124 = vst [vmem:[#allocation27_spill] sm:$0xff] %v6114_v55 }
 0x412   : > { %v6116_v37 = vpop.permute.xlu0 %2991 }
 0x413   : > { %7125 = vst [vmem:[#allocation28_spill] sm:$0xff] %v6116_v37  ;;  %v6118_v43 = vpop.permute.xlu1 %2985  ;;  %v3009_v37 = vsel %vm539_vm5, %v5996_v34, %v5992_v20  ;;  %v3012_v34 = vsel %vm539_vm5, %v6000_v16, %v6016_v29 }
 0x414   : > { %7126 = vst [vmem:[#allocation29_spill] sm:$0xff] %v6118_v43 }
 0x416   : > { %v6120_v11 = vpop.permute.xlu0 %2995 }
 0x417   : > { %7127 = vst [vmem:[#allocation30_spill] sm:$0xff] %v6120_v11  ;;  %v6122_v0 = vpop.permute.xlu1 %2989 }
 0x418   : > { %7128 = vst [vmem:[#allocation31_spill] sm:$0xff] %v6122_v0 }
 0x41a   : > { %v6124_v10 = vpop.permute.xlu0 %2999 }
 0x41b   : > { %7129 = vst [vmem:[#allocation32_spill] sm:$0xff] %v6124_v10  ;;  %v6126_v15 = vpop.permute.xlu1 %2993  ;;  %v3010_v10 = vsel %vm539_vm5, %v5992_v20, %v6006_v21 }
 0x41c   : > { %7130 = vst [vmem:[#allocation33_spill] sm:$0xff] %v6126_v15  ;;  %v3093_v15 = vmax.f32 %v5676_v30, %v3009_v37  ;;  %v3096_v37 = vmax.f32 %v5731_v1, %v3012_v34 }
 0x41e   : > { %v6128_v9 = vpop.permute.xlu0 %3003 }
 0x41f   : > { %7131 = vst [vmem:[#allocation34_spill] sm:$0xff] %v6128_v9  ;;  %v6130_v17 = vpop.permute.xlu1 %2997 }
 0x420   : > { %7132 = vst [vmem:[#allocation35_spill] sm:$0xff] %v6130_v17  ;;  %v3094_v17 = vmax.f32 %v5739_v32, %v3010_v10 }
 0x422   : > { %v6132_v25 = vpop.permute.xlu0 %3007 }
 0x423   : > { %7133 = vst [vmem:[#allocation36_spill] sm:$0xff] %v6132_v25  ;;  %v6134_v47 = vpop.permute.xlu1 %3001  ;;  %v3011_v25 = vsel %vm539_vm5, %v6006_v21, %v6000_v16 }
 0x424   : > { %7134 = vst [vmem:[#allocation37_spill] sm:$0xff] %v6134_v47  ;;  %v3095_v32 = vmax.f32 %v5741_v59, %v3011_v25 }
 0x426   : > { %v3140_v55 = vpop.permute.xlu0 %3139 }
 0x427   : > { %v6139_v11 = vpop.permute.xlu1 %3005 }
 0x428   : > { %7135 = vst [vmem:[#allocation38_spill] sm:$0xff] %v6139_v11 }
 0x42a   : > { %v3144_v9 = vpop.permute.xlu0 %3143 }
 0x42b   : > { %v3138_v0 = vpop.permute.xlu1 %3137 }
 0x42c   : > { %v6152_v47 = vmax.f32 %v3093_v15, %v3138_v0  ;;  %v3217_v11 = vsel %vm893_vm10, %v3138_v0, %v3140_v55  ;;  %v3013_v15 = vsel %vm539_vm5, %v6016_v29, %v6008_v4  ;;  %v3014_v0 = vsel %vm539_vm5, %v6008_v4, %v6024_v28 }
 0x42d   : > { %v6155_v43 = vmax.f32 %v3094_v17, %v3217_v11  ;;  %v3097_v25 = vmax.f32 %v5736_v53, %v3013_v15  ;;  %v3098_v16 = vmax.f32 %v5797_v13, %v3014_v0  ;;  %v3016_v4 = vsel %vm539_vm5, %v6020_v35, %v6036_v7 }
 0x42e   : > { %3385 = vrot.lane.b32.xlu1 %v6152_v47, %s4561_s21  ;;  %v3148_v30 = vpop.permute.xlu0 %3147 }
 0x42f   : > { %v3142_v10 = vpop.permute.xlu1 %3141  ;;  %3387 = vrot.lane.b32.xlu0 %v6155_v43, %s4561_s21 }
 0x430   : > { %v3218_v11 = vsel %vm893_vm10, %v3140_v55, %v3142_v10  ;;  %v3219_v17 = vsel %vm893_vm10, %v3142_v10, %v3144_v9  ;;  %v3015_v55 = vsel %vm539_vm5, %v6024_v28, %v6020_v35  ;;  %v3100_v10 = vmax.f32 %v5808_v3, %v3016_v4 }
 0x431   : > { %v6171_v20 = vmax.f32 %v3095_v32, %v3218_v11  ;;  %v6173_v59 = vmax.f32 %v3096_v37, %v3219_v17  ;;  %v3099_v37 = vmax.f32 %v5799_v61, %v3015_v55  ;;  %v3018_v35 = vsel %vm539_vm5, %v6028_v26, %v6044_v40 }
 0x432   : > { %v3152_v1 = vpop.permute.xlu0 %3151 }
 0x433   : > { %v3146_v21 = vpop.permute.xlu1 %3145  ;;  %3389 = vrot.lane.b32.xlu1 %v6171_v20, %s4561_s21  ;;  %3391 = vrot.lane.b32.xlu0 %v6173_v59, %s4561_s21 }
 0x434   : > { %v3220_v29 = vsel %vm893_vm10, %v3144_v9, %v3146_v21  ;;  %v3221_v53 = vsel %vm893_vm10, %v3146_v21, %v3148_v30  ;;  %v3017_v9 = vsel %vm539_vm5, %v6036_v7, %v6028_v26  ;;  %v3019_v7 = vsel %vm539_vm5, %v6034_v50, %v6052_v5 }
 0x435   : > { %v6189_v13 = vmax.f32 %v3097_v25, %v3220_v29  ;;  %v6191_v34 = vmax.f32 %v3098_v16, %v3221_v53  ;;  %v3101_v17 = vmax.f32 %v5811_v36, %v3017_v9  ;;  %v3102_v25 = vmax.f32 %v5868_v63, %v3018_v35 }
 0x436   : > { %v3156_v32 = vpop.permute.xlu0 %3155  ;;  %v3104_v63 = vmax.f32 %v5877_v12, %v3019_v7  ;;  %v3103_v50 = vmax.f32 %v5891_v58, %v6044_v40  ;;  %v3021_v29 = vsel %vm539_vm5, %v6042_v45, %v6060_v8 }
 0x437   : > { %v3150_v15 = vpop.permute.xlu1 %3149  ;;  %3393 = vrot.lane.b32.xlu1 %v6189_v13, %s4561_s21  ;;  %3395 = vrot.lane.b32.xlu0 %v6191_v34, %s4561_s21 }
 0x438   : > { %v3222_v28 = vsel %vm893_vm10, %v3148_v30, %v3150_v15  ;;  %v3223_v61 = vsel %vm893_vm10, %v3150_v15, %v3152_v1  ;;  %v6241_v53 = vmax.f32 %v3103_v50, %v3156_v32 }
 0x439   : > { %v6207_v3 = vmax.f32 %v3099_v37, %v3222_v28  ;;  %v6209_v0 = vmax.f32 %v3100_v10, %v3223_v61  ;;  %v3106_v10 = vmax.f32 %v5759_v33, %v3021_v29 }
 0x43a   : > { %v3160_v11 = vpop.permute.xlu0 %3159 }
 0x43b   : > { %v3154_v16 = vpop.permute.xlu1 %3153  ;;  %3397 = vrot.lane.b32.xlu1 %v6207_v3, %s4561_s21  ;;  %3399 = vrot.lane.b32.xlu0 %v6209_v0, %s4561_s21 }
 0x43c   : > { %v3224_v26 = vsel %vm893_vm10, %v3152_v1, %v3154_v16  ;;  %v3225_v30 = vsel %vm893_vm10, %v3154_v16, %v3156_v32  ;;  %v3020_v1 = vsel %vm539_vm5, %v6052_v5, %v6042_v45  ;;  %v3022_v45 = vsel %vm539_vm5, %v6060_v8, %v6050_v18 }
 0x43d   : > { %v6222_v21 = vmax.f32 %v3101_v17, %v3224_v26  ;;  %v6224_v36 = vmax.f32 %v3102_v25, %v3225_v30  ;;  %v3105_v37 = vmax.f32 %v5757_v57, %v3020_v1  ;;  %v3023_v5 = vsel %vm539_vm5, %v6050_v18, %v6068_v56 }
 0x43e   : > { %v3164_v55 = vpop.permute.xlu0 %3163  ;;  %v3107_v28 = vmax.f32 %v5753_v27, %v3022_v45  ;;  %v3108_v61 = vmax.f32 %v5755_v14, %v3023_v5  ;;  %v3024_v18 = vsel %vm539_vm5, %v6068_v56, %v6058_v23  ;;  %v3025_v8 = vsel %vm539_vm5, %v6058_v23, %v6076_v6 }
 0x43f   : > { %v3158_v4 = vpop.permute.xlu1 %3157  ;;  %3401 = vrot.lane.b32.xlu1 %v6222_v21, %s4561_s21  ;;  %3403 = vrot.lane.b32.xlu0 %v6224_v36, %s4561_s21  ;;  %v3109_v16 = vmax.f32 %v5820_v38, %v3024_v18  ;;  %v3110_v26 = vmax.f32 %v5826_v42, %v3025_v8  ;;  %v3026_v23 = vsel %vm539_vm5, %v6076_v6, %v6066_v22 }
 0x440   : > { %v6239_v12 = vmax.f32 %v3104_v63, %v3158_v4  ;;  %v3226_v58 = vsel %vm893_vm10, %v3158_v4, %v3160_v11  ;;  %v3027_v56 = vsel %vm539_vm5, %v6066_v22, %v6084_v19  ;;  %v3111_v4 = vmax.f32 %v5824_v41, %v3026_v23 }
 0x441   : > { %v6257_v57 = vmax.f32 %v3105_v37, %v3226_v58  ;;  %v3112_v1 = vmax.f32 %v5829_v31, %v3027_v56  ;;  %v3028_v6 = vsel %vm539_vm5, %v6084_v19, %v6074_v24  ;;  %v3029_v19 = vsel %vm539_vm5, %v6092_v39, %v6082_v49  ;;  %v7140_v56 = vld [vmem:[#allocation9_spill] sm:$0xff] }
 0x442   : > { %v3168_v40 = vpop.permute.xlu0 %3167  ;;  %v3113_v37 = vmax.f32 %v5879_v44, %v3028_v6  ;;  %v3030_v45 = vsel %vm539_vm5, %v6082_v49, %v6100_v60  ;;  %v3031_v39 = vsel %vm539_vm5, %v6100_v60, %v6090_v62  ;;  %v3032_v49 = vsel %vm539_vm5, %v6090_v62, %v6106_v2  ;;  %v7136_v60 = vld [vmem:[#allocation22_spill] sm:$0xff] }
 0x443   : > { %v3162_v15 = vpop.permute.xlu1 %3161  ;;  %3405 = vrot.lane.b32.xlu1 %v6241_v53, %s4561_s21  ;;  %3407 = vrot.lane.b32.xlu0 %v6239_v12, %s4561_s21  ;;  %v3117_v18 = vmax.f32 %v5777_v51, %v3031_v39  ;;  %v3118_v8 = vmax.f32 %v5771_v48, %v3032_v49  ;;  %v3033_v62 = vsel %vm539_vm5, %v6106_v2, %v7136_v60 }
 0x444   : > { %v3227_v32 = vsel %vm893_vm10, %v3160_v11, %v3162_v15  ;;  %v3228_v9 = vsel %vm893_vm10, %v3162_v15, %v3164_v55 }
 0x445   : > { %v6259_v33 = vmax.f32 %v3106_v10, %v3227_v32  ;;  %v6275_v27 = vmax.f32 %v3107_v28, %v3228_v9  ;;  %v3114_v10 = vmax.f32 %v5910_v46, %v6074_v24  ;;  %v3115_v32 = vmax.f32 %v5920_v52, %v3029_v19 }
 0x446   : > { %v3172_v35 = vpop.permute.xlu0 %3171  ;;  %v3116_v9 = vmax.f32 %v5775_v54, %v3030_v45 }
 0x447   : > { %v3166_v17 = vpop.permute.xlu1 %3165  ;;  %3409 = vrot.lane.b32.xlu1 %v6257_v57, %s4561_s21  ;;  %3411 = vrot.lane.b32.xlu0 %v6259_v33, %s4561_s21 }
 0x448   : > { %v3229_v11 = vsel %vm893_vm10, %v3164_v55, %v3166_v17  ;;  %v3230_v25 = vsel %vm893_vm10, %v3166_v17, %v3168_v40 }
 0x449   : > { %v6277_v14 = vmax.f32 %v3108_v61, %v3229_v11  ;;  %v6293_v38 = vmax.f32 %v3109_v16, %v3230_v25  ;;  %v7137_v25 = vld [vmem:[#allocation25_spill] sm:$0xff] }
 0x44a   : > { %v3176_v7 = vpop.permute.xlu0 %3175 }
 0x44b   : > { %v3170_v30 = vpop.permute.xlu1 %3169  ;;  %3413 = vrot.lane.b32.xlu1 %v6275_v27, %s4561_s21  ;;  %3415 = vrot.lane.b32.xlu0 %v6277_v14, %s4561_s21  ;;  %v6328_v44 = vmax.f32 %v3114_v10, %v3176_v7 }
 0x44c   : > { %v3231_v63 = vsel %vm893_vm10, %v3168_v40, %v3170_v30  ;;  %v3232_v55 = vsel %vm893_vm10, %v3170_v30, %v3172_v35  ;;  %v7139_v30 = vld [vmem:[#allocation4_spill] sm:$0xff] }
 0x44d   : > { %v6295_v42 = vmax.f32 %v3110_v26, %v3231_v63  ;;  %v6308_v58 = vmax.f32 %v3111_v4, %v3232_v55  ;;  %v3119_v23 = vmax.f32 %v7139_v30, %v3033_v62  ;;  %v7157_v30 = vld [vmem:[#allocation20_spill] sm:$0xff] }
 0x44e   : > { %v3180_v50 = vpop.permute.xlu0 %3179 }
 0x44f   : > { %v3174_v29 = vpop.permute.xlu1 %3173  ;;  %3417 = vrot.lane.b32.xlu1 %v6293_v38, %s4561_s21  ;;  %3419 = vrot.lane.b32.xlu0 %v6295_v42, %s4561_s21 }
 0x450   : > { %v3233_v22 = vsel %vm893_vm10, %v3172_v35, %v3174_v29  ;;  %v3234_v41 = vsel %vm893_vm10, %v3174_v29, %v3176_v7  ;;  %v3034_v7 = vsel %vm539_vm5, %v7136_v60, %v7137_v25 }
 0x451   : > { %v6310_v40 = vmax.f32 %v3112_v1, %v3233_v22  ;;  %v6326_v5 = vmax.f32 %v3113_v37, %v3234_v41  ;;  %v3120_v63 = vmax.f32 %v7140_v56, %v3034_v7  ;;  %v7142_v1 = vld [vmem:[#allocation27_spill] sm:$0xff]  ;;  %v7154_v7 = vld [vmem:[#allocation26_spill] sm:$0xff] }
 0x452   : > { %v3184_v31 = vpop.permute.xlu0 %3183  ;;  %v7145_v37 = vld [vmem:[#allocation11_spill] sm:$0xff] }
 0x453   : > { %v3178_v15 = vpop.permute.xlu1 %3177  ;;  %3421 = vrot.lane.b32.xlu1 %v6308_v58, %s4561_s21  ;;  %3423 = vrot.lane.b32.xlu0 %v6310_v40, %s4561_s21  ;;  %v7158_v56 = vld [vmem:[#allocation19_spill] sm:$0xff] }
 0x454   : > { %v3235_v46 = vsel %vm893_vm10, %v3178_v15, %v3180_v50  ;;  %v6343_v28 = vmax.f32 %v3115_v32, %v3178_v15  ;;  %v7146_v15 = vld [vmem:[#allocation10_spill] sm:$0xff] }
 0x455   : > { %v6345_v52 = vmax.f32 %v3116_v9, %v3235_v46  ;;  %v7147_v46 = vld [vmem:[#allocation24_spill] sm:$0xff]  ;;  %v7148_v9 = vld [vmem:[#allocation29_spill] sm:$0xff] }
 0x456   : > { %v3188_v24 = vpop.permute.xlu0 %3187  ;;  %v3037_v32 = vsel %vm539_vm5, %v7142_v1, %v7147_v46 }
 0x457   : > { %v3182_v35 = vpop.permute.xlu1 %3181  ;;  %3425 = vrot.lane.b32.xlu1 %v6326_v5, %s4561_s21  ;;  %3427 = vrot.lane.b32.xlu0 %v6328_v44, %s4561_s21 }
 0x458   : > { %v3236_v54 = vsel %vm893_vm10, %v3180_v50, %v3182_v35  ;;  %v3237_v61 = vsel %vm893_vm10, %v3182_v35, %v3184_v31  ;;  %v7141_v50 = vld [vmem:[#allocation23_spill] sm:$0xff] }
 0x459   : > { %v6361_v16 = vmax.f32 %v3117_v18, %v3236_v54  ;;  %v6363_v51 = vmax.f32 %v3118_v8, %v3237_v61  ;;  %v3035_v4 = vsel %vm539_vm5, %v7137_v25, %v7141_v50  ;;  %v3036_v29 = vsel %vm539_vm5, %v7141_v50, %v7142_v1  ;;  %v7151_v18 = vld [vmem:[#allocation12_spill] sm:$0xff]  ;;  %v7153_v25 = vld [vmem:[#allocation31_spill] sm:$0xff] }
 0x45a   : > { %v3192_v17 = vpop.permute.xlu0 %3191  ;;  %v3121_v10 = vmax.f32 %v7145_v37, %v3035_v4  ;;  %v3122_v19 = vmax.f32 %v7146_v15, %v3036_v29  ;;  %v3123_v8 = vmax.f32 %v7151_v18, %v3037_v32  ;;  %v7159_v4 = vld [vmem:[#allocation28_spill] sm:$0xff]  ;;  %v7160_v29 = vld [vmem:[#allocation33_spill] sm:$0xff] }
 0x45b   : > { %v3186_v11 = vpop.permute.xlu1 %3185  ;;  %3429 = vrot.lane.b32.xlu1 %v6343_v28, %s4561_s21  ;;  %3431 = vrot.lane.b32.xlu0 %v6345_v52, %s4561_s21  ;;  %7138 = vst [vmem:[#allocation22_spill] sm:$0xff] %v6363_v51  ;;  %v3040_v1 = vsel %vm539_vm5, %v7153_v25, %v7159_v4 }
 0x45c   : > { %v3238_v48 = vsel %vm893_vm10, %v3184_v31, %v3186_v11  ;;  %v3239_v26 = vsel %vm893_vm10, %v3186_v11, %v3188_v24  ;;  %v7152_v11 = vld [vmem:[#allocation17_spill] sm:$0xff] }
 0x45d   : > { %v6379_v6 = vmax.f32 %v3119_v23, %v3238_v48  ;;  %v6381_v22 = vmax.f32 %v3120_v63, %v3239_v26  ;;  %v3039_v48 = vsel %vm539_vm5, %v7154_v7, %v7153_v25  ;;  %v3125_v23 = vmax.f32 %v7157_v30, %v7148_v9  ;;  %v7170_v7 = vld [vmem:[#allocation6_spill] sm:$0xff] }
 0x45e   : > { %v3196_v2 = vpop.permute.xlu0 %3195  ;;  %v3126_v63 = vmax.f32 %v7158_v56, %v3039_v48 }
 0x45f   : > { %v3190_v55 = vpop.permute.xlu1 %3189  ;;  %3433 = vrot.lane.b32.xlu1 %v6361_v16, %s4561_s21  ;;  %3435 = vrot.lane.b32.xlu0 %v6363_v51, %s4561_s21  ;;  %7143 = vst [vmem:[#allocation25_spill] sm:$0xff] %v6379_v6  ;;  %7144 = vst [vmem:[#allocation4_spill] sm:$0xff] %v6381_v22 }
 0x460   : > { %v3240_v41 = vsel %vm893_vm10, %v3188_v24, %v3190_v55  ;;  %v3241_v31 = vsel %vm893_vm10, %v3190_v55, %v3192_v17  ;;  %v3038_v24 = vsel %vm539_vm5, %v7147_v46, %v7148_v9  ;;  %v7164_v46 = vld [vmem:[#allocation8_spill] sm:$0xff] }
 0x461   : > { %v6397_v35 = vmax.f32 %v3121_v10, %v3240_v41  ;;  %v6399_v39 = vmax.f32 %v3122_v19, %v3241_v31  ;;  %v3124_v60 = vmax.f32 %v7152_v11, %v3038_v24  ;;  %v3041_v41 = vsel %vm539_vm5, %v7159_v4, %v7160_v29  ;;  %v7163_v19 = vld [vmem:[#allocation7_spill] sm:$0xff]  ;;  %v7165_v24 = vld [vmem:[#allocation30_spill] sm:$0xff] }
 0x462   : > { %v3200_v49 = vpop.permute.xlu0 %3199  ;;  %v6429_v31 = vmax.f32 %v3125_v23, %v3196_v2  ;;  %v3128_v32 = vmax.f32 %v7164_v46, %v3041_v41  ;;  %v7171_v23 = vld [vmem:[#allocation32_spill] sm:$0xff]  ;;  %v7175_v41 = vld [vmem:[#allocation13_spill] sm:$0xff] }
 0x463   : > { %v3194_v45 = vpop.permute.xlu1 %3193  ;;  %3437 = vrot.lane.b32.xlu1 %v6379_v6, %s4561_s21  ;;  %3439 = vrot.lane.b32.xlu0 %v6381_v22, %s4561_s21  ;;  %7149 = vst [vmem:[#allocation9_spill] sm:$0xff] %v6397_v35  ;;  %7150 = vst [vmem:[#allocation23_spill] sm:$0xff] %v6399_v39 }
 0x464   : > { %v3242_v54 = vsel %vm893_vm10, %v3192_v17, %v3194_v45  ;;  %v3243_v61 = vsel %vm893_vm10, %v3194_v45, %v3196_v2  ;;  %7161 = vst [vmem:[#allocation10_spill] sm:$0xff] %v6429_v31  ;;  %v3127_v45 = vmax.f32 %v7163_v19, %v3040_v1  ;;  %v3042_v2 = vsel %vm539_vm5, %v7160_v29, %v7165_v24 }
 0x465   : > { %v6412_v26 = vmax.f32 %v3123_v8, %v3242_v54  ;;  %v6414_v17 = vmax.f32 %v3124_v60, %v3243_v61  ;;  %v7166_v54 = vld [vmem:[#allocation35_spill] sm:$0xff] }
 0x466   : > { %v3204_v50 = vpop.permute.xlu0 %3203  ;;  %v3043_v61 = vsel %vm539_vm5, %v7165_v24, %v7166_v54  ;;  %v3044_v56 = vsel %vm539_vm5, %v7166_v54, %v7171_v23 }
 0x467   : > { %v3198_v62 = vpop.permute.xlu1 %3197  ;;  %3441 = vrot.lane.b32.xlu1 %v6397_v35, %s4561_s21  ;;  %3443 = vrot.lane.b32.xlu0 %v6399_v39, %s4561_s21  ;;  %7155 = vst [vmem:[#allocation27_spill] sm:$0xff] %v6412_v26  ;;  %7156 = vst [vmem:[#allocation11_spill] sm:$0xff] %v6414_v17  ;;  %v3130_v48 = vmax.f32 %v7170_v7, %v3043_v61 }
 0x468   : > { %v6431_v37 = vmax.f32 %v3126_v63, %v3198_v62  ;;  %v3244_v10 = vsel %vm893_vm10, %v3198_v62, %v3200_v49  ;;  %v7169_v62 = vld [vmem:[#allocation5_spill] sm:$0xff] }
 0x469   : > { %v3129_v25 = vmax.f32 %v7169_v62, %v3042_v2  ;;  %v7172_v63 = vld [vmem:[#allocation37_spill] sm:$0xff]  ;;  %v7178_v2 = vld [vmem:[#allocation38_spill] sm:$0xff] }
 0x46a   : > { %7162 = vst [vmem:[#allocation24_spill] sm:$0xff] %v6431_v37  ;;  %v3208_v8 = vpop.permute.xlu0 %3207 }
 0x46b   : > { %v3202_v55 = vpop.permute.xlu1 %3201  ;;  %3445 = vrot.lane.b32.xlu1 %v6412_v26, %s4561_s21  ;;  %3447 = vrot.lane.b32.xlu0 %v6414_v17, %s4561_s21 }
 0x46c   : > { %v3245_v15 = vsel %vm893_vm10, %v3200_v49, %v3202_v55  ;;  %v6447_v49 = vmax.f32 %v3127_v45, %v3244_v10  ;;  %v3246_v11 = vsel %vm893_vm10, %v3202_v55, %v3204_v50  ;;  %v3045_v55 = vsel %vm539_vm5, %v7171_v23, %v7172_v63 }
 0x46d   : > { %v6449_v18 = vmax.f32 %v3128_v32, %v3245_v15  ;;  %v3131_v10 = vmax.f32 %v7175_v41, %v3044_v56  ;;  %v7176_v15 = vld [vmem:[#allocation15_spill] sm:$0xff]  ;;  %v7177_v32 = vld [vmem:[#allocation34_spill] sm:$0xff]  ;;  %v7187_v41 = vld [vmem:[#allocation21_spill] sm:$0xff] }
 0x46e   : > { %7167 = vst [vmem:[#allocation29_spill] sm:$0xff] %v6447_v49  ;;  %v3132_v19 = vmax.f32 %v7176_v15, %v3045_v55  ;;  %v3212_v45 = vpop.permute.xlu0 %3211  ;;  %v3046_v24 = vsel %vm539_vm5, %v7172_v63, %v7177_v32 }
 0x46f   : > { %v3206_v9 = vpop.permute.xlu1 %3205  ;;  %3449 = vrot.lane.b32.xlu1 %v6429_v31, %s4561_s21  ;;  %3451 = vrot.lane.b32.xlu0 %v6431_v37, %s4561_s21  ;;  %7168 = vst [vmem:[#allocation12_spill] sm:$0xff] %v6449_v18 }
 0x470   : > { %v3247_v60 = vsel %vm893_vm10, %v3204_v50, %v3206_v9  ;;  %v6465_v50 = vmax.f32 %v3129_v25, %v3246_v11  ;;  %v3248_v1 = vsel %vm893_vm10, %v3206_v9, %v3208_v8  ;;  %v3047_v9 = vsel %vm539_vm5, %v7177_v32, %v7178_v2  ;;  %v7182_v25 = vld [vmem:[#allocation16_spill] sm:$0xff] }
 0x471   : > { %v6467_v4 = vmax.f32 %v3130_v48, %v3247_v60  ;;  %v6483_v54 = vmax.f32 %v3131_v10, %v3248_v1  ;;  %v7181_v60 = vld [vmem:[#allocation14_spill] sm:$0xff]  ;;  %v3134_v7 = vmax.f32 %v7182_v25, %v3047_v9  ;;  %v7183_v48 = vld [vmem:[#allocation36_spill] sm:$0xff] }
 0x472   : > { %7173 = vst [vmem:[#allocation17_spill] sm:$0xff] %v6465_v50  ;;  %v3133_v62 = vmax.f32 %v7181_v60, %v3046_v24  ;;  %v3048_v23 = vsel %vm539_vm5, %v7178_v2, %v7183_v48  ;;  %v7186_v1 = vld [vmem:[#allocation18_spill] sm:$0xff]  ;;  %v3136_v10 = vmax.f32 %v7187_v41, %v7183_v48 }
 0x473   : > { %v3210_v30 = vpop.permute.xlu1 %3209  ;;  %3453 = vrot.lane.b32.xlu1 %v6447_v49, %s4561_s21  ;;  %3455 = vrot.lane.b32.xlu0 %v6449_v18, %s4561_s21  ;;  %7174 = vst [vmem:[#allocation31_spill] sm:$0xff] %v6467_v4  ;;  %7179 = vst [vmem:[#allocation26_spill] sm:$0xff] %v6483_v54 }
 0x474   : > { %v3249_v29 = vsel %vm893_vm10, %v3208_v8, %v3210_v30  ;;  %v3250_v8 = vsel %vm893_vm10, %v3210_v30, %v3212_v45  ;;  %v3216_v30 = vpop.permute.xlu0 %3215 }
 0x475   : > { %v6485_v61 = vmax.f32 %v3132_v19, %v3249_v29  ;;  %v6498_v56 = vmax.f32 %v3133_v62, %v3250_v8  ;;  %v3135_v29 = vmax.f32 %v7186_v1, %v3048_v23  ;;  %v6512_v19 = vmax.f32 %v3136_v10, %v3216_v30 }
 0x477   : > { %v3214_v46 = vpop.permute.xlu1 %3213  ;;  %3457 = vrot.lane.b32.xlu1 %v6465_v50, %s4561_s21  ;;  %3459 = vrot.lane.b32.xlu0 %v6467_v4, %s4561_s21  ;;  %7180 = vst [vmem:[#allocation20_spill] sm:$0xff] %v6485_v61  ;;  %7184 = vst [vmem:[#allocation19_spill] sm:$0xff] %v6498_v56 }
 0x478   : > { %v3251_v11 = vsel %vm893_vm10, %v3212_v45, %v3214_v46  ;;  %v3252_v55 = vsel %vm893_vm10, %v3214_v46, %v3216_v30  ;;  %7189 = vst [vmem:[#allocation7_spill] sm:$0xff] %v6512_v19 }
 0x479   : > { %v6500_v63 = vmax.f32 %v3134_v7, %v3251_v11  ;;  %v6510_v15 = vmax.f32 %v3135_v29, %v3252_v55 }
 0x47b   : > { %3461 = vrot.lane.b32.xlu1 %v6483_v54, %s4561_s21  ;;  %3463 = vrot.lane.b32.xlu0 %v6485_v61, %s4561_s21  ;;  %7185 = vst [vmem:[#allocation28_spill] sm:$0xff] %v6500_v63  ;;  %7188 = vst [vmem:[#allocation33_spill] sm:$0xff] %v6510_v15 }
 0x47f   : > { %3465 = vrot.lane.b32.xlu1 %v6498_v56, %s4561_s21  ;;  %3467 = vrot.lane.b32.xlu0 %v6500_v63, %s4561_s21 }
 0x483   : > { %3469 = vrot.lane.b32.xlu1 %v6510_v15, %s4561_s21  ;;  %3471 = vrot.lane.b32.xlu0 %v6512_v19, %s4561_s21  ;;  %s4587_s21 = smov 38  }
 0x487   : > { %3601 = vrot.lane.b32.xlu1 %v6152_v47, %s4562_s22  ;;  %3603 = vrot.lane.b32.xlu0 %v6155_v43, %s4562_s22 }
 0x48b   : > { %3605 = vrot.lane.b32.xlu1 %v6171_v20, %s4562_s22  ;;  %3607 = vrot.lane.b32.xlu0 %v6173_v59, %s4562_s22 }
 0x48f   : > { %3609 = vrot.lane.b32.xlu1 %v6189_v13, %s4562_s22  ;;  %3611 = vrot.lane.b32.xlu0 %v6191_v34, %s4562_s22 }
 0x493   : > { %3613 = vrot.lane.b32.xlu1 %v6207_v3, %s4562_s22  ;;  %3615 = vrot.lane.b32.xlu0 %v6209_v0, %s4562_s22 }
 0x497   : > { %3617 = vrot.lane.b32.xlu1 %v6222_v21, %s4562_s22  ;;  %3619 = vrot.lane.b32.xlu0 %v6224_v36, %s4562_s22 }
 0x49b   : > { %3621 = vrot.lane.b32.xlu1 %v6241_v53, %s4562_s22  ;;  %3623 = vrot.lane.b32.xlu0 %v6239_v12, %s4562_s22 }
 0x49f   : > { %3625 = vrot.lane.b32.xlu1 %v6257_v57, %s4562_s22  ;;  %3627 = vrot.lane.b32.xlu0 %v6259_v33, %s4562_s22 }
 0x4a0   : > { %v6546_v45 = vpop.permute.xlu1 %3385 }
 0x4a1   : > { %v6548_v46 = vpop.permute.xlu0 %3387 }
 0x4a3   : > { %3629 = vrot.lane.b32.xlu1 %v6275_v27, %s4562_s22  ;;  %3631 = vrot.lane.b32.xlu0 %v6277_v14, %s4562_s22 }
 0x4a5   : > { %v6554_v32 = vpop.permute.xlu1 %3389  ;;  %v6556_v24 = vpop.permute.xlu0 %3391 }
 0x4a7   : > { %3633 = vrot.lane.b32.xlu1 %v6293_v38, %s4562_s22  ;;  %3635 = vrot.lane.b32.xlu0 %v6295_v42, %s4562_s22 }
 0x4a9   : > { %v6562_v2 = vpop.permute.xlu1 %3393  ;;  %v6564_v9 = vpop.permute.xlu0 %3395 }
 0x4ab   : > { %3637 = vrot.lane.b32.xlu1 %v6308_v58, %s4562_s22  ;;  %3639 = vrot.lane.b32.xlu0 %v6310_v40, %s4562_s22 }
 0x4ad   : > { %v6570_v8 = vpop.permute.xlu1 %3397  ;;  %v6572_v11 = vpop.permute.xlu0 %3399 }
 0x4af   : > { %3641 = vrot.lane.b32.xlu1 %v6326_v5, %s4562_s22  ;;  %3643 = vrot.lane.b32.xlu0 %v6328_v44, %s4562_s22 }
 0x4b1   : > { %v6578_v60 = vpop.permute.xlu1 %3401  ;;  %v6580_v62 = vpop.permute.xlu0 %3403 }
 0x4b3   : > { %3645 = vrot.lane.b32.xlu1 %v6343_v28, %s4562_s22  ;;  %3647 = vrot.lane.b32.xlu0 %v6345_v52, %s4562_s22 }
 0x4b5   : > { %v6586_v25 = vpop.permute.xlu1 %3405  ;;  %v6588_v7 = vpop.permute.xlu0 %3407 }
 0x4b7   : > { %3649 = vrot.lane.b32.xlu1 %v6361_v16, %s4562_s22  ;;  %3651 = vrot.lane.b32.xlu0 %v6363_v51, %s4562_s22 }
 0x4b9   : > { %v6594_v48 = vpop.permute.xlu1 %3409  ;;  %v6596_v23 = vpop.permute.xlu0 %3411 }
 0x4bb   : > { %3653 = vrot.lane.b32.xlu1 %v6379_v6, %s4562_s22  ;;  %3655 = vrot.lane.b32.xlu0 %v6381_v22, %s4562_s22 }
 0x4bd   : > { %v6602_v30 = vpop.permute.xlu1 %3413  ;;  %v6604_v55 = vpop.permute.xlu0 %3415 }
 0x4bf   : > { %3657 = vrot.lane.b32.xlu1 %v6397_v35, %s4562_s22  ;;  %3659 = vrot.lane.b32.xlu0 %v6399_v39, %s4562_s22 }
 0x4c1   : > { %v6610_v1 = vpop.permute.xlu1 %3417  ;;  %v6612_v29 = vpop.permute.xlu0 %3419 }
 0x4c3   : > { %3661 = vrot.lane.b32.xlu1 %v6412_v26, %s4562_s22  ;;  %3663 = vrot.lane.b32.xlu0 %v6414_v17, %s4562_s22 }
 0x4c5   : > { %v6618_v41 = vpop.permute.xlu1 %3421  ;;  %v6620_v10 = vpop.permute.xlu0 %3423 }
 0x4c7   : > { %3665 = vrot.lane.b32.xlu1 %v6429_v31, %s4562_s22  ;;  %3667 = vrot.lane.b32.xlu0 %v6431_v37, %s4562_s22 }
 0x4c9   : > { %v6626_v39 = vpop.permute.xlu1 %3425  ;;  %v6628_v35 = vpop.permute.xlu0 %3427 }
 0x4cb   : > { %3669 = vrot.lane.b32.xlu1 %v6447_v49, %s4562_s22  ;;  %3671 = vrot.lane.b32.xlu0 %v6449_v18, %s4562_s22 }
 0x4cd   : > { %v6634_v17 = vpop.permute.xlu1 %3429  ;;  %v6636_v26 = vpop.permute.xlu0 %3431 }
 0x4cf   : > { %3673 = vrot.lane.b32.xlu1 %v6465_v50, %s4562_s22  ;;  %3675 = vrot.lane.b32.xlu0 %v6467_v4, %s4562_s22 }
 0x4d1   : > { %v6642_v37 = vpop.permute.xlu1 %3433  ;;  %v6644_v31 = vpop.permute.xlu0 %3435 }
 0x4d3   : > { %3677 = vrot.lane.b32.xlu1 %v6483_v54, %s4562_s22  ;;  %3679 = vrot.lane.b32.xlu0 %v6485_v61, %s4562_s22 }
 0x4d5   : > { %v6650_v18 = vpop.permute.xlu1 %3437  ;;  %v6652_v49 = vpop.permute.xlu0 %3439 }
 0x4d6   : > { %7190 = vst [vmem:[#allocation8_spill] sm:$0xff] %v6650_v18  ;;  %7191 = vst [vmem:[#allocation30_spill] sm:$0xff] %v6652_v49 }
 0x4d7   : > { %3681 = vrot.lane.b32.xlu1 %v6498_v56, %s4562_s22  ;;  %3683 = vrot.lane.b32.xlu0 %v6500_v63, %s4562_s22 }
 0x4d9   : > { %v6658_v4 = vpop.permute.xlu1 %3441  ;;  %v6660_v50 = vpop.permute.xlu0 %3443 }
 0x4da   : > { %7192 = vst [vmem:[#allocation35_spill] sm:$0xff] %v6658_v4  ;;  %7193 = vst [vmem:[#allocation5_spill] sm:$0xff] %v6660_v50 }
 0x4db   : > { %3685 = vrot.lane.b32.xlu1 %v6510_v15, %s4562_s22  ;;  %3687 = vrot.lane.b32.xlu0 %v6512_v19, %s4562_s22  ;;  %s4509_s22 = smul.u32 320, %s7246_s16 }
 0x4dd   : > { %v6666_v61 = vpop.permute.xlu1 %3445  ;;  %v6668_v54 = vpop.permute.xlu0 %3447  ;;  %s6945_s9 = scalar_lea.vmem %s7038_s4, %s4509_s22 }
 0x4de   : > { %7194 = vst [vmem:[#allocation6_spill] sm:$0xff] %v6666_v61  ;;  %7195 = vst [vmem:[#allocation32_spill] sm:$0xff] %v6668_v54 }
 0x4e1   : > { %v6670_v22 = vpop.permute.xlu1 %3449  ;;  %v6672_v56 = vpop.permute.xlu0 %3451 }
 0x4e2   : > { %7196 = vst [vmem:[#allocation37_spill] sm:$0xff] %v6670_v22  ;;  %7197 = vst [vmem:[#allocation13_spill] sm:$0xff] %v6672_v56 }
 0x4e5   : > { %v6674_v6 = vpop.permute.xlu1 %3453  ;;  %v3456_v63 = vpop.permute.xlu0 %3455 }
 0x4e6   : > { %7198 = vst [vmem:[#allocation15_spill] sm:$0xff] %v6674_v6  ;;  %v6678_v50 = vsel %vm259_vm1, %v6674_v6, %v3456_v63 }
 0x4e7   : > { %7199 = vst [vmem:[#allocation34_spill] sm:$0xff] %v6678_v50 }
 0x4e9   : > { %v3458_v4 = vpop.permute.xlu1 %3457  ;;  %v3460_v15 = vpop.permute.xlu0 %3459 }
 0x4ea   : > { %v6681_v51 = vsel %vm259_vm1, %v3456_v63, %v3458_v4  ;;  %v6684_v19 = vsel %vm259_vm1, %v3458_v4, %v3460_v15  ;;  %v3473_v4 = vsel %vm259_vm1, %v6546_v45, %v6548_v46 }
 0x4eb   : > { %7200 = vst [vmem:[#allocation38_spill] sm:$0xff] %v6681_v51 }
 0x4ed   : > { %v3462_v54 = vpop.permute.xlu1 %3461  ;;  %v3464_v61 = vpop.permute.xlu0 %3463 }
 0x4ee   : > { %v6687_v22 = vsel %vm259_vm1, %v3460_v15, %v3462_v54  ;;  %v6690_v56 = vsel %vm259_vm1, %v3462_v54, %v3464_v61 }
 0x4ef   : > { %7201 = vst [vmem:[#allocation14_spill] sm:$0xff] %v6687_v22  ;;  %7202 = vst [vmem:[#allocation16_spill] sm:$0xff] %v6690_v56 }
 0x4f1   : > { %v3466_v49 = vpop.permute.xlu1 %3465  ;;  %v3468_v18 = vpop.permute.xlu0 %3467 }
 0x4f2   : > { %v6693_v50 = vsel %vm259_vm1, %v3464_v61, %v3466_v49  ;;  %v6696_v6 = vsel %vm259_vm1, %v3466_v49, %v3468_v18  ;;  %v3557_v61 = vmax.f32 %v6152_v47, %v3473_v4  ;;  %v3474_v49 = vsel %vm259_vm1, %v6548_v46, %v6554_v32 }
 0x4f3   : > { %7203 = vst [vmem:[#allocation36_spill] sm:$0xff] %v6693_v50  ;;  %7204 = vst [vmem:[#allocation18_spill] sm:$0xff] %v6696_v6  ;;  %v3475_v6 = vsel %vm259_vm1, %v6554_v32, %v6556_v24  ;;  %v3476_v4 = vsel %vm259_vm1, %v6556_v24, %v6562_v2  ;;  %v3477_v46 = vsel %vm259_vm1, %v6562_v2, %v6564_v9 }
 0x4f5   : > { %v3470_v63 = vpop.permute.xlu1 %3469  ;;  %v6698_v51 = vpop.permute.xlu0 %3471 }
 0x4f6   : > { %7205 = vst [vmem:[#allocation21_spill] sm:$0xff] %v6698_v51  ;;  %v6704_v15 = vsel %vm259_vm1, %v3468_v18, %v3470_v63  ;;  %v6708_v54 = vsel %vm259_vm1, %v3470_v63, %v6698_v51  ;;  %v3559_v63 = vmax.f32 %v6171_v20, %v3475_v6  ;;  %v3560_v20 = vmax.f32 %v6173_v59, %v3476_v4 }
 0x4f7   : > { %7206 = vst [vmem:[#allocation39_spill] sm:$0xff] %v6704_v15  ;;  %7207 = vst [vmem:[#allocation40_spill] sm:$0xff] %v6708_v54  ;;  %v3558_v15 = vmax.f32 %v6155_v43, %v3474_v49  ;;  %v3561_v6 = vmax.f32 %v6189_v13, %v3477_v46 }
 0x4f9   : > { %v3602_v50 = vpop.permute.xlu1 %3601  ;;  %v3604_v56 = vpop.permute.xlu0 %3603 }
 0x4fa   : > { %v3689_v45 = vsel %vm329_vm2, %v3602_v50, %v3604_v56 }
 0x4fb   : > { %v3773_v18 = vmax.f32 %v3557_v61, %v3689_v45 }
 0x4fd   : > { %v3817_v54 = vmax.f32 %v3773_v18, 0.0  ;;  %v3606_v51 = vpop.permute.xlu1 %3605  ;;  %v3608_v47 = vpop.permute.xlu0 %3607 }
 0x4fe   : > { %v3690_v32 = vsel %vm329_vm2, %v3604_v56, %v3606_v51  ;;  %v3691_v50 = vsel %vm329_vm2, %v3606_v51, %v3608_v47  ;;  %v3478_v56 = vsel %vm259_vm1, %v6564_v9, %v6570_v8  ;;  %v3479_v51 = vsel %vm259_vm1, %v6570_v8, %v6572_v11 }
 0x4ff   : > { %v3861_v61 = vmin.f32 %v3817_v54, 6.4  ;;  %v3774_v45 = vmax.f32 %v3558_v15, %v3690_v32  ;;  %v3775_v43 = vmax.f32 %v3559_v63, %v3691_v50  ;;  %v3562_v4 = vmax.f32 %v6191_v34, %v3478_v56 }
 0x500   : > { %v3563_v46 = vmax.f32 %v6207_v3, %v3479_v51  ;;  %v3481_v8 = vsel %vm259_vm1, %v6578_v60, %v6580_v62 }
 0x501   : > { %v3818_v49 = vmax.f32 %v3774_v45, 0.0  ;;  %v3819_v18 = vmax.f32 %v3775_v43, 0.0  ;;  %v3610_v22 = vpop.permute.xlu1 %3609  ;;  %3949 = vrot.lane.b32.xlu1 %v3861_v61, %s4587_s21  ;;  %v3612_v24 = vpop.permute.xlu0 %3611 }
 0x502   : > { %v3692_v2 = vsel %vm329_vm2, %v3608_v47, %v3610_v22  ;;  %v3693_v59 = vsel %vm329_vm2, %v3610_v22, %v3612_v24  ;;  %v3480_v22 = vsel %vm259_vm1, %v6572_v11, %v6578_v60  ;;  %v3482_v60 = vsel %vm259_vm1, %v6580_v62, %v6586_v25 }
 0x503   : > { %v3862_v13 = vmin.f32 %v3818_v49, 6.4  ;;  %v3863_v15 = vmin.f32 %v3819_v18, 6.4  ;;  %v3776_v54 = vmax.f32 %v3560_v20, %v3692_v2  ;;  %v3777_v63 = vmax.f32 %v3561_v6, %v3693_v59 }
 0x504   : > { %v3564_v6 = vmax.f32 %v6209_v0, %v3480_v22  ;;  %v3565_v49 = vmax.f32 %v6222_v21, %v3481_v8 }
 0x505   : > { %v3820_v32 = vmax.f32 %v3776_v54, 0.0  ;;  %v3821_v50 = vmax.f32 %v3777_v63, 0.0  ;;  %v3614_v61 = vpop.permute.xlu1 %3613  ;;  %3951 = vrot.lane.b32.xlu0 %v3862_v13, %s4587_s21  ;;  %3953 = vrot.lane.b32.xlu1 %v3863_v15, %s4587_s21  ;;  %v3616_v9 = vpop.permute.xlu0 %3615  ;;  %v3567_v15 = vmax.f32 %v6241_v53, %v6586_v25  ;;  %v3566_v54 = vmax.f32 %v6224_v36, %v3482_v60 }
 0x506   : > { %v3694_v34 = vsel %vm329_vm2, %v3612_v24, %v3614_v61  ;;  %v3695_v3 = vsel %vm329_vm2, %v3614_v61, %v3616_v9  ;;  %v3487_v60 = vsel %vm259_vm1, %v6604_v55, %v6610_v1 }
 0x507   : > { %v3864_v47 = vmin.f32 %v3820_v32, 6.4  ;;  %v3865_v45 = vmin.f32 %v3821_v50, 6.4  ;;  %v3778_v43 = vmax.f32 %v3562_v4, %v3694_v34  ;;  %v3779_v20 = vmax.f32 %v3563_v46, %v3695_v3 }
 0x508   : > { %v3483_v32 = vsel %vm259_vm1, %v6588_v7, %v6594_v48  ;;  %v3484_v50 = vsel %vm259_vm1, %v6594_v48, %v6596_v23  ;;  %v3485_v3 = vsel %vm259_vm1, %v6596_v23, %v6602_v30 }
 0x509   : > { %v3822_v18 = vmax.f32 %v3778_v43, 0.0  ;;  %v3823_v56 = vmax.f32 %v3779_v20, 0.0  ;;  %v3618_v51 = vpop.permute.xlu1 %3617  ;;  %3955 = vrot.lane.b32.xlu0 %v3864_v47, %s4587_s21  ;;  %3957 = vrot.lane.b32.xlu1 %v3865_v45, %s4587_s21  ;;  %v3620_v11 = vpop.permute.xlu0 %3619  ;;  %v3568_v8 = vmax.f32 %v6239_v12, %v3483_v32  ;;  %v3569_v34 = vmax.f32 %v6257_v57, %v3484_v50 }
 0x50a   : > { %v3696_v24 = vsel %vm329_vm2, %v3616_v9, %v3618_v51  ;;  %v3697_v2 = vsel %vm329_vm2, %v3618_v51, %v3620_v11  ;;  %v3486_v45 = vsel %vm259_vm1, %v6602_v30, %v6604_v55  ;;  %v3570_v23 = vmax.f32 %v6259_v33, %v3485_v3 }
 0x50b   : > { %v3866_v59 = vmin.f32 %v3822_v18, 6.4  ;;  %v3867_v0 = vmin.f32 %v3823_v56, 6.4  ;;  %v3780_v13 = vmax.f32 %v3564_v6, %v3696_v24  ;;  %v3781_v21 = vmax.f32 %v3565_v49, %v3697_v2 }
 0x50c   : > { %v3571_v18 = vmax.f32 %v6275_v27, %v3486_v45  ;;  %v3488_v24 = vsel %vm259_vm1, %v6610_v1, %v6612_v29  ;;  %v3489_v1 = vsel %vm259_vm1, %v6612_v29, %v6618_v41 }
 0x50d   : > { %v3824_v63 = vmax.f32 %v3780_v13, 0.0  ;;  %v3825_v4 = vmax.f32 %v3781_v21, 0.0  ;;  %v3622_v46 = vpop.permute.xlu1 %3621  ;;  %3959 = vrot.lane.b32.xlu0 %v3866_v59, %s4587_s21  ;;  %3961 = vrot.lane.b32.xlu1 %v3867_v0, %s4587_s21  ;;  %v3624_v62 = vpop.permute.xlu0 %3623  ;;  %v3572_v21 = vmax.f32 %v6277_v14, %v3487_v60  ;;  %v3495_v60 = vsel %vm259_vm1, %v6642_v37, %v6644_v31 }
 0x50e   : > { %v3698_v53 = vsel %vm329_vm2, %v3620_v11, %v3622_v46  ;;  %v3783_v25 = vmax.f32 %v3567_v15, %v3622_v46  ;;  %v3573_v15 = vmax.f32 %v6293_v38, %v3488_v24  ;;  %v3490_v46 = vsel %vm259_vm1, %v6618_v41, %v6620_v10 }
 0x50f   : > { %v3868_v36 = vmin.f32 %v3824_v63, 6.4  ;;  %v3869_v61 = vmin.f32 %v3825_v4, 6.4  ;;  %v3782_v9 = vmax.f32 %v3566_v54, %v3698_v53  ;;  %v3491_v41 = vsel %vm259_vm1, %v6620_v10, %v6626_v39 }
 0x510   : > { %v3827_v22 = vmax.f32 %v3783_v25, 0.0  ;;  %v3574_v25 = vmax.f32 %v6295_v42, %v3489_v1  ;;  %v3576_v45 = vmax.f32 %v6310_v40, %v3491_v41 }
 0x511   : > { %v3826_v7 = vmax.f32 %v3782_v9, 0.0  ;;  %v3626_v47 = vpop.permute.xlu1 %3625  ;;  %3963 = vrot.lane.b32.xlu0 %v3868_v36, %s4587_s21  ;;  %3965 = vrot.lane.b32.xlu1 %v3869_v61, %s4587_s21  ;;  %v3628_v48 = vpop.permute.xlu0 %3627  ;;  %v3575_v36 = vmax.f32 %v6308_v58, %v3490_v46 }
 0x512   : > { %v3871_v43 = vmin.f32 %v3827_v22, 6.4  ;;  %v3699_v12 = vsel %vm329_vm2, %v3624_v62, %v3626_v47  ;;  %v3700_v57 = vsel %vm329_vm2, %v3626_v47, %v3628_v48 }
 0x513   : > { %v3870_v20 = vmin.f32 %v3826_v7, 6.4  ;;  %v3784_v6 = vmax.f32 %v3568_v8, %v3699_v12  ;;  %v3785_v49 = vmax.f32 %v3569_v34, %v3700_v57  ;;  %v3492_v8 = vsel %vm259_vm1, %v6626_v39, %v6628_v35 }
 0x515   : > { %v3828_v56 = vmax.f32 %v3784_v6, 0.0  ;;  %v3829_v51 = vmax.f32 %v3785_v49, 0.0  ;;  %v3630_v11 = vpop.permute.xlu1 %3629  ;;  %3967 = vrot.lane.b32.xlu0 %v3870_v20, %s4587_s21  ;;  %3969 = vrot.lane.b32.xlu1 %v3871_v43, %s4587_s21  ;;  %v3632_v30 = vpop.permute.xlu0 %3631  ;;  %v3577_v43 = vmax.f32 %v6326_v5, %v3492_v8  ;;  %v3493_v20 = vsel %vm259_vm1, %v6634_v17, %v6636_v26 }
 0x516   : > { %v3701_v33 = vsel %vm329_vm2, %v3628_v48, %v3630_v11  ;;  %v3702_v27 = vsel %vm329_vm2, %v3630_v11, %v3632_v30  ;;  %v3578_v48 = vmax.f32 %v6328_v44, %v6628_v35  ;;  %v3494_v17 = vsel %vm259_vm1, %v6636_v26, %v6642_v37 }
 0x517   : > { %v3872_v2 = vmin.f32 %v3828_v56, 6.4  ;;  %v3873_v59 = vmin.f32 %v3829_v51, 6.4  ;;  %v3786_v0 = vmax.f32 %v3570_v23, %v3701_v33  ;;  %v3787_v13 = vmax.f32 %v3571_v18, %v3702_v27 }
 0x518   : > { %v3579_v18 = vmax.f32 %v6343_v28, %v3493_v20  ;;  %v7217_v20 = vld [vmem:[#allocation32_spill] sm:$0xff] }
 0x519   : > { %v3830_v54 = vmax.f32 %v3786_v0, 0.0  ;;  %v3831_v63 = vmax.f32 %v3787_v13, 0.0  ;;  %v3634_v4 = vpop.permute.xlu1 %3633  ;;  %3971 = vrot.lane.b32.xlu0 %v3872_v2, %s4587_s21  ;;  %3973 = vrot.lane.b32.xlu1 %v3873_v59, %s4587_s21  ;;  %v3636_v55 = vpop.permute.xlu0 %3635  ;;  %v3580_v59 = vmax.f32 %v6345_v52, %v3494_v17  ;;  %v3581_v0 = vmax.f32 %v6361_v16, %v3495_v60 }
 0x51a   : > { %v3703_v14 = vsel %vm329_vm2, %v3632_v30, %v3634_v4  ;;  %v3704_v38 = vsel %vm329_vm2, %v3634_v4, %v3636_v55 }
 0x51b   : > { %v3874_v62 = vmin.f32 %v3830_v54, 6.4  ;;  %v3875_v32 = vmin.f32 %v3831_v63, 6.4  ;;  %v3788_v50 = vmax.f32 %v3572_v21, %v3703_v14  ;;  %v3789_v53 = vmax.f32 %v3573_v15, %v3704_v38  ;;  %v7208_v15 = vld [vmem:[#allocation8_spill] sm:$0xff]  ;;  %v7209_v54 = vld [vmem:[#allocation30_spill] sm:$0xff] }
 0x51c   : > { %v3496_v37 = vsel %vm259_vm1, %v6644_v31, %v7208_v15  ;;  %v3497_v63 = vsel %vm259_vm1, %v7208_v15, %v7209_v54  ;;  %v7210_v14 = vld [vmem:[#allocation22_spill] sm:$0xff] }
 0x51d   : > { %v3832_v61 = vmax.f32 %v3788_v50, 0.0  ;;  %v3833_v9 = vmax.f32 %v3789_v53, 0.0  ;;  %v3638_v22 = vpop.permute.xlu1 %3637  ;;  %3975 = vrot.lane.b32.xlu0 %v3874_v62, %s4587_s21  ;;  %3977 = vrot.lane.b32.xlu1 %v3875_v32, %s4587_s21  ;;  %v3640_v29 = vpop.permute.xlu0 %3639  ;;  %v3582_v38 = vmax.f32 %v7210_v14, %v3496_v37  ;;  %v7211_v62 = vld [vmem:[#allocation25_spill] sm:$0xff]  ;;  %v7222_v37 = vld [vmem:[#allocation11_spill] sm:$0xff] }
 0x51e   : > { %v3705_v42 = vsel %vm329_vm2, %v3636_v55, %v3638_v22  ;;  %v3706_v58 = vsel %vm329_vm2, %v3638_v22, %v3640_v29  ;;  %v3583_v32 = vmax.f32 %v7211_v62, %v3497_v63 }
 0x51f   : > { %v3876_v34 = vmin.f32 %v3832_v61, 6.4  ;;  %v3877_v3 = vmin.f32 %v3833_v9, 6.4  ;;  %v3790_v7 = vmax.f32 %v3574_v25, %v3705_v42  ;;  %v3791_v47 = vmax.f32 %v3575_v36, %v3706_v58  ;;  %v7212_v36 = vld [vmem:[#allocation35_spill] sm:$0xff]  ;;  %v7213_v9 = vld [vmem:[#allocation5_spill] sm:$0xff] }
 0x520   : > { %v3498_v61 = vsel %vm259_vm1, %v7209_v54, %v7212_v36  ;;  %v3499_v22 = vsel %vm259_vm1, %v7212_v36, %v7213_v9  ;;  %v7226_v36 = vld [vmem:[#allocation34_spill] sm:$0xff] }
 0x521   : > { %v3834_v10 = vmax.f32 %v3790_v7, 0.0  ;;  %v3835_v12 = vmax.f32 %v3791_v47, 0.0  ;;  %v3642_v57 = vpop.permute.xlu1 %3641  ;;  %3979 = vrot.lane.b32.xlu0 %v3876_v34, %s4587_s21  ;;  %3981 = vrot.lane.b32.xlu1 %v3877_v3, %s4587_s21  ;;  %v3644_v39 = vpop.permute.xlu0 %3643  ;;  %v7214_v3 = vld [vmem:[#allocation4_spill] sm:$0xff]  ;;  %v7215_v47 = vld [vmem:[#allocation9_spill] sm:$0xff] }
 0x522   : > { %v3707_v6 = vsel %vm329_vm2, %v3640_v29, %v3642_v57  ;;  %v3708_v44 = vsel %vm329_vm2, %v3642_v57, %v3644_v39  ;;  %v3794_v35 = vmax.f32 %v3578_v48, %v3644_v39  ;;  %v3584_v7 = vmax.f32 %v7214_v3, %v3498_v61  ;;  %v7216_v57 = vld [vmem:[#allocation6_spill] sm:$0xff]  ;;  %v7227_v61 = vld [vmem:[#allocation29_spill] sm:$0xff] }
 0x523   : > { %v3878_v40 = vmin.f32 %v3834_v10, 6.4  ;;  %v3879_v49 = vmin.f32 %v3835_v12, 6.4  ;;  %v3792_v5 = vmax.f32 %v3576_v45, %v3707_v6  ;;  %v3793_v23 = vmax.f32 %v3577_v43, %v3708_v44 }
 0x524   : > { %v3838_v28 = vmax.f32 %v3794_v35, 0.0  ;;  %v3585_v48 = vmax.f32 %v7215_v47, %v3499_v22  ;;  %v3500_v39 = vsel %vm259_vm1, %v7213_v9, %v7216_v57  ;;  %v3501_v6 = vsel %vm259_vm1, %v7216_v57, %v7217_v20  ;;  %v7228_v47 = vld [vmem:[#allocation38_spill] sm:$0xff] }
 0x525   : > { %v3836_v56 = vmax.f32 %v3792_v5, 0.0  ;;  %v3837_v51 = vmax.f32 %v3793_v23, 0.0  ;;  %v3646_v11 = vpop.permute.xlu1 %3645  ;;  %3983 = vrot.lane.b32.xlu0 %v3878_v40, %s4587_s21  ;;  %3985 = vrot.lane.b32.xlu1 %v3879_v49, %s4587_s21  ;;  %v3648_v30 = vpop.permute.xlu0 %3647  ;;  %v3591_v9 = vmax.f32 %v7227_v61, %v7226_v36  ;;  %v7243_v61 = vld [vmem:[#allocation40_spill] sm:$0xff] }
 0x526   : > { %v3709_v24 = vsel %vm329_vm2, %v3646_v11, %v3648_v30  ;;  %v3882_v16 = vmin.f32 %v3838_v28, 6.4 }
 0x527   : > { %v3880_v33 = vmin.f32 %v3836_v56, 6.4  ;;  %v3881_v27 = vmin.f32 %v3837_v51, 6.4  ;;  %v3795_v2 = vmax.f32 %v3579_v18, %v3709_v24  ;;  %v7218_v18 = vld [vmem:[#allocation23_spill] sm:$0xff] }
 0x528   : > { %v3586_v56 = vmax.f32 %v7218_v18, %v3500_v39  ;;  %v7219_v51 = vld [vmem:[#allocation27_spill] sm:$0xff] }
 0x529   : > { %v3839_v13 = vmax.f32 %v3795_v2, 0.0  ;;  %v3650_v21 = vpop.permute.xlu1 %3649  ;;  %3987 = vrot.lane.b32.xlu0 %v3880_v33, %s4587_s21  ;;  %3989 = vrot.lane.b32.xlu1 %v3881_v27, %s4587_s21  ;;  %v3652_v26 = vpop.permute.xlu0 %3651  ;;  %v3587_v11 = vmax.f32 %v7219_v51, %v3501_v6  ;;  %v7220_v33 = vld [vmem:[#allocation37_spill] sm:$0xff]  ;;  %v7232_v18 = vld [vmem:[#allocation31_spill] sm:$0xff]  ;;  %v7234_v51 = vld [vmem:[#allocation26_spill] sm:$0xff] }
 0x52a   : > { %v3710_v4 = vsel %vm329_vm2, %v3648_v30, %v3650_v21  ;;  %v3711_v52 = vsel %vm329_vm2, %v3650_v21, %v3652_v26  ;;  %v3502_v28 = vsel %vm259_vm1, %v7217_v20, %v7220_v33 }
 0x52b   : > { %v3883_v55 = vmin.f32 %v3839_v13, 6.4  ;;  %v3796_v1 = vmax.f32 %v3580_v59, %v3710_v4  ;;  %v3797_v46 = vmax.f32 %v3581_v0, %v3711_v52  ;;  %v3588_v54 = vmax.f32 %v7222_v37, %v3502_v28  ;;  %v7238_v37 = vld [vmem:[#allocation19_spill] sm:$0xff] }
 0x52d   : > { %v3840_v50 = vmax.f32 %v3796_v1, 0.0  ;;  %v3841_v53 = vmax.f32 %v3797_v46, 0.0  ;;  %v3654_v25 = vpop.permute.xlu1 %3653  ;;  %3991 = vrot.lane.b32.xlu0 %v3882_v16, %s4587_s21  ;;  %3993 = vrot.lane.b32.xlu1 %v3883_v55, %s4587_s21  ;;  %v3656_v31 = vpop.permute.xlu0 %3655  ;;  %v7223_v55 = vld [vmem:[#allocation15_spill] sm:$0xff]  ;;  %v7224_v1 = vld [vmem:[#allocation13_spill] sm:$0xff] }
 0x52e   : > { %v3712_v29 = vsel %vm329_vm2, %v3652_v26, %v3654_v25  ;;  %v3713_v41 = vsel %vm329_vm2, %v3654_v25, %v3656_v31  ;;  %v7221_v26 = vld [vmem:[#allocation10_spill] sm:$0xff]  ;;  %v3503_v46 = vsel %vm259_vm1, %v7224_v1, %v7223_v55  ;;  %v7225_v25 = vld [vmem:[#allocation24_spill] sm:$0xff]  ;;  %vm4037_vm1 = vcmask 310272  }
 0x52f   : > { %v3884_v8 = vmin.f32 %v3840_v50, 6.4  ;;  %v3885_v42 = vmin.f32 %v3841_v53, 6.4  ;;  %v3798_v58 = vmax.f32 %v3582_v38, %v3712_v29  ;;  %v3799_v34 = vmax.f32 %v3583_v32, %v3713_v41 }
 0x530   : > { %v3589_v15 = vmax.f32 %v7221_v26, %v7220_v33 }
 0x531   : > { %v3842_v45 = vmax.f32 %v3798_v58, 0.0  ;;  %v3843_v43 = vmax.f32 %v3799_v34, 0.0  ;;  %v3658_v10 = vpop.permute.xlu1 %3657  ;;  %3995 = vrot.lane.b32.xlu0 %v3884_v8, %s4587_s21  ;;  %3997 = vrot.lane.b32.xlu1 %v3885_v42, %s4587_s21  ;;  %v3660_v12 = vpop.permute.xlu0 %3659 }
 0x532   : > { %v3714_v44 = vsel %vm329_vm2, %v3656_v31, %v3658_v10  ;;  %v3715_v35 = vsel %vm329_vm2, %v3658_v10, %v3660_v12  ;;  %v3590_v31 = vmax.f32 %v7225_v25, %v3503_v46  ;;  %v7241_v25 = vld [vmem:[#allocation39_spill] sm:$0xff] }
 0x533   : > { %v3886_v40 = vmin.f32 %v3842_v45, 6.4  ;;  %v3887_v49 = vmin.f32 %v3843_v43, 6.4  ;;  %v3800_v5 = vmax.f32 %v3584_v7, %v3714_v44  ;;  %v3801_v23 = vmax.f32 %v3585_v48, %v3715_v35  ;;  %v7229_v48 = vld [vmem:[#allocation12_spill] sm:$0xff]  ;;  %v7230_v43 = vld [vmem:[#allocation17_spill] sm:$0xff] }
 0x534   : > { %v3592_v45 = vmax.f32 %v7229_v48, %v7228_v47  ;;  %v3593_v10 = vmax.f32 %v7230_v43, %v6684_v19  ;;  %v7233_v19 = vld [vmem:[#allocation16_spill] sm:$0xff] }
 0x535   : > { %v3844_v30 = vmax.f32 %v3800_v5, 0.0  ;;  %v3845_v17 = vmax.f32 %v3801_v23, 0.0  ;;  %v3662_v60 = vpop.permute.xlu1 %3661  ;;  %3999 = vrot.lane.b32.xlu0 %v3886_v40, %s4587_s21  ;;  %4001 = vrot.lane.b32.xlu1 %v3887_v49, %s4587_s21  ;;  %v3664_v24 = vpop.permute.xlu0 %3663  ;;  %v7231_v23 = vld [vmem:[#allocation14_spill] sm:$0xff] }
 0x536   : > { %v3716_v27 = vsel %vm329_vm2, %v3660_v12, %v3662_v60  ;;  %v3717_v2 = vsel %vm329_vm2, %v3662_v60, %v3664_v24 }
 0x537   : > { %v3888_v59 = vmin.f32 %v3844_v30, 6.4  ;;  %v3889_v0 = vmin.f32 %v3845_v17, 6.4  ;;  %v3802_v13 = vmax.f32 %v3586_v56, %v3716_v27  ;;  %v3803_v21 = vmax.f32 %v3587_v11, %v3717_v2 }
 0x538   : > { %v3594_v56 = vmax.f32 %v7232_v18, %v7231_v23  ;;  %v3595_v11 = vmax.f32 %v7234_v51, %v7233_v19 }
 0x539   : > { %v3846_v63 = vmax.f32 %v3802_v13, 0.0  ;;  %v3847_v4 = vmax.f32 %v3803_v21, 0.0  ;;  %v3666_v52 = vpop.permute.xlu1 %3665  ;;  %4003 = vrot.lane.b32.xlu0 %v3888_v59, %s4587_s21  ;;  %4005 = vrot.lane.b32.xlu1 %v3889_v0, %s4587_s21  ;;  %v3668_v16 = vpop.permute.xlu0 %3667  ;;  %v7235_v13 = vld [vmem:[#allocation36_spill] sm:$0xff] }
 0x53a   : > { %v3718_v14 = vsel %vm329_vm2, %v3664_v24, %v3666_v52  ;;  %v3805_v38 = vmax.f32 %v3589_v15, %v3666_v52  ;;  %v7236_v21 = vld [vmem:[#allocation20_spill] sm:$0xff]  ;;  %v7237_v15 = vld [vmem:[#allocation18_spill] sm:$0xff] }
 0x53b   : > { %v3890_v62 = vmin.f32 %v3846_v63, 6.4  ;;  %v3891_v32 = vmin.f32 %v3847_v4, 6.4  ;;  %v3804_v50 = vmax.f32 %v3588_v54, %v3718_v14  ;;  %v3596_v26 = vmax.f32 %v7236_v21, %v7235_v13 }
 0x53c   : > { %v3849_v53 = vmax.f32 %v3805_v38, 0.0  ;;  %v3597_v54 = vmax.f32 %v7238_v37, %v7237_v15 }
 0x53d   : > { %v3848_v22 = vmax.f32 %v3804_v50, 0.0  ;;  %v3670_v29 = vpop.permute.xlu1 %3669  ;;  %4007 = vrot.lane.b32.xlu0 %v3890_v62, %s4587_s21  ;;  %4009 = vrot.lane.b32.xlu1 %v3891_v32, %s4587_s21  ;;  %v3672_v41 = vpop.permute.xlu0 %3671  ;;  %v7239_v32 = vld [vmem:[#allocation21_spill] sm:$0xff]  ;;  %v7240_v50 = vld [vmem:[#allocation7_spill] sm:$0xff] }
 0x53e   : > { %v3893_v8 = vmin.f32 %v3849_v53, 6.4  ;;  %v3719_v42 = vsel %vm329_vm2, %v3668_v16, %v3670_v29  ;;  %v3720_v58 = vsel %vm329_vm2, %v3670_v29, %v3672_v41  ;;  %v3600_v53 = vmax.f32 %v7240_v50, %v7239_v32 }
 0x53f   : > { %v3892_v34 = vmin.f32 %v3848_v22, 6.4  ;;  %v3806_v3 = vmax.f32 %v3590_v31, %v3719_v42  ;;  %v3807_v7 = vmax.f32 %v3591_v9, %v3720_v58  ;;  %v7242_v31 = vld [vmem:[#allocation28_spill] sm:$0xff]  ;;  %v7244_v9 = vld [vmem:[#allocation33_spill] sm:$0xff] }
 0x540   : > { %v3598_v36 = vmax.f32 %v7242_v31, %v7241_v25  ;;  %v3599_v22 = vmax.f32 %v7244_v9, %v7243_v61 }
 0x541   : > { %v3850_v12 = vmax.f32 %v3806_v3, 0.0  ;;  %v3851_v57 = vmax.f32 %v3807_v7, 0.0  ;;  %v3674_v39 = vpop.permute.xlu1 %3673  ;;  %4011 = vrot.lane.b32.xlu0 %v3892_v34, %s4587_s21  ;;  %4013 = vrot.lane.b32.xlu1 %v3893_v8, %s4587_s21  ;;  %v3676_v20 = vpop.permute.xlu0 %3675 }
 0x542   : > { %v3721_v6 = vsel %vm329_vm2, %v3672_v41, %v3674_v39  ;;  %v3722_v44 = vsel %vm329_vm2, %v3674_v39, %v3676_v20 }
 0x543   : > { %v3894_v35 = vmin.f32 %v3850_v12, 6.4  ;;  %v3895_v40 = vmin.f32 %v3851_v57, 6.4  ;;  %v3808_v49 = vmax.f32 %v3592_v45, %v3721_v6  ;;  %v3809_v5 = vmax.f32 %v3593_v10, %v3722_v44 }
 0x545   : > { %v3852_v30 = vmax.f32 %v3808_v49, 0.0  ;;  %v3853_v17 = vmax.f32 %v3809_v5, 0.0  ;;  %v3678_v60 = vpop.permute.xlu1 %3677  ;;  %4015 = vrot.lane.b32.xlu0 %v3894_v35, %s4587_s21  ;;  %4017 = vrot.lane.b32.xlu1 %v3895_v40, %s4587_s21  ;;  %v3680_v24 = vpop.permute.xlu0 %3679 }
 0x546   : > { %v3723_v33 = vsel %vm329_vm2, %v3676_v20, %v3678_v60  ;;  %v3724_v28 = vsel %vm329_vm2, %v3678_v60, %v3680_v24 }
 0x547   : > { %v3896_v27 = vmin.f32 %v3852_v30, 6.4  ;;  %v3897_v2 = vmin.f32 %v3853_v17, 6.4  ;;  %v3810_v59 = vmax.f32 %v3594_v56, %v3723_v33  ;;  %v3811_v0 = vmax.f32 %v3595_v11, %v3724_v28 }
 0x549   : > { %v3854_v63 = vmax.f32 %v3810_v59, 0.0  ;;  %v3855_v4 = vmax.f32 %v3811_v0, 0.0  ;;  %v3682_v52 = vpop.permute.xlu1 %3681  ;;  %4019 = vrot.lane.b32.xlu0 %v3896_v27, %s4587_s21  ;;  %4021 = vrot.lane.b32.xlu1 %v3897_v2, %s4587_s21  ;;  %v3684_v16 = vpop.permute.xlu0 %3683 }
 0x54a   : > { %v3725_v55 = vsel %vm329_vm2, %v3680_v24, %v3682_v52  ;;  %v3726_v1 = vsel %vm329_vm2, %v3682_v52, %v3684_v16 }
 0x54b   : > { %v3898_v46 = vmin.f32 %v3854_v63, 6.4  ;;  %v3899_v14 = vmin.f32 %v3855_v4, 6.4  ;;  %v3812_v38 = vmax.f32 %v3596_v26, %v3725_v55  ;;  %v3813_v62 = vmax.f32 %v3597_v54, %v3726_v1 }
 0x54d   : > { %v3856_v29 = vmax.f32 %v3812_v38, 0.0  ;;  %v3857_v41 = vmax.f32 %v3813_v62, 0.0  ;;  %v3686_v8 = vpop.permute.xlu1 %3685  ;;  %4023 = vrot.lane.b32.xlu0 %v3898_v46, %s4587_s21  ;;  %4025 = vrot.lane.b32.xlu1 %v3899_v14, %s4587_s21  ;;  %v3688_v42 = vpop.permute.xlu0 %3687 }
 0x54e   : > { %v3727_v58 = vsel %vm329_vm2, %v3684_v16, %v3686_v8  ;;  %v3728_v34 = vsel %vm329_vm2, %v3686_v8, %v3688_v42  ;;  %v3816_v3 = vmax.f32 %v3600_v53, %v3688_v42 }
 0x54f   : > { %v3900_v7 = vmin.f32 %v3856_v29, 6.4  ;;  %v3901_v47 = vmin.f32 %v3857_v41, 6.4  ;;  %v3814_v48 = vmax.f32 %v3598_v36, %v3727_v58  ;;  %v3815_v45 = vmax.f32 %v3599_v22, %v3728_v34 }
 0x550   : > { %v3860_v57 = vmax.f32 %v3816_v3, 0.0 }
 0x551   : > { %v3858_v43 = vmax.f32 %v3814_v48, 0.0  ;;  %v3859_v10 = vmax.f32 %v3815_v45, 0.0  ;;  %4027 = vrot.lane.b32.xlu0 %v3900_v7, %s4587_s21  ;;  %4029 = vrot.lane.b32.xlu1 %v3901_v47, %s4587_s21 }
 0x552   : > { %v3904_v20 = vmin.f32 %v3860_v57, 6.4 }
 0x553   : > { %v3902_v12 = vmin.f32 %v3858_v43, 6.4  ;;  %v3903_v39 = vmin.f32 %v3859_v10, 6.4 }
 0x555   : > { %4031 = vrot.lane.b32.xlu0 %v3902_v12, %s4587_s21  ;;  %4033 = vrot.lane.b32.xlu1 %v3903_v39, %s4587_s21 }
 0x559   : > { %4035 = vrot.lane.b32.xlu0 %v3904_v20, %s4587_s21 }
 0x573   : > { %v3950_v6 = vpop.permute.xlu1 %3949 }
 0x577   : > { %v3952_v44 = vpop.permute.xlu0 %3951  ;;  %v3954_v35 = vpop.permute.xlu1 %3953 }
 0x578   : > { %v4038_v40 = vsel %vm4037_vm1, %v3950_v6, %v3952_v44  ;;  %v4039_v49 = vsel %vm4037_vm1, %v3952_v44, %v3954_v35 }
 0x579   : > { %4118 = vst [vmem:[%s6945_s9] sm:$0xff] %v4038_v40  ;;  %4119 = vst [vmem:[%s6945_s9 + $0x8] sm:$0xff] %v4039_v49 }
 0x57b   : > { %v3956_v5 = vpop.permute.xlu0 %3955  ;;  %v3958_v23 = vpop.permute.xlu1 %3957 }
 0x57c   : > { %v4040_v18 = vsel %vm4037_vm1, %v3954_v35, %v3956_v5  ;;  %v4041_v56 = vsel %vm4037_vm1, %v3956_v5, %v3958_v23 }
 0x57d   : > { %4120 = vst [vmem:[%s6945_s9 + $0x10] sm:$0xff] %v4040_v18  ;;  %4121 = vst [vmem:[%s6945_s9 + $0x18] sm:$0xff] %v4041_v56 }
 0x57f   : > { %v3960_v19 = vpop.permute.xlu0 %3959  ;;  %v3962_v51 = vpop.permute.xlu1 %3961 }
 0x580   : > { %v4042_v11 = vsel %vm4037_vm1, %v3958_v23, %v3960_v19  ;;  %v4043_v30 = vsel %vm4037_vm1, %v3960_v19, %v3962_v51 }
 0x581   : > { %4122 = vst [vmem:[%s6945_s9 + $0x20] sm:$0xff] %v4042_v11  ;;  %4123 = vst [vmem:[%s6945_s9 + $0x28] sm:$0xff] %v4043_v30 }
 0x583   : > { %v3964_v17 = vpop.permute.xlu0 %3963  ;;  %v3966_v60 = vpop.permute.xlu1 %3965 }
 0x584   : > { %v4044_v24 = vsel %vm4037_vm1, %v3962_v51, %v3964_v17  ;;  %v4045_v33 = vsel %vm4037_vm1, %v3964_v17, %v3966_v60 }
 0x585   : > { %4124 = vst [vmem:[%s6945_s9 + $0x30] sm:$0xff] %v4044_v24  ;;  %4125 = vst [vmem:[%s6945_s9 + $0x38] sm:$0xff] %v4045_v33 }
 0x587   : > { %v3968_v28 = vpop.permute.xlu0 %3967  ;;  %v3970_v27 = vpop.permute.xlu1 %3969 }
 0x588   : > { %v4046_v2 = vsel %vm4037_vm1, %v3966_v60, %v3968_v28  ;;  %v4047_v59 = vsel %vm4037_vm1, %v3968_v28, %v3970_v27 }
 0x589   : > { %4126 = vst [vmem:[%s6945_s9 + $0x40] sm:$0xff] %v4046_v2  ;;  %4127 = vst.msk [vmem:[%s6945_s9 + $0x48] sm:$0xff] %vm217_vm0, %v4047_v59 }
 0x58b   : > { %v3972_v0 = vpop.permute.xlu0 %3971  ;;  %v3974_v13 = vpop.permute.xlu1 %3973 }
 0x58c   : > { %v4048_v21 = vsel %vm4037_vm1, %v3972_v0, %v3974_v13 }
 0x58d   : > { %4128 = vst [vmem:[%s6945_s9 + $0x50] sm:$0xff] %v4048_v21 }
 0x58f   : > { %v3976_v26 = vpop.permute.xlu0 %3975  ;;  %v3978_v15 = vpop.permute.xlu1 %3977 }
 0x590   : > { %v4049_v37 = vsel %vm4037_vm1, %v3974_v13, %v3976_v26  ;;  %v4050_v54 = vsel %vm4037_vm1, %v3976_v26, %v3978_v15 }
 0x591   : > { %4129 = vst [vmem:[%s6945_s9 + $0x58] sm:$0xff] %v4049_v37  ;;  %4130 = vst [vmem:[%s6945_s9 + $0x60] sm:$0xff] %v4050_v54 }
 0x593   : > { %v3980_v63 = vpop.permute.xlu0 %3979  ;;  %v3982_v4 = vpop.permute.xlu1 %3981 }
 0x594   : > { %v4051_v52 = vsel %vm4037_vm1, %v3978_v15, %v3980_v63  ;;  %v4052_v16 = vsel %vm4037_vm1, %v3980_v63, %v3982_v4 }
 0x595   : > { %4131 = vst [vmem:[%s6945_s9 + $0x68] sm:$0xff] %v4051_v52  ;;  %4132 = vst [vmem:[%s6945_s9 + $0x70] sm:$0xff] %v4052_v16 }
 0x597   : > { %v3984_v55 = vpop.permute.xlu0 %3983  ;;  %v3986_v1 = vpop.permute.xlu1 %3985 }
 0x598   : > { %v4053_v46 = vsel %vm4037_vm1, %v3982_v4, %v3984_v55  ;;  %v4054_v14 = vsel %vm4037_vm1, %v3984_v55, %v3986_v1 }
 0x599   : > { %4133 = vst [vmem:[%s6945_s9 + $0x78] sm:$0xff] %v4053_v46  ;;  %4134 = vst [vmem:[%s6945_s9 + $0x80] sm:$0xff] %v4054_v14 }
 0x59b   : > { %v3988_v38 = vpop.permute.xlu0 %3987  ;;  %v3990_v62 = vpop.permute.xlu1 %3989 }
 0x59c   : > { %v4055_v32 = vsel %vm4037_vm1, %v3986_v1, %v3988_v38  ;;  %v4056_v50 = vsel %vm4037_vm1, %v3988_v38, %v3990_v62 }
 0x59d   : > { %4135 = vst [vmem:[%s6945_s9 + $0x88] sm:$0xff] %v4055_v32  ;;  %4136 = vst [vmem:[%s6945_s9 + $0x90] sm:$0xff] %v4056_v50 }
 0x59f   : > { %v3992_v53 = vpop.permute.xlu0 %3991  ;;  %v3994_v25 = vpop.permute.xlu1 %3993 }
 0x5a0   : > { %v4057_v31 = vsel %vm4037_vm1, %v3990_v62, %v3992_v53 }
 0x5a1   : > { %4137 = vst.msk [vmem:[%s6945_s9 + $0x98] sm:$0xff] %vm217_vm0, %v4057_v31 }
 0x5a3   : > { %v3996_v36 = vpop.permute.xlu0 %3995  ;;  %v3998_v61 = vpop.permute.xlu1 %3997 }
 0x5a4   : > { %v4058_v9 = vsel %vm4037_vm1, %v3994_v25, %v3996_v36  ;;  %v4059_v22 = vsel %vm4037_vm1, %v3996_v36, %v3998_v61 }
 0x5a5   : > { %4138 = vst [vmem:[%s6945_s9 + $0xa0] sm:$0xff] %v4058_v9  ;;  %4139 = vst [vmem:[%s6945_s9 + $0xa8] sm:$0xff] %v4059_v22 }
 0x5a7   : > { %v4000_v29 = vpop.permute.xlu0 %3999  ;;  %v4002_v41 = vpop.permute.xlu1 %4001 }
 0x5a8   : > { %v4060_v8 = vsel %vm4037_vm1, %v3998_v61, %v4000_v29  ;;  %v4061_v42 = vsel %vm4037_vm1, %v4000_v29, %v4002_v41 }
 0x5a9   : > { %4140 = vst [vmem:[%s6945_s9 + $0xb0] sm:$0xff] %v4060_v8  ;;  %4141 = vst [vmem:[%s6945_s9 + $0xb8] sm:$0xff] %v4061_v42 }
 0x5ab   : > { %v4004_v58 = vpop.permute.xlu0 %4003  ;;  %v4006_v34 = vpop.permute.xlu1 %4005 }
 0x5ac   : > { %v4062_v3 = vsel %vm4037_vm1, %v4002_v41, %v4004_v58  ;;  %v4063_v7 = vsel %vm4037_vm1, %v4004_v58, %v4006_v34 }
 0x5ad   : > { %4142 = vst [vmem:[%s6945_s9 + $0xc0] sm:$0xff] %v4062_v3  ;;  %4143 = vst [vmem:[%s6945_s9 + $0xc8] sm:$0xff] %v4063_v7 }
 0x5af   : > { %v4008_v47 = vpop.permute.xlu0 %4007  ;;  %v4010_v48 = vpop.permute.xlu1 %4009 }
 0x5b0   : > { %v4064_v45 = vsel %vm4037_vm1, %v4006_v34, %v4008_v47  ;;  %v4065_v43 = vsel %vm4037_vm1, %v4008_v47, %v4010_v48 }
 0x5b1   : > { %4144 = vst [vmem:[%s6945_s9 + $0xd0] sm:$0xff] %v4064_v45  ;;  %4145 = vst [vmem:[%s6945_s9 + $0xd8] sm:$0xff] %v4065_v43 }
 0x5b3   : > { %v4012_v10 = vpop.permute.xlu0 %4011  ;;  %v4014_v12 = vpop.permute.xlu1 %4013 }
 0x5b4   : > { %v4066_v57 = vsel %vm4037_vm1, %v4010_v48, %v4012_v10  ;;  %v4067_v39 = vsel %vm4037_vm1, %v4012_v10, %v4014_v12 }
 0x5b5   : > { %4146 = vst [vmem:[%s6945_s9 + $0xe0] sm:$0xff] %v4066_v57  ;;  %4147 = vst.msk [vmem:[%s6945_s9 + $0xe8] sm:$0xff] %vm217_vm0, %v4067_v39 }
 0x5b7   : > { %v4016_v20 = vpop.permute.xlu0 %4015  ;;  %v4018_v6 = vpop.permute.xlu1 %4017 }
 0x5b8   : > { %v4068_v44 = vsel %vm4037_vm1, %v4016_v20, %v4018_v6 }
 0x5b9   : > { %4148 = vst [vmem:[%s6945_s9 + $0xf0] sm:$0xff] %v4068_v44 }
 0x5bb   : > { %v4020_v35 = vpop.permute.xlu0 %4019  ;;  %v4022_v40 = vpop.permute.xlu1 %4021 }
 0x5bc   : > { %v4069_v49 = vsel %vm4037_vm1, %v4018_v6, %v4020_v35  ;;  %v4070_v5 = vsel %vm4037_vm1, %v4020_v35, %v4022_v40 }
 0x5bd   : > { %4149 = vst [vmem:[%s6945_s9 + $0xf8] sm:$0xff] %v4069_v49  ;;  %4150 = vst [vmem:[%s6945_s9 + $0x100] sm:$0xff] %v4070_v5 }
 0x5bf   : > { %v4024_v23 = vpop.permute.xlu0 %4023  ;;  %v4026_v18 = vpop.permute.xlu1 %4025 }
 0x5c0   : > { %v4071_v56 = vsel %vm4037_vm1, %v4022_v40, %v4024_v23  ;;  %v4072_v19 = vsel %vm4037_vm1, %v4024_v23, %v4026_v18 }
 0x5c1   : > { %4151 = vst [vmem:[%s6945_s9 + $0x108] sm:$0xff] %v4071_v56  ;;  %4152 = vst [vmem:[%s6945_s9 + $0x110] sm:$0xff] %v4072_v19 }
 0x5c3   : > { %v4028_v51 = vpop.permute.xlu0 %4027  ;;  %v4030_v11 = vpop.permute.xlu1 %4029 }
 0x5c4   : > { %v4073_v30 = vsel %vm4037_vm1, %v4026_v18, %v4028_v51  ;;  %v4074_v17 = vsel %vm4037_vm1, %v4028_v51, %v4030_v11 }
 0x5c5   : > { %4153 = vst [vmem:[%s6945_s9 + $0x118] sm:$0xff] %v4073_v30  ;;  %4154 = vst [vmem:[%s6945_s9 + $0x120] sm:$0xff] %v4074_v17 }
 0x5c7   : > { %v4032_v60 = vpop.permute.xlu0 %4031  ;;  %v4034_v24 = vpop.permute.xlu1 %4033 }
 0x5c8   : > { %v4075_v33 = vsel %vm4037_vm1, %v4030_v11, %v4032_v60  ;;  %v4076_v28 = vsel %vm4037_vm1, %v4032_v60, %v4034_v24 }
 0x5c9   : > { %4155 = vst [vmem:[%s6945_s9 + $0x128] sm:$0xff] %v4075_v33  ;;  %4156 = vst [vmem:[%s6945_s9 + $0x130] sm:$0xff] %v4076_v28 }
 0x5cb   : > { %v4036_v27 = vpop.permute.xlu0 %4035 }
 0x5cc   : > { %v4077_v2 = vsel %vm4037_vm1, %v4034_v24, %v4036_v27 }
 0x5cd   : > { %4157 = vst.msk [vmem:[%s6945_s9 + $0x138] sm:$0xff] %vm217_vm0, %v4077_v2 }
 0x5ce PF: > { %s14_s15 = sadd.s32 1, %s4559_s15  }
 0x5cf   : > { %p11_p4 = scmp.ge.s32.totalorder %s14_s15, 4  }
 0x5d1   :  { %13 = sbr.rel (!%p11_p4) target bundleno = 1 (0x1), region = 66 }

</bundles_post_ra>
